<compile_context>
chip_gen: v6e
topology: v6e:2x2x1
jax: 0.10.0
libtpu: 0.0.40
codegen_flags: <defaults>
</compile_context>

<pallas_src>
import numpy as np
import jax
import jax.numpy as jnp
from jax.experimental import pallas as pl
from jax.experimental.pallas import tpu as pltpu

D_IN = 256        # contrastive embedding dim
D_HID = 1024      # MLP hidden dim
NORM_EPS = 1e-12  # F.normalize eps
VMEM_LIMIT = 32 * 1024 * 1024  # explicit (> v5e's 16 MiB default, within v7x budget)


def _round_up(x, m):
    return (x + m - 1) // m * m


# ------------------------- Stage 1: MLP + L2 normalize ------------------------

def _mlp_proj_kernel(vis_ref, w1_ref, b1_ref, w2_ref, b2_ref, projn_ref):
    vis = vis_ref[...]                                       # (TM, 256) bf16
    # Linear -> ReLU (bf16 MXU operands, f32 accumulation; elementwise in f32)
    h = jnp.dot(vis, w1_ref[...], preferred_element_type=jnp.float32)
    h = jnp.maximum(h + b1_ref[...], 0.0)                    # (TM, 1024) f32
    proj = jnp.dot(h.astype(jnp.bfloat16), w2_ref[...],
                   preferred_element_type=jnp.float32) + b2_ref[...]  # (TM, 256) f32
    # L2 normalize (matches F.normalize: x / max(||x||, eps)) via rsqrt (EUP)
    sumsq = jnp.sum(proj * proj, axis=-1, keepdims=True)
    inv = jax.lax.rsqrt(jnp.maximum(sumsq, NORM_EPS * NORM_EPS))
    projn_ref[...] = (proj * inv).astype(jnp.bfloat16)


# --------------------- Stage 2: normalize memory + similarity -----------------

def _sim_kernel(scale_ref, bias_ref, mem_ref, projn_ref, out_ref):
    mem = mem_ref[...]                                       # (TQ, 256) f32
    sumsq = jnp.sum(mem * mem, axis=-1, keepdims=True)
    inv = jax.lax.rsqrt(jnp.maximum(sumsq, NORM_EPS * NORM_EPS))
    # Fold exp(logit_scale) into the normalized queries (cheaper than scaling
    # the (TQ, Nv) output), then cast to bf16 for the MXU.
    mem_n = (mem * (inv * scale_ref[0])).astype(jnp.bfloat16)
    sim = jax.lax.dot_general(
        mem_n, projn_ref[...],
        dimension_numbers=(((1,), (1,)), ((), ())),          # NT matmul, no transpose
        preferred_element_type=jnp.float32)                  # (TQ, Nv_pad) f32
    out_ref[...] = sim + bias_ref[0]


# --------------------------------- Wrapper ------------------------------------

def contrastive_embed(memory, visual_embed, params):
    """memory: (B, Nq, 256), visual_embed: (B, Nv, 256) -> logits (B, Nq, Nv)."""
    B, Nq, D = memory.shape
    Bv, Nv, Dv = visual_embed.shape
    assert D == D_IN and Dv == D_IN and Bv == B

    w1, b1, w2, b2, logit_scale, bias = params
    f32, bf16 = jnp.float32, jnp.bfloat16

    # ---- padding / tiling choices -------------------------------------------
    Nv_pad = _round_up(Nv, 128)          # lane-dense output columns
    Nq8 = _round_up(Nq, 8)
    TQ = min(256, Nq8)                   # query tile (256-aligned for big Nq)
    Nq_pad = _round_up(Nq8, TQ)

    R = B * Nv_pad                       # flattened rows for the MLP (big M)
    TM = 256 if R >= 256 else R
    R_pad = _round_up(R, TM)

    # ---- pad inputs ----------------------------------------------------------
    vis = jnp.zeros((B, Nv_pad, D_IN), bf16).at[:, :Nv, :].set(
        visual_embed.astype(bf16))
    vis_flat = vis.reshape(B * Nv_pad, D_IN)
    if R_pad > R:
        vis_flat = jnp.concatenate(
            [vis_flat, jnp.zeros((R_pad - R, D_IN), bf16)], axis=0)

    mem = jnp.zeros((B, Nq_pad, D_IN), f32).at[:, :Nq, :].set(memory.astype(f32))

    # ---- stage 1: projection MLP + L2 normalize over all visual rows --------
    proj_n_flat = pl.pallas_call(
        _mlp_proj_kernel,
        out_shape=jax.ShapeDtypeStruct((R_pad, D_IN), bf16),
        grid_spec=pltpu.PrefetchScalarGridSpec(
            num_scalar_prefetch=0,
            grid=(R_pad // TM,),
            in_specs=[
                pl.BlockSpec((TM, D_IN), lambda r: (r, 0)),      # visual rows (bf16)
                pl.BlockSpec((D_IN, D_HID), lambda r: (0, 0)),   # w1 (bf16, resident)
                pl.BlockSpec((1, D_HID), lambda r: (0, 0)),      # b1 (f32)
                pl.BlockSpec((D_HID, D_IN), lambda r: (0, 0)),   # w2 (bf16, resident)
                pl.BlockSpec((1, D_IN), lambda r: (0, 0)),       # b2 (f32)
            ],
            out_specs=pl.BlockSpec((TM, D_IN), lambda r: (r, 0)),
        ),
        compiler_params=pltpu.CompilerParams(
            dimension_semantics=("parallel",),
            vmem_limit_bytes=VMEM_LIMIT),
    )(vis_flat,
      w1.astype(bf16), b1.reshape(1, D_HID).astype(f32),
      w2.astype(bf16), b2.reshape(1, D_IN).astype(f32))

    proj_n = proj_n_flat[:B * Nv_pad].reshape(B, Nv_pad, D_IN)

    scale = jnp.exp(logit_scale).reshape(1).astype(f32)
    bias1 = jnp.reshape(bias, (1,)).astype(f32)

    # ---- stage 2: normalize memory + scaled similarity ----------------------
    logits = pl.pallas_call(
        _sim_kernel,
        out_shape=jax.ShapeDtypeStruct((B, Nq_pad, Nv_pad), f32),
        grid_spec=pltpu.PrefetchScalarGridSpec(
            num_scalar_prefetch=0,
            grid=(B, Nq_pad // TQ),
            in_specs=[
                pl.BlockSpec(memory_space=pltpu.MemorySpace.SMEM),  # exp(logit_scale)
                pl.BlockSpec(memory_space=pltpu.MemorySpace.SMEM),  # bias
                pl.BlockSpec((None, TQ, D_IN), lambda b, q: (b, q, 0)),      # memory
                pl.BlockSpec((None, Nv_pad, D_IN), lambda b, q: (b, 0, 0)),  # proj_n
            ],
            out_specs=pl.BlockSpec((None, TQ, Nv_pad), lambda b, q: (b, q, 0)),
        ),
        compiler_params=pltpu.CompilerParams(
            dimension_semantics=("parallel", "parallel"),
            vmem_limit_bytes=VMEM_LIMIT),
    )(scale, bias1, mem, proj_n)

    return logits[:, :Nq, :Nv]


# --------------------------------- Params / ref --------------------------------

def xavier_uniform(key, fan_in, fan_out):
    limit = float(np.sqrt(6.0 / (fan_in + fan_out)))
    return jax.random.uniform(key, (fan_in, fan_out), jnp.float32, -limit, limit)


def init_params(key):
    k1, k2 = jax.random.split(key, 2)
    # nn.Linear stores weight as (out, in); we keep (in, out) so kernel does x @ W.
    w1 = xavier_uniform(k1, D_IN, D_HID)      # Linear(256 -> 1024), xavier (dim > 1)
    b1 = jnp.zeros((D_HID,), jnp.float32)     # dim-1 params untouched by xavier init
    w2 = xavier_uniform(k2, D_HID, D_IN)      # Linear(1024 -> 256)
    b2 = jnp.zeros((D_IN,), jnp.float32)
    logit_scale = jnp.asarray(np.log(1.0 / 0.07), jnp.float32)
    bias = jnp.asarray(0.0, jnp.float32)
    return (w1, b1, w2, b2, logit_scale, bias)


def reference(memory, visual_embed, params):
    """Pure-JAX f32 reference (matches the PyTorch module)."""
    w1, b1, w2, b2, logit_scale, bias = params
    proj = jnp.maximum(visual_embed @ w1 + b1, 0.0) @ w2 + b2
    mem_n = memory / jnp.maximum(
        jnp.linalg.norm(memory, axis=-1, keepdims=True), NORM_EPS)
    proj_n = proj / jnp.maximum(
        jnp.linalg.norm(proj, axis=-1, keepdims=True), NORM_EPS)
    return jnp.einsum("bqd,bkd->bqk", mem_n, proj_n) * jnp.exp(logit_scale) + bias


if __name__ == "__main__":
    key = jax.random.PRNGKey(0)
    kp, km, kv = jax.random.split(key, 3)

    params = init_params(kp)

    B, Nq, Nv = 2, 16, 8
    memory = jax.random.normal(km, (B, Nq, D_IN), jnp.float32)
    visual_embed = jax.random.normal(kv, (B, Nv, D_IN), jnp.float32)

    out = jax.jit(contrastive_embed)(memory, visual_embed, params)
    out = jax.block_until_ready(out)
    assert out.shape == (B, Nq, Nv)

    ref = jax.block_until_ready(reference(memory, visual_embed, params))
    # bf16 MXU operands with f32 accumulation: relaxed tolerance vs f32 reference.
    np.testing.assert_allclose(np.asarray(out), np.asarray(ref),
                               rtol=3e-2, atol=3e-1)

    print("KERNEL_OK")
</pallas_src>

<mosaic_0001>
module attributes {stable_mosaic.version = 11 : i64} {
  func.func @_sim_kernel(%arg0: i32, %arg1: i32, %arg2: memref<1xf32, #tpu.memory_space<smem>>, %arg3: memref<1xf32, #tpu.memory_space<smem>>, %arg4: memref<1x16x256xf32, #tpu.memory_space<vmem>>, %arg5: memref<1x128x256xbf16, #tpu.memory_space<vmem>>, %arg6: memref<1x16x128xf32, #tpu.memory_space<vmem>>) attributes {dimension_semantics = [#tpu.dimension_semantics<parallel>, #tpu.dimension_semantics<parallel>], iteration_bounds = array<i64: 2, 1>, scalar_prefetch = 0 : i64, scratch_operands = 0 : i64, tpu.core_type = #tpu.core_type<tc>, window_params = [{transform_indices = @transform_0, window_bounds = array<i64: 1>}, {transform_indices = @transform_1, window_bounds = array<i64: 1>}, {transform_indices = @transform_2, window_bounds = array<i64: 1, 16, 256>}, {transform_indices = @transform_3, window_bounds = array<i64: 1, 128, 256>}, {transform_indices = @transform_4, window_bounds = array<i64: 1, 16, 128>}]} {
    %c0 = arith.constant 0 : index
    %c0_0 = arith.constant 0 : index
    %c0_1 = arith.constant 0 : index
    %0 = vector.load %arg4[%c0, %c0_0, %c0_1] : memref<1x16x256xf32, #tpu.memory_space<vmem>>, vector<1x16x256xf32>
    %1 = vector.shape_cast %0 : vector<1x16x256xf32> to vector<16x256xf32>
    %2 = arith.mulf %1, %1 : vector<16x256xf32>
    %cst = arith.constant dense<0.000000e+00> : vector<16xf32>
    %3 = vector.multi_reduction <add>, %2, %cst [1] : vector<16x256xf32> to vector<16xf32>
    %4 = vector.shape_cast %3 : vector<16xf32> to vector<16x1xf32>
    %cst_2 = arith.constant 1.000000e-24 : f32
    %5 = vector.broadcast %cst_2 : f32 to vector<16x1xf32>
    %6 = arith.maximumf %4, %5 : vector<16x1xf32>
    %7 = math.rsqrt %6 : vector<16x1xf32>
    %c0_3 = arith.constant 0 : index
    %8 = memref.load %arg2[%c0_3] : memref<1xf32, #tpu.memory_space<smem>>
    %9 = vector.broadcast %8 : f32 to vector<16x1xf32>
    %10 = arith.mulf %7, %9 : vector<16x1xf32>
    %11 = vector.broadcast %10 : vector<16x1xf32> to vector<16x256xf32>
    %12 = arith.mulf %1, %11 : vector<16x256xf32>
    %13 = arith.truncf %12 : vector<16x256xf32> to vector<16x256xbf16>
    %c0_4 = arith.constant 0 : index
    %c0_5 = arith.constant 0 : index
    %c0_6 = arith.constant 0 : index
    %14 = vector.load %arg5[%c0_4, %c0_5, %c0_6] : memref<1x128x256xbf16, #tpu.memory_space<vmem>>, vector<1x128x256xbf16>
    %15 = vector.shape_cast %14 : vector<1x128x256xbf16> to vector<128x256xbf16>
    %cst_7 = arith.constant dense<0.000000e+00> : vector<16x128xf32>
    %16 = tpu.matmul %13, %15, %cst_7 {dimension_numbers = #tpu.dot_dimension_numbers<[1], [1], [0], [0], [0, 0, 1, 0], [], []>} : vector<16x256xbf16>, vector<128x256xbf16>, vector<16x128xf32> -> vector<16x128xf32>
    %c0_8 = arith.constant 0 : index
    %17 = memref.load %arg3[%c0_8] : memref<1xf32, #tpu.memory_space<smem>>
    %18 = vector.broadcast %17 : f32 to vector<16x128xf32>
    %19 = arith.addf %16, %18 : vector<16x128xf32>
    %c0_9 = arith.constant 0 : index
    %c0_10 = arith.constant 0 : index
    %c0_11 = arith.constant 0 : index
    %20 = vector.load %arg6[%c0_9, %c0_10, %c0_11] : memref<1x16x128xf32, #tpu.memory_space<vmem>>, vector<1x16x128xf32>
    %21 = vector.shape_cast %20 : vector<1x16x128xf32> to vector<16x128xf32>
    %22 = vector.shape_cast %19 : vector<16x128xf32> to vector<1x16x128xf32>
    tpu.vector_store %arg6[%c0_9, %c0_10, %c0_11], %22 {strides = array<i32>} : memref<1x16x128xf32, #tpu.memory_space<vmem>>, vector<1x16x128xf32>,
    return
  }
  func.func @transform_0(%arg0: i32, %arg1: i32) -> i32 {
    %c0_i32 = arith.constant 0 : i32
    %c0_i32_0 = arith.constant 0 : i32
    return %c0_i32 : i32
  }
  func.func @transform_1(%arg0: i32, %arg1: i32) -> i32 {
    %c0_i32 = arith.constant 0 : i32
    %c0_i32_0 = arith.constant 0 : i32
    return %c0_i32 : i32
  }
  func.func @transform_2(%arg0: i32, %arg1: i32) -> (i32, i32, i32) {
    %c0_i32 = arith.constant 0 : i32
    %c0_i32_0 = arith.constant 0 : i32
    return %arg0, %arg1, %c0_i32 : i32, i32, i32
  }
  func.func @transform_3(%arg0: i32, %arg1: i32) -> (i32, i32, i32) {
    %c0_i32 = arith.constant 0 : i32
    %c0_i32_0 = arith.constant 0 : i32
    %c0_i32_1 = arith.constant 0 : i32
    return %arg0, %c0_i32, %c0_i32_0 : i32, i32, i32
  }
  func.func @transform_4(%arg0: i32, %arg1: i32) -> (i32, i32, i32) {
    %c0_i32 = arith.constant 0 : i32
    %c0_i32_0 = arith.constant 0 : i32
    return %arg0, %arg1, %c0_i32 : i32, i32, i32
  }
}

module attributes {stable_mosaic.version = 11 : i64} {
  func.func @_mlp_proj_kernel(%arg0: i32, %arg1: memref<256x256xbf16, #tpu.memory_space<vmem>>, %arg2: memref<256x1024xbf16, #tpu.memory_space<vmem>>, %arg3: memref<1x1024xf32, #tpu.memory_space<vmem>>, %arg4: memref<1024x256xbf16, #tpu.memory_space<vmem>>, %arg5: memref<1x256xf32, #tpu.memory_space<vmem>>, %arg6: memref<256x256xbf16, #tpu.memory_space<vmem>>) attributes {dimension_semantics = [#tpu.dimension_semantics<parallel>], iteration_bounds = array<i64: 1>, scalar_prefetch = 0 : i64, scratch_operands = 0 : i64, tpu.core_type = #tpu.core_type<tc>, window_params = [{transform_indices = @transform_0, window_bounds = array<i64: 256, 256>}, {pipeline_mode = #tpu.pipeline_mode<synchronous>, transform_indices = @transform_1, window_bounds = array<i64: 256, 1024>}, {pipeline_mode = #tpu.pipeline_mode<synchronous>, transform_indices = @transform_2, window_bounds = array<i64: 1, 1024>}, {pipeline_mode = #tpu.pipeline_mode<synchronous>, transform_indices = @transform_3, window_bounds = array<i64: 1024, 256>}, {pipeline_mode = #tpu.pipeline_mode<synchronous>, transform_indices = @transform_4, window_bounds = array<i64: 1, 256>}, {transform_indices = @transform_5, window_bounds = array<i64: 256, 256>}]} {
    %c0 = arith.constant 0 : index
    %c0_0 = arith.constant 0 : index
    %0 = vector.load %arg1[%c0, %c0_0] : memref<256x256xbf16, #tpu.memory_space<vmem>>, vector<256x256xbf16>
    %c0_1 = arith.constant 0 : index
    %c0_2 = arith.constant 0 : index
    %1 = vector.load %arg2[%c0_1, %c0_2] : memref<256x1024xbf16, #tpu.memory_space<vmem>>, vector<256x1024xbf16>
    %cst = arith.constant dense<0.000000e+00> : vector<256x1024xf32>
    %2 = tpu.matmul %0, %1, %cst {dimension_numbers = #tpu.dot_dimension_numbers<[1], [0], [0], [1], [0, 0, 1, 1], [], []>} : vector<256x256xbf16>, vector<256x1024xbf16>, vector<256x1024xf32> -> vector<256x1024xf32>
    %c0_3 = arith.constant 0 : index
    %c0_4 = arith.constant 0 : index
    %3 = vector.load %arg3[%c0_3, %c0_4] : memref<1x1024xf32, #tpu.memory_space<vmem>>, vector<1x1024xf32>
    %4 = vector.broadcast %3 : vector<1x1024xf32> to vector<256x1024xf32>
    %5 = arith.addf %2, %4 : vector<256x1024xf32>
    %cst_5 = arith.constant 0.000000e+00 : f32
    %6 = vector.broadcast %cst_5 : f32 to vector<256x1024xf32>
    %7 = arith.maximumf %5, %6 : vector<256x1024xf32>
    %8 = arith.truncf %7 : vector<256x1024xf32> to vector<256x1024xbf16>
    %c0_6 = arith.constant 0 : index
    %c0_7 = arith.constant 0 : index
    %9 = vector.load %arg4[%c0_6, %c0_7] : memref<1024x256xbf16, #tpu.memory_space<vmem>>, vector<1024x256xbf16>
    %cst_8 = arith.constant dense<0.000000e+00> : vector<256x256xf32>
    %10 = tpu.matmul %8, %9, %cst_8 {dimension_numbers = #tpu.dot_dimension_numbers<[1], [0], [0], [1], [0, 0, 1, 1], [], []>} : vector<256x1024xbf16>, vector<1024x256xbf16>, vector<256x256xf32> -> vector<256x256xf32>
    %c0_9 = arith.constant 0 : index
    %c0_10 = arith.constant 0 : index
    %11 = vector.load %arg5[%c0_9, %c0_10] : memref<1x256xf32, #tpu.memory_space<vmem>>, vector<1x256xf32>
    %12 = vector.broadcast %11 : vector<1x256xf32> to vector<256x256xf32>
    %13 = arith.addf %10, %12 : vector<256x256xf32>
    %14 = arith.mulf %13, %13 : vector<256x256xf32>
    %cst_11 = arith.constant dense<0.000000e+00> : vector<256xf32>
    %15 = vector.multi_reduction <add>, %14, %cst_11 [1] : vector<256x256xf32> to vector<256xf32>
    %16 = vector.shape_cast %15 : vector<256xf32> to vector<256x1xf32>
    %cst_12 = arith.constant 1.000000e-24 : f32
    %17 = vector.broadcast %cst_12 : f32 to vector<256x1xf32>
    %18 = arith.maximumf %16, %17 : vector<256x1xf32>
    %19 = math.rsqrt %18 : vector<256x1xf32>
    %20 = vector.broadcast %19 : vector<256x1xf32> to vector<256x256xf32>
    %21 = arith.mulf %13, %20 : vector<256x256xf32>
    %22 = arith.truncf %21 : vector<256x256xf32> to vector<256x256xbf16>
    %c0_13 = arith.constant 0 : index
    %c0_14 = arith.constant 0 : index
    %23 = vector.load %arg6[%c0_13, %c0_14] : memref<256x256xbf16, #tpu.memory_space<vmem>>, vector<256x256xbf16>
    tpu.vector_store %arg6[%c0_13, %c0_14], %22 {strides = array<i32>} : memref<256x256xbf16, #tpu.memory_space<vmem>>, vector<256x256xbf16>,
    return
  }
  func.func @transform_0(%arg0: i32) -> (i32, i32) {
    %c0_i32 = arith.constant 0 : i32
    %c0_i32_0 = arith.constant 0 : i32
    return %arg0, %c0_i32 : i32, i32
  }
  func.func @transform_1(%arg0: i32) -> (i32, i32) {
    %c0_i32 = arith.constant 0 : i32
    %c0_i32_0 = arith.constant 0 : i32
    %c0_i32_1 = arith.constant 0 : i32
    return %c0_i32, %c0_i32_0 : i32, i32
  }
  func.func @transform_2(%arg0: i32) -> (i32, i32) {
    %c0_i32 = arith.constant 0 : i32
    %c0_i32_0 = arith.constant 0 : i32
    %c0_i32_1 = arith.constant 0 : i32
    return %c0_i32, %c0_i32_0 : i32, i32
  }
  func.func @transform_3(%arg0: i32) -> (i32, i32) {
    %c0_i32 = arith.constant 0 : i32
    %c0_i32_0 = arith.constant 0 : i32
    %c0_i32_1 = arith.constant 0 : i32
    return %c0_i32, %c0_i32_0 : i32, i32
  }
  func.func @transform_4(%arg0: i32) -> (i32, i32) {
    %c0_i32 = arith.constant 0 : i32
    %c0_i32_0 = arith.constant 0 : i32
    %c0_i32_1 = arith.constant 0 : i32
    return %c0_i32, %c0_i32_0 : i32, i32
  }
  func.func @transform_5(%arg0: i32) -> (i32, i32) {
    %c0_i32 = arith.constant 0 : i32
    %c0_i32_0 = arith.constant 0 : i32
    return %arg0, %c0_i32 : i32, i32
  }
}

</mosaic_0001>

<bundles_post_ra>
// kernel: contrastive_embed.3
= control target key start
LH: loop header
LB: loop body
LE: loop exit
PB: predicated region body
PF: predicated region fallthrough
CT: control target
= control target key end

     0   :  { %s673_s19 = smov 0   ;;  %s675_s20 = smov 0   ;;  %s732_s0 = inlined_call_operand.<no memory space> [shape: f32[1], index: 0, kind: input, shape index: {}]   ;;  %s733_s1 = inlined_call_operand.<no memory space> [shape: f32[1], index: 1, kind: input, shape index: {}]   ;;  %s734_s2 = inlined_call_operand.vmem [shape: f32[2,16,256], index: 2, kind: input, shape index: {}]   ;;  %s735_s3 = inlined_call_operand.vmem [shape: bf16[2,128,256], index: 3, kind: input, shape index: {}]   ;;  %s736_s4 = inlined_call_operand.vmem [shape: f32[2,16,128], index: 4, kind: output, shape index: {}]  }
   0x1   :  { %9 = sst [smem:[#allocation2]] %s732_s0  ;;  %s677_s21 = smov 0  }
   0x2   :  { %10 = sst [smem:[#allocation3]] %s733_s1 }
   0x3 LB: > { %s28_s0 = sadd.s32 1, %s636_s20  ;;  %p538_p0 = scmp.ge.s32.totalorder %s640_s21, 1  ;;  %s640_s21 = sphi %s677_s21, %s16_s21   ;;  %s636_s20 = sphi %s675_s20, %s738_s20   ;;  %s632_s19 = sphi %s673_s19, %s737_s19  }
   0x4   : > { %p30_p1 = scmp.ge.s32.totalorder %s28_s0, 2  ;;  %p196_p2 = scmp.lt.s32.totalorder %s640_s21, 3 }
   0x6   : > { %s740_s0 = smov (%p30_p1, %s28_s0), 0  ;;  %p197_p3 = pnand %p538_p0, %p196_p2 }
   0x7   : > { %p237_p4 = scmp.lt.s32.totalorder (!%p197_p3), %s632_s19, 1  ;;  %s281_s29 = sld [smem:[#allocation2]] (!%p197_p3) }
   0x8   : > { %200 = sbr.rel (%p197_p3) target bundleno = 386 (0x182), region = 36  ;;  %s307_s30 = sld [smem:[#allocation3]] (!%p197_p3) }
   0xd   : > { %s742_s19 = smov (!%p237_p4, %s632_s19), 1  ;;  %v282_v31 = vstv %s281_s29 }
   0xe   : > { %s563_s1 = sshll.u32 %s742_s19, 5  ;;  %s564_s22 = sshll.u32 %s742_s19, 7  ;;  %v308_v41 = vstv %s307_s30 }
   0xf   : > { %s245_s25 = scalar_lea.vmem %s734_s2, %s563_s1  ;;  %s701_s28 = scalar_lea.vmem %s735_s3, %s564_s22 }
  0x10   : > { %v263_v0 = vld [vmem:[%s245_s25] sm:$0xff]  ;;  %v264_v1 = vld [vmem:[%s245_s25 + $0x8] sm:$0xff]  ;;  %v265_v2 = vld [vmem:[%s245_s25 + $0x10] sm:$0xff]  ;;  %s565_s5 = sshll.u32 %s742_s19, 4 }
  0x11   : > { %v267_v3 = vmul.f32 %v263_v0, %v263_v0  ;;  %v268_v4 = vmul.f32 %v264_v1, %v264_v1  ;;  %v266_v5 = vld [vmem:[%s245_s25 + $0x18] sm:$0xff]  ;;  %v269_v6 = vmul.f32 %v265_v2, %v265_v2  ;;  %v593_v11 = vld [vmem:[%s701_s28 + $0x64] ss:$8 sps:$4 sm:$0xff]   ;;  %v595_v13 = vld [vmem:[%s701_s28 + $0x60] ss:$8 sps:$4 sm:$0xff]   ;;  %s260_s8 = scalar_lea.vmem %s736_s4, %s565_s5 }
  0x12   : > { %v270_v7 = vmul.f32 %v266_v5, %v266_v5  ;;  %v590_v8 = vld [vmem:[%s701_s28 + $0x74] ss:$8 sps:$4 sm:$0xff]   ;;  %v592_v9 = vld [vmem:[%s701_s28 + $0x70] ss:$8 sps:$4 sm:$0xff]   ;;  %v599_v16 = vld [vmem:[%s701_s28 + $0x44] ss:$8 sps:$4 sm:$0xff]  }
  0x13   : > { %v271_v10 = vadd.f32 %v268_v4, %v267_v3  ;;  %389 = vmatprep.subr.bf16.mxu0 %v590_v8  ;;  %v596_v14 = vld [vmem:[%s701_s28 + $0x54] ss:$8 sps:$4 sm:$0xff]   ;;  %v598_v15 = vld [vmem:[%s701_s28 + $0x50] ss:$8 sps:$4 sm:$0xff]   ;;  %v601_v17 = vld [vmem:[%s701_s28 + $0x40] ss:$8 sps:$4 sm:$0xff]  }
  0x14   : > { %v274_v12 = vadd.f32 %v270_v7, %v269_v6  ;;  %390 = vmatpush1.bf16.xpose.msra.mxu0 %v592_v9  ;;  %v602_v18 = vld [vmem:[%s701_s28 + $0x34] ss:$8 sps:$4 sm:$0xff]   ;;  %v604_v19 = vld [vmem:[%s701_s28 + $0x30] ss:$8 sps:$4 sm:$0xff]   ;;  %v605_v20 = vld [vmem:[%s701_s28 + $0x24] ss:$8 sps:$4 sm:$0xff]  }
  0x15   : > { %272 = vadd.xlane.f32.xlu0 %v271_v10  ;;  %391 = vmatprep.subr.bf16.mxu0 %v593_v11  ;;  %v607_v21 = vld [vmem:[%s701_s28 + $0x20] ss:$8 sps:$4 sm:$0xff]   ;;  %v608_v22 = vld [vmem:[%s701_s28 + $0x14] ss:$8 sps:$4 sm:$0xff]   ;;  %v610_v23 = vld [vmem:[%s701_s28 + $0x10] ss:$8 sps:$4 sm:$0xff]  }
  0x16   : > { %v611_v24 = vld [vmem:[%s701_s28 + $0x4] ss:$8 sps:$4 sm:$0xff]   ;;  %v613_v25 = vld [vmem:[%s701_s28] ss:$8 sps:$4 sm:$0xff]  }
  0x19   : > { %275 = vadd.xlane.f32.xlu0 %v274_v12 }
  0x1c   : > { %392 = vmatpush1.bf16.xpose.msra.mxu0 %v595_v13 }
  0x1d   : > { %393 = vmatprep.subr.bf16.mxu0 %v596_v14 }
  0x24   : > { %394 = vmatpush1.bf16.xpose.msra.mxu0 %v598_v15 }
  0x25   : > { %395 = vmatprep.subr.bf16.mxu0 %v599_v16 }
  0x2c   : > { %396 = vmatpush1.bf16.xpose.msra.mxu0 %v601_v17 }
  0x2d   : > { %397 = vmatprep.subr.bf16.mxu0 %v602_v18 }
  0x34   : > { %398 = vmatpush1.bf16.xpose.msra.mxu0 %v604_v19 }
  0x35   : > { %399 = vmatprep.subr.bf16.mxu0 %v605_v20 }
  0x3c   : > { %400 = vmatpush1.bf16.xpose.msra.mxu0 %v607_v21 }
  0x3d   : > { %401 = vmatprep.subr.bf16.mxu0 %v608_v22 }
  0x44   : > { %402 = vmatpush1.bf16.xpose.msra.mxu0 %v610_v23 }
  0x45   : > { %403 = vmatprep.subr.bf16.mxu0 %v611_v24 }
  0x4c   : > { %404 = vmatpush1.bf16.xpose.msra.mxu0 %v613_v25 }
  0x9e   : > { %v273_v26 = vpop.xlane.xlu0 %272 }
  0x9f   : > { %v277_v27 = vmax.f32 %v273_v26, 1e-24 }
  0xa1   : > { %614 = vrsqrt.f32 %v277_v27 }
  0xa2   : > { %v276_v28 = vpop.xlane.xlu0 %275 }
  0xa3   : > { %v278_v29 = vmax.f32 %v276_v28, 1e-24 }
  0xa5   : > { %616 = vrsqrt.f32 %v278_v29 }
  0xae   : > { %v615_v30 = vpop.eup %614 }
  0xaf   : > { %v283_v32 = vmul.f32 %v615_v30, %v282_v31 }
  0xb1   : > { %v286_v35 = vmul.f32 %v283_v32, %v264_v1  ;;  %v285_v37 = vmul.f32 %v283_v32, %v263_v0 }
  0xb2   : > { %v617_v33 = vpop.eup %616 }
  0xb3   : > { %v284_v34 = vmul.f32 %v617_v33, %v282_v31 }
  0xb5   : > { %v288_v36 = vmul.f32 %v284_v34, %v266_v5  ;;  %v287_v38 = vmul.f32 %v284_v34, %v265_v2 }
  0xb7   : > { %v290_v39 = vpack.c.bf16 %v288_v36, %v286_v35  ;;  %v289_v40 = vpack.c.bf16 %v287_v38, %v285_v37 }
  0xb9   : > { %421 = vmatprep.mubr.bf16.mxu0 %v290_v39 }
  0xba   : > { %422 = vmatmul.mubr.bf16.vlgmr.msra.gmra.mxu0 %v289_v40 }
 0x17a   : > { %v423_v42 = vpop.f32.mrf.mxu0 }
 0x17b   : > { %v424_v43 = vadd.f32 %v423_v42, %v308_v41 }
 0x17c   : > { %v425_v44 = vpop.f32.mrf.mxu0 }
 0x17d   : > { %430 = vst [vmem:[%s260_s8] sm:$0xff] %v424_v43 }
 0x17e   : > { %v426_v45 = vpop.f32.mrf.mxu0 }
 0x17f   : > { %v427_v46 = vadd.f32 %v426_v45, %v308_v41 }
 0x180   : > { %v428_v47 = vpop.f32.mrf.mxu0 }
 0x181   : > { %431 = vst [vmem:[%s260_s8 + $0x8] sm:$0xff] %v427_v46 }
 0x182 PF: > { %s16_s21 = sadd.s32 1, %s640_s21   ;;  %s737_s19 = smov %s636_s20 }
 0x183   : > { %p13_p5 = scmp.ge.s32.totalorder %s16_s21, 4   ;;  %s738_s20 = smov %s740_s0 }
 0x185   :  { %15 = sbr.rel (!%p13_p5) target bundleno = 3 (0x3), region = 69 }

// kernel: contrastive_embed.2
= control target key start
LH: loop header
LB: loop body
LE: loop exit
PB: predicated region body
PF: predicated region fallthrough
CT: control target
= control target key end

     0   :  { %s7730_s1 = inlined_call_operand.vmem [shape: bf16[256,1024], index: 1, kind: input, shape index: {}]   ;;  %s7731_s0 = inlined_call_operand.vmem [shape: bf16[256,256], index: 0, kind: input, shape index: {}]   ;;  %s7732_s3 = inlined_call_operand.vmem [shape: bf16[1024,256], index: 3, kind: input, shape index: {}]   ;;  %s7733_s2 = inlined_call_operand.vmem [shape: f32[1,1024], index: 2, kind: input, shape index: {}]   ;;  %s7734_s4 = inlined_call_operand.vmem [shape: f32[1,256], index: 4, kind: input, shape index: {}]   ;;  %s7735_s5 = inlined_call_operand.vmem [shape: bf16[256,256], index: 5, kind: output, shape index: {}]  }
   0x1   :  { %v108_v0 = vld [vmem:[%s7730_s1 + $0x1c0] sm:$0xff]  ;;  %v109_v2 = vld [vmem:[%s7730_s1 + $0x1c8] sm:$0xff] }
   0x2   :  { %v112_v1 = vld [vmem:[%s7730_s1 + $0x1e0] sm:$0xff]  ;;  %v113_v4 = vld [vmem:[%s7730_s1 + $0x1e8] sm:$0xff] }
   0x3   :  { %v4335_v3 = vcombine.high %v108_v0, %v112_v1  ;;  %v4334_v5 = vcombine.low %v108_v0, %v112_v1  ;;  %v100_v6 = vld [vmem:[%s7730_s1 + $0x180] sm:$0xff]  ;;  %v4337_v8 = vcombine.high %v109_v2, %v113_v4  ;;  %v4336_v9 = vcombine.low %v109_v2, %v113_v4  ;;  %v101_v11 = vld [vmem:[%s7730_s1 + $0x188] sm:$0xff] }
   0x4   :  { %v104_v7 = vld [vmem:[%s7730_s1 + $0x1a0] sm:$0xff]  ;;  %v105_v12 = vld [vmem:[%s7730_s1 + $0x1a8] sm:$0xff] }
   0x5   :  { %v4327_v10 = vcombine.high %v100_v6, %v104_v7  ;;  %v92_v13 = vld [vmem:[%s7730_s1 + $0x140] sm:$0xff]  ;;  %1022 = vmatprep.subr.bf16.mxu0 %v4335_v3  ;;  %v4329_v14 = vcombine.high %v101_v11, %v105_v12  ;;  %v93_v16 = vld [vmem:[%s7730_s1 + $0x148] sm:$0xff]  ;;  %1215 = vmatprep.subr.bf16.mxu1 %v4337_v8  ;;  %v4326_v18 = vcombine.low %v100_v6, %v104_v7 }
   0x6   :  { %v96_v15 = vld [vmem:[%s7730_s1 + $0x160] sm:$0xff]  ;;  %v97_v17 = vld [vmem:[%s7730_s1 + $0x168] sm:$0xff]  ;;  %1023 = vmatpush1.bf16.msra.mxu0 %v4334_v5  ;;  %1216 = vmatpush1.bf16.msra.mxu1 %v4336_v9  ;;  %v4328_v19 = vcombine.low %v101_v11, %v105_v12 }
   0x7   :  { %1024 = vmatprep.subr.bf16.mxu0 %v4327_v10  ;;  %v4319_v20 = vcombine.high %v92_v13, %v96_v15  ;;  %1217 = vmatprep.subr.bf16.mxu1 %v4329_v14  ;;  %v4321_v21 = vcombine.high %v93_v16, %v97_v17  ;;  %v84_v22 = vld [vmem:[%s7730_s1 + $0x100] sm:$0xff]  ;;  %v85_v24 = vld [vmem:[%s7730_s1 + $0x108] sm:$0xff]  ;;  %v4318_v26 = vcombine.low %v92_v13, %v96_v15 }
   0x8   :  { %v88_v23 = vld [vmem:[%s7730_s1 + $0x120] sm:$0xff]  ;;  %v89_v25 = vld [vmem:[%s7730_s1 + $0x128] sm:$0xff]  ;;  %v4320_v27 = vcombine.low %v93_v16, %v97_v17 }
   0x9   :  { %v4311_v28 = vcombine.high %v84_v22, %v88_v23  ;;  %v4313_v29 = vcombine.high %v85_v24, %v89_v25  ;;  %v76_v30 = vld [vmem:[%s7730_s1 + $0xc0] sm:$0xff]  ;;  %v77_v32 = vld [vmem:[%s7730_s1 + $0xc8] sm:$0xff]  ;;  %v4310_v34 = vcombine.low %v84_v22, %v88_v23  ;;  %v4312_v35 = vcombine.low %v85_v24, %v89_v25 }
   0xa   :  { %1025 = vmatpush1.bf16.msra.mxu0 %v4326_v18  ;;  %1218 = vmatpush1.bf16.msra.mxu1 %v4328_v19  ;;  %v80_v31 = vld [vmem:[%s7730_s1 + $0xe0] sm:$0xff]  ;;  %v81_v33 = vld [vmem:[%s7730_s1 + $0xe8] sm:$0xff] }
   0xb   :  { %1026 = vmatprep.subr.bf16.mxu0 %v4319_v20  ;;  %1219 = vmatprep.subr.bf16.mxu1 %v4321_v21  ;;  %v4303_v36 = vcombine.high %v76_v30, %v80_v31  ;;  %v4305_v37 = vcombine.high %v77_v32, %v81_v33  ;;  %v68_v38 = vld [vmem:[%s7730_s1 + $0x80] sm:$0xff]  ;;  %v69_v40 = vld [vmem:[%s7730_s1 + $0x88] sm:$0xff]  ;;  %v4302_v42 = vcombine.low %v76_v30, %v80_v31 }
   0xc   :  { %v72_v39 = vld [vmem:[%s7730_s1 + $0xa0] sm:$0xff]  ;;  %v73_v41 = vld [vmem:[%s7730_s1 + $0xa8] sm:$0xff]  ;;  %v4304_v43 = vcombine.low %v77_v32, %v81_v33 }
   0xd   :  { %v4295_v44 = vcombine.high %v68_v38, %v72_v39  ;;  %v4297_v45 = vcombine.high %v69_v40, %v73_v41  ;;  %v60_v46 = vld [vmem:[%s7730_s1 + $0x40] sm:$0xff]  ;;  %v61_v48 = vld [vmem:[%s7730_s1 + $0x48] sm:$0xff]  ;;  %v4294_v50 = vcombine.low %v68_v38, %v72_v39  ;;  %v4296_v51 = vcombine.low %v69_v40, %v73_v41 }
   0xe   :  { %1027 = vmatpush1.bf16.msra.mxu0 %v4318_v26  ;;  %1220 = vmatpush1.bf16.msra.mxu1 %v4320_v27  ;;  %v64_v47 = vld [vmem:[%s7730_s1 + $0x60] sm:$0xff]  ;;  %v65_v49 = vld [vmem:[%s7730_s1 + $0x68] sm:$0xff] }
   0xf   :  { %1028 = vmatprep.subr.bf16.mxu0 %v4311_v28  ;;  %1221 = vmatprep.subr.bf16.mxu1 %v4313_v29  ;;  %v4287_v52 = vcombine.high %v60_v46, %v64_v47  ;;  %v4289_v53 = vcombine.high %v61_v48, %v65_v49  ;;  %v52_v54 = vld [vmem:[%s7730_s1] sm:$0xff]  ;;  %v53_v57 = vld [vmem:[%s7730_s1 + $0x8] sm:$0xff]  ;;  %v4286_v59 = vcombine.low %v60_v46, %v64_v47 }
  0x10   :  { %v56_v55 = vld [vmem:[%s7730_s1 + $0x20] sm:$0xff]  ;;  %v57_v58 = vld [vmem:[%s7730_s1 + $0x28] sm:$0xff]  ;;  %v4288_v60 = vcombine.low %v61_v48, %v65_v49 }
  0x11   :  { %v4598_v56 = vld [vmem:[%s7731_s0 + $0x4] ss:$8 sps:$4 sm:$0xff]   ;;  %v4279_v61 = vcombine.high %v52_v54, %v56_v55  ;;  %v4281_v62 = vcombine.high %v53_v57, %v57_v58  ;;  %v4278_v3 = vcombine.low %v52_v54, %v56_v55  ;;  %v4280_v4 = vcombine.low %v53_v57, %v57_v58 }
  0x12   :  { %1029 = vmatpush1.bf16.msra.mxu0 %v4310_v34  ;;  %1222 = vmatpush1.bf16.msra.mxu1 %v4312_v35  ;;  %v172_v63 = vld [vmem:[%s7730_s1 + $0x3c0] sm:$0xff]  ;;  %v173_v1 = vld [vmem:[%s7730_s1 + $0x3c8] sm:$0xff] }
  0x13   :  { %1030 = vmatprep.subr.bf16.mxu0 %v4303_v36  ;;  %1223 = vmatprep.subr.bf16.mxu1 %v4305_v37  ;;  %v176_v0 = vld [vmem:[%s7730_s1 + $0x3e0] sm:$0xff]  ;;  %v177_v2 = vld [vmem:[%s7730_s1 + $0x3e8] sm:$0xff] }
  0x14   :  { %1054 = vmatprep.mubr.bf16.mxu0 %v4598_v56  ;;  %1247 = vmatprep.mubr.bf16.mxu1 %v4598_v56  ;;  %v4399_v5 = vcombine.high %v172_v63, %v176_v0  ;;  %v4401_v6 = vcombine.high %v173_v1, %v177_v2  ;;  %v164_v7 = vld [vmem:[%s7730_s1 + $0x380] sm:$0xff]  ;;  %v165_v9 = vld [vmem:[%s7730_s1 + $0x388] sm:$0xff]  ;;  %v4398_v11 = vcombine.low %v172_v63, %v176_v0  ;;  %v110_v63 = vld [vmem:[%s7730_s1 + $0x1d0] sm:$0xff] }
  0x15   :  { %v168_v8 = vld [vmem:[%s7730_s1 + $0x3a0] sm:$0xff]  ;;  %v169_v10 = vld [vmem:[%s7730_s1 + $0x3a8] sm:$0xff]  ;;  %v4400_v12 = vcombine.low %v173_v1, %v177_v2  ;;  %v114_v0 = vld [vmem:[%s7730_s1 + $0x1f0] sm:$0xff] }
  0x16   :  { %1031 = vmatpush1.bf16.msra.mxu0 %v4302_v42  ;;  %1224 = vmatpush1.bf16.msra.mxu1 %v4304_v43  ;;  %v4391_v13 = vcombine.high %v164_v7, %v168_v8  ;;  %v4393_v14 = vcombine.high %v165_v9, %v169_v10  ;;  %v156_v15 = vld [vmem:[%s7730_s1 + $0x340] sm:$0xff]  ;;  %v157_v17 = vld [vmem:[%s7730_s1 + $0x348] sm:$0xff]  ;;  %v4390_v19 = vcombine.low %v164_v7, %v168_v8  ;;  %v111_v1 = vld [vmem:[%s7730_s1 + $0x1d8] sm:$0xff] }
  0x17   :  { %1032 = vmatprep.subr.bf16.mxu0 %v4295_v44  ;;  %1225 = vmatprep.subr.bf16.mxu1 %v4297_v45  ;;  %v160_v16 = vld [vmem:[%s7730_s1 + $0x360] sm:$0xff]  ;;  %v161_v18 = vld [vmem:[%s7730_s1 + $0x368] sm:$0xff]  ;;  %v4392_v20 = vcombine.low %v165_v9, %v169_v10  ;;  %v115_v2 = vld [vmem:[%s7730_s1 + $0x1f8] sm:$0xff]  ;;  %v4338_v10 = vcombine.low %v110_v63, %v114_v0 }
  0x18   :  { %v4383_v21 = vcombine.high %v156_v15, %v160_v16  ;;  %v4385_v22 = vcombine.high %v157_v17, %v161_v18  ;;  %v148_v23 = vld [vmem:[%s7730_s1 + $0x300] sm:$0xff]  ;;  %v149_v25 = vld [vmem:[%s7730_s1 + $0x308] sm:$0xff]  ;;  %v4382_v27 = vcombine.low %v156_v15, %v160_v16  ;;  %v4384_v28 = vcombine.low %v157_v17, %v161_v18  ;;  %v102_v8 = vld [vmem:[%s7730_s1 + $0x190] sm:$0xff] }
  0x19   :  { %v152_v24 = vld [vmem:[%s7730_s1 + $0x320] sm:$0xff]  ;;  %v153_v26 = vld [vmem:[%s7730_s1 + $0x328] sm:$0xff]  ;;  %v106_v9 = vld [vmem:[%s7730_s1 + $0x1b0] sm:$0xff] }
  0x1a   :  { %1033 = vmatpush1.bf16.msra.mxu0 %v4294_v50  ;;  %1226 = vmatpush1.bf16.msra.mxu1 %v4296_v51  ;;  %v4375_v29 = vcombine.high %v148_v23, %v152_v24  ;;  %v4377_v30 = vcombine.high %v149_v25, %v153_v26  ;;  %v140_v31 = vld [vmem:[%s7730_s1 + $0x2c0] sm:$0xff]  ;;  %v141_v33 = vld [vmem:[%s7730_s1 + $0x2c8] sm:$0xff]  ;;  %v4374_v35 = vcombine.low %v148_v23, %v152_v24  ;;  %v94_v16 = vld [vmem:[%s7730_s1 + $0x150] sm:$0xff] }
  0x1b   :  { %1034 = vmatprep.subr.bf16.mxu0 %v4287_v52  ;;  %1227 = vmatprep.subr.bf16.mxu1 %v4289_v53  ;;  %v144_v32 = vld [vmem:[%s7730_s1 + $0x2e0] sm:$0xff]  ;;  %v145_v34 = vld [vmem:[%s7730_s1 + $0x2e8] sm:$0xff]  ;;  %v4376_v36 = vcombine.low %v149_v25, %v153_v26  ;;  %v4331_v15 = vcombine.high %v102_v8, %v106_v9  ;;  %v98_v17 = vld [vmem:[%s7730_s1 + $0x170] sm:$0xff] }
  0x1c   :  { %v4367_v37 = vcombine.high %v140_v31, %v144_v32  ;;  %v4369_v38 = vcombine.high %v141_v33, %v145_v34  ;;  %v132_v39 = vld [vmem:[%s7730_s1 + $0x280] sm:$0xff]  ;;  %v133_v41 = vld [vmem:[%s7730_s1 + $0x288] sm:$0xff]  ;;  %v4366_v43 = vcombine.low %v140_v31, %v144_v32  ;;  %v4368_v44 = vcombine.low %v141_v33, %v145_v34  ;;  %v86_v25 = vld [vmem:[%s7730_s1 + $0x110] sm:$0xff] }
  0x1d   :  { %v136_v40 = vld [vmem:[%s7730_s1 + $0x2a0] sm:$0xff]  ;;  %v137_v42 = vld [vmem:[%s7730_s1 + $0x2a8] sm:$0xff]  ;;  %v4323_v24 = vcombine.high %v94_v16, %v98_v17  ;;  %v4322_v31 = vcombine.low %v94_v16, %v98_v17  ;;  %v78_v32 = vld [vmem:[%s7730_s1 + $0xd0] sm:$0xff] }
  0x1e   :  { %1035 = vmatpush1.bf16.msra.mxu0 %v4286_v59  ;;  %1228 = vmatpush1.bf16.msra.mxu1 %v4288_v60  ;;  %v4359_v45 = vcombine.high %v132_v39, %v136_v40  ;;  %v4361_v46 = vcombine.high %v133_v41, %v137_v42  ;;  %v124_v47 = vld [vmem:[%s7730_s1 + $0x240] sm:$0xff]  ;;  %v125_v49 = vld [vmem:[%s7730_s1 + $0x248] sm:$0xff]  ;;  %v4358_v51 = vcombine.low %v132_v39, %v136_v40  ;;  %v82_v33 = vld [vmem:[%s7730_s1 + $0xf0] sm:$0xff] }
  0x1f   :  { %1036 = vmatprep.subr.bf16.mxu0 %v4279_v61  ;;  %1229 = vmatprep.subr.bf16.mxu1 %v4281_v62  ;;  %v128_v48 = vld [vmem:[%s7730_s1 + $0x260] sm:$0xff]  ;;  %v129_v50 = vld [vmem:[%s7730_s1 + $0x268] sm:$0xff]  ;;  %v4360_v52 = vcombine.low %v133_v41, %v137_v42  ;;  %v70_v41 = vld [vmem:[%s7730_s1 + $0x90] sm:$0xff] }
  0x20   :  { %v4351_v53 = vcombine.high %v124_v47, %v128_v48  ;;  %v4353_v54 = vcombine.high %v125_v49, %v129_v50  ;;  %v116_v55 = vld [vmem:[%s7730_s1 + $0x200] sm:$0xff]  ;;  %v117_v57 = vld [vmem:[%s7730_s1 + $0x208] sm:$0xff]  ;;  %v4350_v59 = vcombine.low %v124_v47, %v128_v48  ;;  %v4352_v60 = vcombine.low %v125_v49, %v129_v50  ;;  %v74_v42 = vld [vmem:[%s7730_s1 + $0xb0] sm:$0xff] }
  0x21   :  { %v120_v56 = vld [vmem:[%s7730_s1 + $0x220] sm:$0xff]  ;;  %v121_v58 = vld [vmem:[%s7730_s1 + $0x228] sm:$0xff]  ;;  %v75_v47 = vld [vmem:[%s7730_s1 + $0xb8] sm:$0xff]  ;;  %v4306_v49 = vcombine.low %v78_v32, %v82_v33 }
  0x22   :  { %1037 = vmatpush1.bf16.msra.mxu0 %v4278_v3  ;;  %1230 = vmatpush1.bf16.msra.mxu1 %v4280_v4  ;;  %v4343_v61 = vcombine.high %v116_v55, %v120_v56  ;;  %v4345_v62 = vcombine.high %v117_v57, %v121_v58  ;;  %v4342_v3 = vcombine.low %v116_v55, %v120_v56  ;;  %v5144_v7 = vld [vmem:[%s7731_s0] ss:$8 sps:$4 sm:$0xff]   ;;  %v5190_v26 = vld [vmem:[%s7731_s0 + $0x24] ss:$8 sps:$4 sm:$0xff]   ;;  %v62_v50 = vld [vmem:[%s7730_s1 + $0x50] sm:$0xff] }
  0x23   :  { %1038 = vmatprep.subr.bf16.mxu0 %v4399_v5  ;;  %1231 = vmatprep.subr.bf16.mxu1 %v4401_v6  ;;  %v4344_v4 = vcombine.low %v117_v57, %v121_v58  ;;  %v4339_v5 = vcombine.high %v110_v63, %v114_v0  ;;  %v4341_v6 = vcombine.high %v111_v1, %v115_v2  ;;  %v5220_v39 = vld [vmem:[%s7731_s0 + $0x20] ss:$8 sps:$4 sm:$0xff]   ;;  %v63_v55 = vld [vmem:[%s7730_s1 + $0x58] sm:$0xff]  ;;  %v170_v16 = vld [vmem:[%s7730_s1 + $0x3b0] sm:$0xff] }
  0x24   :  { %v67_v56 = vld [vmem:[%s7730_s1 + $0x78] sm:$0xff]  ;;  %v4298_v58 = vcombine.low %v70_v41, %v74_v42 }
  0x25   :  { %v5258_v57 = vld [vmem:[%s7731_s0 + $0x30] ss:$8 sps:$4 sm:$0xff]   ;;  %v5307_v17 = vld [vmem:[%s7731_s0 + $0x54] ss:$8 sps:$4 sm:$0xff]  }
  0x26   :  { %1039 = vmatpush2.bf16.msra.mxu0 %v4398_v11  ;;  %1232 = vmatpush2.bf16.msra.mxu1 %v4400_v12  ;;  %v103_v11 = vld [vmem:[%s7730_s1 + $0x198] sm:$0xff] }
  0x27   :  { %1040 = vmatprep.subr.bf16.mxu0 %v4391_v13  ;;  %1233 = vmatprep.subr.bf16.mxu1 %v4393_v14  ;;  %v107_v12 = vld [vmem:[%s7730_s1 + $0x1b8] sm:$0xff]  ;;  %v4340_v13 = vcombine.low %v111_v1, %v115_v2  ;;  %v4293_v2 = vcombine.high %v63_v55, %v67_v56 }
  0x28   :  { %v5161_v14 = vld [vmem:[%s7731_s0 + $0x14] ss:$8 sps:$4 sm:$0xff]   ;;  %v4333_v18 = vcombine.high %v103_v11, %v107_v12  ;;  %v4332_v23 = vcombine.low %v103_v11, %v107_v12  ;;  %v5296_v12 = vld [vmem:[%s7731_s0 + $0x40] ss:$8 sps:$4 sm:$0xff]  }
  0x29   :  { %v55_v0 = vld [vmem:[%s7730_s1 + $0x18] sm:$0xff] }
  0x2a   :  { %1041 = vmatpush2.bf16.msra.mxu0 %v4390_v19  ;;  %1234 = vmatpush2.bf16.msra.mxu1 %v4392_v20  ;;  %v95_v19 = vld [vmem:[%s7730_s1 + $0x158] sm:$0xff] }
  0x2b   :  { %1042 = vmatprep.subr.bf16.mxu0 %v4383_v21  ;;  %1235 = vmatprep.subr.bf16.mxu1 %v4385_v22  ;;  %v99_v20 = vld [vmem:[%s7730_s1 + $0x178] sm:$0xff]  ;;  %v4330_v21 = vcombine.low %v102_v8, %v106_v9 }
  0x2c   :  { %v5181_v22 = vld [vmem:[%s7731_s0 + $0x10] ss:$8 sps:$4 sm:$0xff]   ;;  %v4324_v34 = vcombine.low %v95_v19, %v99_v20 }
  0x2d   :  { %v59_v1 = vld [vmem:[%s7730_s1 + $0x38] sm:$0xff] }
  0x2e   :  { %1043 = vmatpush2.bf16.msra.mxu0 %v4382_v27  ;;  %1236 = vmatpush2.bf16.msra.mxu1 %v4384_v28  ;;  %v4325_v27 = vcombine.high %v95_v19, %v99_v20  ;;  %v90_v28 = vld [vmem:[%s7730_s1 + $0x130] sm:$0xff]  ;;  %v4285_v9 = vcombine.high %v55_v0, %v59_v1  ;;  %v179_v11 = vld [vmem:[%s7730_s1 + $0x3f8] sm:$0xff] }
  0x2f   :  { %1044 = vmatprep.subr.bf16.mxu0 %v4375_v29  ;;  %1237 = vmatprep.subr.bf16.mxu1 %v4377_v30  ;;  %v87_v29 = vld [vmem:[%s7730_s1 + $0x118] sm:$0xff]  ;;  %v4314_v40 = vcombine.low %v86_v25, %v90_v28 }
  0x30   :  { %v91_v30 = vld [vmem:[%s7730_s1 + $0x138] sm:$0xff] }
  0x31   :  { %v167_v20 = vld [vmem:[%s7730_s1 + $0x398] sm:$0xff] }
  0x32   :  { %1045 = vmatpush2.bf16.msra.mxu0 %v4374_v35  ;;  %1238 = vmatpush2.bf16.msra.mxu1 %v4376_v36  ;;  %v4315_v35 = vcombine.high %v86_v25, %v90_v28  ;;  %v4317_v36 = vcombine.high %v87_v29, %v91_v30  ;;  %v158_v25 = vld [vmem:[%s7730_s1 + $0x350] sm:$0xff] }
  0x33   :  { %1046 = vmatprep.subr.bf16.mxu0 %v4367_v37  ;;  %1239 = vmatprep.subr.bf16.mxu1 %v4369_v38  ;;  %v79_v37 = vld [vmem:[%s7730_s1 + $0xd8] sm:$0xff] }
  0x34   :  { %v83_v38 = vld [vmem:[%s7730_s1 + $0xf8] sm:$0xff] }
  0x35   :  { %v4309_v48 = vcombine.high %v79_v37, %v83_v38 }
  0x36   :  { %1047 = vmatpush2.bf16.msra.mxu0 %v4366_v43  ;;  %1240 = vmatpush2.bf16.msra.mxu1 %v4368_v44  ;;  %v5231_v43 = vld [vmem:[%s7731_s0 + $0x34] ss:$8 sps:$4 sm:$0xff]   ;;  %v4316_v44 = vcombine.low %v87_v29, %v91_v30 }
  0x37   :  { %1048 = vmatprep.subr.bf16.mxu0 %v4359_v45  ;;  %1241 = vmatprep.subr.bf16.mxu1 %v4361_v46  ;;  %v4307_v45 = vcombine.high %v78_v32, %v82_v33  ;;  %v71_v46 = vld [vmem:[%s7730_s1 + $0x98] sm:$0xff] }
  0x38   :  { %v163_v32 = vld [vmem:[%s7730_s1 + $0x378] sm:$0xff] }
  0x39   :  { %v5334_v33 = vld [vmem:[%s7731_s0 + $0x50] ss:$8 sps:$4 sm:$0xff]  }
  0x3a   :  { %1049 = vmatpush2.bf16.msra.mxu0 %v4358_v51  ;;  %1242 = vmatpush2.bf16.msra.mxu1 %v4360_v52  ;;  %v66_v51 = vld [vmem:[%s7730_s1 + $0x70] sm:$0xff]  ;;  %v4308_v52 = vcombine.low %v79_v37, %v83_v38  ;;  %v5345_v37 = vld [vmem:[%s7731_s0 + $0x64] ss:$8 sps:$4 sm:$0xff]  }
  0x3b   :  { %1050 = vmatprep.subr.bf16.mxu0 %v4351_v53  ;;  %1243 = vmatprep.subr.bf16.mxu1 %v4353_v54  ;;  %v4299_v53 = vcombine.high %v70_v41, %v74_v42  ;;  %v4301_v54 = vcombine.high %v71_v46, %v75_v47  ;;  %v4291_v63 = vcombine.high %v62_v50, %v66_v51  ;;  %v151_v41 = vld [vmem:[%s7730_s1 + $0x318] sm:$0xff] }
  0x3c   :  { %v155_v42 = vld [vmem:[%s7730_s1 + $0x338] sm:$0xff] }
  0x3e   :  { %1051 = vmatpush2.bf16.msra.mxu0 %v4350_v59  ;;  %1244 = vmatpush2.bf16.msra.mxu1 %v4352_v60  ;;  %v54_v59 = vld [vmem:[%s7730_s1 + $0x10] sm:$0xff] }
  0x3f   :  { %1052 = vmatprep.subr.bf16.mxu0 %v4343_v61  ;;  %1245 = vmatprep.subr.bf16.mxu1 %v4345_v62  ;;  %v58_v60 = vld [vmem:[%s7730_s1 + $0x30] sm:$0xff]  ;;  %v5269_v61 = vld [vmem:[%s7731_s0 + $0x44] ss:$8 sps:$4 sm:$0xff]   ;;  %v4300_v62 = vcombine.low %v71_v46, %v75_v47 }
  0x40   :  { %v4283_v8 = vcombine.high %v54_v59, %v58_v60  ;;  %v142_v46 = vld [vmem:[%s7730_s1 + $0x2d0] sm:$0xff] }
  0x41   :  { %v146_v47 = vld [vmem:[%s7730_s1 + $0x2f0] sm:$0xff] }
  0x42   :  { %1053 = vmatpush2.bf16.msra.mxu0 %v4342_v3  ;;  %1246 = vmatpush2.bf16.msra.mxu1 %v4344_v4  ;;  %v4290_v3 = vcombine.low %v62_v50, %v66_v51  ;;  %v174_v4 = vld [vmem:[%s7730_s1 + $0x3d0] sm:$0xff]  ;;  %v4381_v50 = vcombine.high %v151_v41, %v155_v42  ;;  %v143_v51 = vld [vmem:[%s7730_s1 + $0x2d8] sm:$0xff] }
  0x43   :  { %1408 = vmatprep.subr.bf16.mxu0 %v4339_v5  ;;  %1601 = vmatprep.subr.bf16.mxu1 %v4341_v6  ;;  %v178_v5 = vld [vmem:[%s7730_s1 + $0x3f0] sm:$0xff]  ;;  %v4292_v6 = vcombine.low %v63_v55, %v67_v56 }
  0x44   :  { %v4403_v19 = vcombine.high %v174_v4, %v178_v5  ;;  %v134_v55 = vld [vmem:[%s7730_s1 + $0x290] sm:$0xff] }
  0x45   :  { %1055 = vmatmul.mubr.bf16.vlgmr.msra.gmra.mxu0 %v5144_v7  ;;  %1248 = vmatmul.mubr.bf16.vlgmr.msra.gmra.mxu1 %v5144_v7  ;;  %v138_v56 = vld [vmem:[%s7730_s1 + $0x2b0] sm:$0xff] }
  0x46   :  { %1409 = vmatpush1.bf16.msra.mxu0 %v4338_v10  ;;  %1602 = vmatpush1.bf16.msra.mxu1 %v4340_v13  ;;  %v175_v10 = vld [vmem:[%s7730_s1 + $0x3d8] sm:$0xff]  ;;  %v4282_v13 = vcombine.low %v54_v59, %v58_v60  ;;  %v4380_v59 = vcombine.low %v151_v41, %v155_v42  ;;  %v4371_v60 = vcombine.high %v142_v46, %v146_v47 }
  0x47   :  { %1064 = vmatprep.mubr.bf16.mxu0 %v5161_v14  ;;  %1257 = vmatprep.mubr.bf16.mxu1 %v5161_v14  ;;  %v4404_v28 = vcombine.low %v175_v10, %v179_v11  ;;  %v5475_v41 = vld [vmem:[%s7731_s0 + $0xb4] ss:$8 sps:$4 sm:$0xff]   ;;  %v5484_v42 = vld [vmem:[%s7731_s0 + $0xb0] ss:$8 sps:$4 sm:$0xff]  }
  0x48   :  { %1410 = vmatprep.subr.bf16.mxu0 %v4331_v15  ;;  %1603 = vmatprep.subr.bf16.mxu1 %v4333_v18  ;;  %v166_v15 = vld [vmem:[%s7730_s1 + $0x390] sm:$0xff]  ;;  %v4284_v18 = vcombine.low %v55_v0, %v59_v1  ;;  %v4370_v1 = vcombine.low %v142_v46, %v146_v47 }
  0x49   :  { %v4395_v29 = vcombine.high %v166_v15, %v170_v16  ;;  %v5503_v46 = vld [vmem:[%s7731_s0 + $0xd4] ss:$8 sps:$4 sm:$0xff]   ;;  %v5512_v47 = vld [vmem:[%s7731_s0 + $0xd0] ss:$8 sps:$4 sm:$0xff]  }
  0x4a   :  { %1411 = vmatpush1.bf16.msra.mxu0 %v4330_v21  ;;  %1604 = vmatpush1.bf16.msra.mxu1 %v4332_v23  ;;  %v171_v21 = vld [vmem:[%s7730_s1 + $0x3b8] sm:$0xff]  ;;  %v4405_v23 = vcombine.high %v175_v10, %v179_v11  ;;  %v4362_v11 = vcombine.low %v134_v55, %v138_v56 }
  0x4b   :  { %1412 = vmatprep.subr.bf16.mxu0 %v4323_v24  ;;  %1605 = vmatprep.subr.bf16.mxu1 %v4325_v27  ;;  %v4402_v24 = vcombine.low %v174_v4, %v178_v5  ;;  %v162_v27 = vld [vmem:[%s7730_s1 + $0x370] sm:$0xff]  ;;  %v4397_v30 = vcombine.high %v167_v20, %v171_v21  ;;  %v4396_v38 = vcombine.low %v167_v20, %v171_v21  ;;  %v119_v20 = vld [vmem:[%s7730_s1 + $0x218] sm:$0xff] }
  0x4c   :  { %v4363_v5 = vcombine.high %v134_v55, %v138_v56  ;;  %v5410_v10 = vld [vmem:[%s7731_s0 + $0x70] ss:$8 sps:$4 sm:$0xff]   ;;  %v4654_v56 = vld [vmem:[%s7732_s3 + $0x64] ss:$8 sps:$4 sm:$0xff]  }
  0x4d   :  { %1065 = vmatmul.mubr.bf16.gmra.mxu0 %v5181_v22  ;;  %1258 = vmatmul.mubr.bf16.gmra.mxu1 %v5181_v22  ;;  %v123_v21 = vld [vmem:[%s7730_s1 + $0x238] sm:$0xff] }
  0x4e   :  { %1074 = vmatprep.mubr.bf16.mxu0 %v5190_v26  ;;  %1267 = vmatprep.mubr.bf16.mxu1 %v5190_v26  ;;  %v4649_v55 = vld [vmem:[%s7732_s3 + $0x170] ss:$8 sps:$4 sm:$0xff]  }
  0x4f   :  { %1413 = vmatpush1.bf16.msra.mxu0 %v4322_v31  ;;  %1606 = vmatpush1.bf16.msra.mxu1 %v4324_v34  ;;  %v159_v31 = vld [vmem:[%s7730_s1 + $0x358] sm:$0xff]  ;;  %v4394_v34 = vcombine.low %v166_v15, %v170_v16  ;;  %v122_v15 = vld [vmem:[%s7730_s1 + $0x230] sm:$0xff]  ;;  %v5421_v16 = vld [vmem:[%s7731_s0 + $0x84] ss:$8 sps:$4 sm:$0xff]  }
  0x50   :  { %1414 = vmatprep.subr.bf16.mxu0 %v4315_v35  ;;  %1607 = vmatprep.subr.bf16.mxu1 %v4317_v36  ;;  %v150_v35 = vld [vmem:[%s7730_s1 + $0x310] sm:$0xff] }
  0x51   :  { %v154_v36 = vld [vmem:[%s7730_s1 + $0x330] sm:$0xff] }
  0x53   :  { %1415 = vmatpush1.bf16.msra.mxu0 %v4314_v40  ;;  %1608 = vmatpush1.bf16.msra.mxu1 %v4316_v44  ;;  %v4387_v40 = vcombine.high %v158_v25, %v162_v27  ;;  %v4389_v44 = vcombine.high %v159_v31, %v163_v32 }
  0x54   :  { %1416 = vmatprep.subr.bf16.mxu0 %v4307_v45  ;;  %1609 = vmatprep.subr.bf16.mxu1 %v4309_v48  ;;  %v4386_v45 = vcombine.low %v158_v25, %v162_v27  ;;  %v4388_v48 = vcombine.low %v159_v31, %v163_v32  ;;  %v4648_v31 = vld [vmem:[%s7732_s3 + $0x74] ss:$8 sps:$4 sm:$0xff]   ;;  %v5439_v32 = vld [vmem:[%s7731_s0 + $0x80] ss:$8 sps:$4 sm:$0xff]  }
  0x55   :  { %1075 = vmatmul.mubr.bf16.gmra.mxu0 %v5220_v39  ;;  %1268 = vmatmul.mubr.bf16.gmra.mxu1 %v5220_v39 }
  0x56   :  { %1084 = vmatprep.mubr.bf16.mxu0 %v5231_v43  ;;  %1277 = vmatprep.mubr.bf16.mxu1 %v5231_v43 }
  0x57   :  { %1417 = vmatpush1.bf16.msra.mxu0 %v4306_v49  ;;  %1610 = vmatpush1.bf16.msra.mxu1 %v4308_v52  ;;  %v4379_v49 = vcombine.high %v150_v35, %v154_v36  ;;  %v147_v52 = vld [vmem:[%s7730_s1 + $0x2f8] sm:$0xff] }
  0x58   :  { %1418 = vmatprep.subr.bf16.mxu0 %v4299_v53  ;;  %1611 = vmatprep.subr.bf16.mxu1 %v4301_v54  ;;  %v5372_v53 = vld [vmem:[%s7731_s0 + $0x60] ss:$8 sps:$4 sm:$0xff]   ;;  %v4378_v54 = vcombine.low %v150_v35, %v154_v36  ;;  %v4373_v0 = vcombine.high %v143_v51, %v147_v52  ;;  %v4372_v4 = vcombine.low %v143_v51, %v147_v52  ;;  %v5447_v35 = vld [vmem:[%s7731_s0 + $0x94] ss:$8 sps:$4 sm:$0xff]   ;;  %v5456_v36 = vld [vmem:[%s7731_s0 + $0x90] ss:$8 sps:$4 sm:$0xff]  }
  0x59   :  { %v5540_v51 = vld [vmem:[%s7731_s0 + $0xf0] ss:$8 sps:$4 sm:$0xff]   ;;  %v4902_v52 = vld [vmem:[%s7731_s0 + $0x4] ss:$8 sps:$4 sm:$0xff]  }
  0x5b   :  { %1419 = vmatpush1.bf16.msra.mxu0 %v4298_v58  ;;  %1612 = vmatpush1.bf16.msra.mxu1 %v4300_v62  ;;  %v5383_v58 = vld [vmem:[%s7731_s0 + $0x74] ss:$8 sps:$4 sm:$0xff]  }
  0x5c   :  { %1420 = vmatprep.subr.bf16.mxu0 %v4291_v63  ;;  %1613 = vmatprep.subr.bf16.mxu1 %v4293_v2  ;;  %v135_v62 = vld [vmem:[%s7730_s1 + $0x298] sm:$0xff]  ;;  %v126_v2 = vld [vmem:[%s7730_s1 + $0x250] sm:$0xff] }
  0x5d   :  { %1085 = vmatmul.mubr.bf16.gmra.mxu0 %v5258_v57  ;;  %1278 = vmatmul.mubr.bf16.gmra.mxu1 %v5258_v57  ;;  %v139_v63 = vld [vmem:[%s7730_s1 + $0x2b8] sm:$0xff] }
  0x5e   :  { %1094 = vmatprep.mubr.bf16.mxu0 %v5269_v61  ;;  %1287 = vmatprep.mubr.bf16.mxu1 %v5269_v61 }
  0x5f   :  { %1421 = vmatpush1.bf16.msra.mxu0 %v4290_v3  ;;  %1614 = vmatpush1.bf16.msra.mxu1 %v4292_v6  ;;  %v130_v3 = vld [vmem:[%s7730_s1 + $0x270] sm:$0xff]  ;;  %v4365_v6 = vcombine.high %v135_v62, %v139_v63 }
  0x60   :  { %1422 = vmatprep.subr.bf16.mxu0 %v4283_v8  ;;  %1615 = vmatprep.subr.bf16.mxu1 %v4285_v9  ;;  %v127_v8 = vld [vmem:[%s7730_s1 + $0x258] sm:$0xff] }
  0x61   :  { %v131_v9 = vld [vmem:[%s7730_s1 + $0x278] sm:$0xff] }
  0x62   :  { %v4356_v25 = vcombine.low %v127_v8, %v131_v9 }
  0x63   :  { %1423 = vmatpush1.bf16.msra.mxu0 %v4282_v13  ;;  %1616 = vmatpush1.bf16.msra.mxu1 %v4284_v18  ;;  %v118_v13 = vld [vmem:[%s7730_s1 + $0x210] sm:$0xff]  ;;  %v4364_v18 = vcombine.low %v135_v62, %v139_v63  ;;  %v4655_v62 = vld [vmem:[%s7732_s3 + $0x160] ss:$8 sps:$4 sm:$0xff]  }
  0x64   :  { %1424 = vmatprep.subr.bf16.mxu0 %v4403_v19  ;;  %1617 = vmatprep.subr.bf16.mxu1 %v4405_v23  ;;  %v4355_v19 = vcombine.high %v126_v2, %v130_v3  ;;  %v4357_v23 = vcombine.high %v127_v8, %v131_v9  ;;  %v4347_v27 = vcombine.high %v118_v13, %v122_v15  ;;  %v4660_v63 = vld [vmem:[%s7732_s3 + $0x54] ss:$8 sps:$4 sm:$0xff]   ;;  %v4678_v8 = vld [vmem:[%s7732_s3 + $0x24] ss:$8 sps:$4 sm:$0xff]  }
  0x65   :  { %1095 = vmatmul.mubr.bf16.gmra.mxu0 %v5296_v12  ;;  %1288 = vmatmul.mubr.bf16.gmra.mxu1 %v5296_v12  ;;  %v4681_v9 = vld [vmem:[%s7732_s3 + $0x124] ss:$8 sps:$4 sm:$0xff]  }
  0x66   :  { %1104 = vmatprep.mubr.bf16.mxu0 %v5307_v17  ;;  %1297 = vmatprep.mubr.bf16.mxu1 %v5307_v17 }
  0x67   :  { %1425 = vmatpush2.bf16.msra.mxu0 %v4402_v24  ;;  %1618 = vmatpush2.bf16.msra.mxu1 %v4404_v28  ;;  %v4354_v24 = vcombine.low %v126_v2, %v130_v3  ;;  %v4349_v28 = vcombine.high %v119_v20, %v123_v21  ;;  %v4669_v2 = vld [vmem:[%s7732_s3 + $0x144] ss:$8 sps:$4 sm:$0xff]   ;;  %v4664_v3 = vld [vmem:[%s7732_s3 + $0x40] ss:$8 sps:$4 sm:$0xff]  }
  0x68   :  { %1426 = vmatprep.subr.bf16.mxu0 %v4395_v29  ;;  %1619 = vmatprep.subr.bf16.mxu1 %v4397_v30  ;;  %v4346_v29 = vcombine.low %v118_v13, %v122_v15  ;;  %v4348_v30 = vcombine.low %v119_v20, %v123_v21  ;;  %v4679_v13 = vld [vmem:[%s7732_s3 + $0x120] ss:$8 sps:$4 sm:$0xff]   ;;  %v4684_v15 = vld [vmem:[%s7732_s3 + $0x14] ss:$8 sps:$4 sm:$0xff]   ;;  %v4693_v20 = vld [vmem:[%s7732_s3 + $0x104] ss:$8 sps:$4 sm:$0xff]  }
  0x69   :  { %v4688_v21 = vld [vmem:[%s7732_s3] ss:$8 sps:$4 sm:$0xff]  }
  0x6b   :  { %1427 = vmatpush2.bf16.msra.mxu0 %v4394_v34  ;;  %1620 = vmatpush2.bf16.msra.mxu1 %v4396_v38  ;;  %v4651_v34 = vld [vmem:[%s7732_s3 + $0x174] ss:$8 sps:$4 sm:$0xff]   ;;  %v5461_v38 = vld [vmem:[%s7731_s0 + $0xa4] ss:$8 sps:$4 sm:$0xff]  }
  0x6c   :  { %1428 = vmatprep.subr.bf16.mxu0 %v4387_v40  ;;  %1621 = vmatprep.subr.bf16.mxu1 %v4389_v44  ;;  %v5470_v40 = vld [vmem:[%s7731_s0 + $0xa0] ss:$8 sps:$4 sm:$0xff]   ;;  %v5489_v44 = vld [vmem:[%s7731_s0 + $0xc4] ss:$8 sps:$4 sm:$0xff]  }
  0x6d   :  { %1105 = vmatmul.mubr.bf16.gmra.mxu0 %v5334_v33  ;;  %1298 = vmatmul.mubr.bf16.gmra.mxu1 %v5334_v33 }
  0x6e   :  { %1114 = vmatprep.mubr.bf16.mxu0 %v5345_v37  ;;  %1307 = vmatprep.mubr.bf16.mxu1 %v5345_v37 }
  0x6f   :  { %1429 = vmatpush2.bf16.msra.mxu0 %v4386_v45  ;;  %1622 = vmatpush2.bf16.msra.mxu1 %v4388_v48  ;;  %v5498_v45 = vld [vmem:[%s7731_s0 + $0xc0] ss:$8 sps:$4 sm:$0xff]   ;;  %v5517_v48 = vld [vmem:[%s7731_s0 + $0xe4] ss:$8 sps:$4 sm:$0xff]  }
  0x70   :  { %1430 = vmatprep.subr.bf16.mxu0 %v4379_v49  ;;  %1623 = vmatprep.subr.bf16.mxu1 %v4381_v50  ;;  %v5526_v49 = vld [vmem:[%s7731_s0 + $0xe0] ss:$8 sps:$4 sm:$0xff]   ;;  %v5531_v50 = vld [vmem:[%s7731_s0 + $0xf4] ss:$8 sps:$4 sm:$0xff]  }
  0x73   :  { %1431 = vmatpush2.bf16.msra.mxu0 %v4378_v54  ;;  %1624 = vmatpush2.bf16.msra.mxu1 %v4380_v59  ;;  %v4646_v54 = vld [vmem:[%s7732_s3 + $0x70] ss:$8 sps:$4 sm:$0xff]   ;;  %v4657_v59 = vld [vmem:[%s7732_s3 + $0x164] ss:$8 sps:$4 sm:$0xff]  }
  0x74   :  { %1432 = vmatprep.subr.bf16.mxu0 %v4371_v60  ;;  %1625 = vmatprep.subr.bf16.mxu1 %v4373_v0  ;;  %v4652_v60 = vld [vmem:[%s7732_s3 + $0x60] ss:$8 sps:$4 sm:$0xff]   ;;  %v4658_v0 = vld [vmem:[%s7732_s3 + $0x50] ss:$8 sps:$4 sm:$0xff]  }
  0x75   :  { %1115 = vmatmul.mubr.bf16.gmra.mxu0 %v5372_v53  ;;  %1308 = vmatmul.mubr.bf16.gmra.mxu1 %v5372_v53 }
  0x76   :  { %1124 = vmatprep.mubr.bf16.mxu0 %v5383_v58  ;;  %1317 = vmatprep.mubr.bf16.mxu1 %v5383_v58 }
  0x77   :  { %1433 = vmatpush2.bf16.msra.mxu0 %v4370_v1  ;;  %1626 = vmatpush2.bf16.msra.mxu1 %v4372_v4  ;;  %v4661_v1 = vld [vmem:[%s7732_s3 + $0x150] ss:$8 sps:$4 sm:$0xff]   ;;  %v4667_v4 = vld [vmem:[%s7732_s3 + $0x140] ss:$8 sps:$4 sm:$0xff]  }
  0x78   :  { %1434 = vmatprep.subr.bf16.mxu0 %v4363_v5  ;;  %1627 = vmatprep.subr.bf16.mxu1 %v4365_v6  ;;  %v4672_v5 = vld [vmem:[%s7732_s3 + $0x34] ss:$8 sps:$4 sm:$0xff]   ;;  %v4673_v6 = vld [vmem:[%s7732_s3 + $0x130] ss:$8 sps:$4 sm:$0xff]  }
  0x7b   :  { %1435 = vmatpush2.bf16.msra.mxu0 %v4362_v11  ;;  %1628 = vmatpush2.bf16.msra.mxu1 %v4364_v18  ;;  %v4676_v11 = vld [vmem:[%s7732_s3 + $0x20] ss:$8 sps:$4 sm:$0xff]   ;;  %v4685_v18 = vld [vmem:[%s7732_s3 + $0x110] ss:$8 sps:$4 sm:$0xff]  }
  0x7c   :  { %1436 = vmatprep.subr.bf16.mxu0 %v4355_v19  ;;  %1629 = vmatprep.subr.bf16.mxu1 %v4357_v23  ;;  %v4690_v19 = vld [vmem:[%s7732_s3 + $0x4] ss:$8 sps:$4 sm:$0xff]   ;;  %v4691_v23 = vld [vmem:[%s7732_s3 + $0x100] ss:$8 sps:$4 sm:$0xff]  }
  0x7d   :  { %1125 = vmatmul.mubr.bf16.gmra.mxu0 %v5410_v10  ;;  %1318 = vmatmul.mubr.bf16.gmra.mxu1 %v5410_v10 }
  0x7e   :  { %1134 = vmatprep.mubr.bf16.mxu0 %v5421_v16  ;;  %1327 = vmatprep.mubr.bf16.mxu1 %v5421_v16 }
  0x7f   :  { %1437 = vmatpush2.bf16.msra.mxu0 %v4354_v24  ;;  %1630 = vmatpush2.bf16.msra.mxu1 %v4356_v25  ;;  %v4696_v24 = vld [vmem:[%s7732_s3 + $0xf4] ss:$8 sps:$4 sm:$0xff]   ;;  %v4697_v25 = vld [vmem:[%s7732_s3 + $0x1f0] ss:$8 sps:$4 sm:$0xff]  }
  0x80   :  { %1438 = vmatprep.subr.bf16.mxu0 %v4347_v27  ;;  %1631 = vmatprep.subr.bf16.mxu1 %v4349_v28  ;;  %v4702_v27 = vld [vmem:[%s7732_s3 + $0xe4] ss:$8 sps:$4 sm:$0xff]  }
  0x81   :  { %v4705_v28 = vld [vmem:[%s7732_s3 + $0x1e4] ss:$8 sps:$4 sm:$0xff]  }
  0x83   :  { %1439 = vmatpush2.bf16.msra.mxu0 %v4346_v29  ;;  %1632 = vmatpush2.bf16.msra.mxu1 %v4348_v30  ;;  %v4700_v29 = vld [vmem:[%s7732_s3 + $0xe0] ss:$8 sps:$4 sm:$0xff]  }
  0x84   :  { %2958 = vmatprep.subr.bf16.mxu0 %v4648_v31  ;;  %3151 = vmatprep.subr.bf16.mxu1 %v4651_v34  ;;  %v4703_v30 = vld [vmem:[%s7732_s3 + $0x1e0] ss:$8 sps:$4 sm:$0xff]   ;;  %v4708_v31 = vld [vmem:[%s7732_s3 + $0xd4] ss:$8 sps:$4 sm:$0xff]   ;;  %v4709_v34 = vld [vmem:[%s7732_s3 + $0x1d0] ss:$8 sps:$4 sm:$0xff]  }
  0x85   :  { %1135 = vmatmul.mubr.bf16.gmra.mxu0 %v5439_v32  ;;  %1328 = vmatmul.mubr.bf16.gmra.mxu1 %v5439_v32 }
  0x86   :  { %1144 = vmatprep.mubr.bf16.mxu0 %v5447_v35  ;;  %1337 = vmatprep.mubr.bf16.mxu1 %v5447_v35 }
  0x8d   :  { %1145 = vmatmul.mubr.bf16.gmra.mxu0 %v5456_v36  ;;  %1338 = vmatmul.mubr.bf16.gmra.mxu1 %v5456_v36 }
  0x8e   :  { %1154 = vmatprep.mubr.bf16.mxu0 %v5461_v38  ;;  %1347 = vmatprep.mubr.bf16.mxu1 %v5461_v38 }
  0x95   :  { %1155 = vmatmul.mubr.bf16.gmra.mxu0 %v5470_v40  ;;  %1348 = vmatmul.mubr.bf16.gmra.mxu1 %v5470_v40 }
  0x96   :  { %1164 = vmatprep.mubr.bf16.mxu0 %v5475_v41  ;;  %1357 = vmatprep.mubr.bf16.mxu1 %v5475_v41 }
  0x9d   :  { %1165 = vmatmul.mubr.bf16.gmra.mxu0 %v5484_v42  ;;  %1358 = vmatmul.mubr.bf16.gmra.mxu1 %v5484_v42 }
  0x9e   :  { %1174 = vmatprep.mubr.bf16.mxu0 %v5489_v44  ;;  %1367 = vmatprep.mubr.bf16.mxu1 %v5489_v44 }
  0xa5   :  { %1175 = vmatmul.mubr.bf16.gmra.mxu0 %v5498_v45  ;;  %1368 = vmatmul.mubr.bf16.gmra.mxu1 %v5498_v45 }
  0xa6   :  { %1184 = vmatprep.mubr.bf16.mxu0 %v5503_v46  ;;  %1377 = vmatprep.mubr.bf16.mxu1 %v5503_v46 }
  0xad   :  { %1185 = vmatmul.mubr.bf16.gmra.mxu0 %v5512_v47  ;;  %1378 = vmatmul.mubr.bf16.gmra.mxu1 %v5512_v47 }
  0xae   :  { %1194 = vmatprep.mubr.bf16.mxu0 %v5517_v48  ;;  %1387 = vmatprep.mubr.bf16.mxu1 %v5517_v48 }
  0xb5   :  { %1195 = vmatmul.mubr.bf16.gmra.mxu0 %v5526_v49  ;;  %1388 = vmatmul.mubr.bf16.gmra.mxu1 %v5526_v49 }
  0xb6   :  { %1204 = vmatprep.mubr.bf16.mxu0 %v5531_v50  ;;  %1397 = vmatprep.mubr.bf16.mxu1 %v5531_v50 }
  0xbd   :  { %1205 = vmatmul.mubr.bf16.gmra.mxu0 %v5540_v51  ;;  %1398 = vmatmul.mubr.bf16.gmra.mxu1 %v5540_v51 }
  0xbe   :  { %1440 = vmatprep.mubr.bf16.mxu0 %v4902_v52  ;;  %1633 = vmatprep.mubr.bf16.mxu1 %v4902_v52  ;;  %v4714_v52 = vld [vmem:[%s7732_s3 + $0xc4] ss:$8 sps:$4 sm:$0xff]  }
  0xc5   :  { %1441 = vmatmul.mubr.bf16.vlgmr.msra.gmra.mxu0 %v5144_v7  ;;  %1634 = vmatmul.mubr.bf16.vlgmr.msra.gmra.mxu1 %v5144_v7  ;;  %v4663_v7 = vld [vmem:[%s7732_s3 + $0x154] ss:$8 sps:$4 sm:$0xff]  }
  0xc6   :  { %2959 = vmatpush1.bf16.msra.mxu0 %v4646_v54  ;;  %3152 = vmatpush1.bf16.msra.mxu1 %v4649_v55  ;;  %v4717_v54 = vld [vmem:[%s7732_s3 + $0x1c4] ss:$8 sps:$4 sm:$0xff]   ;;  %v4712_v55 = vld [vmem:[%s7732_s3 + $0xc0] ss:$8 sps:$4 sm:$0xff]  }
  0xc7   :  { %1450 = vmatprep.mubr.bf16.mxu0 %v5161_v14  ;;  %1643 = vmatprep.mubr.bf16.mxu1 %v5161_v14  ;;  %v4666_v14 = vld [vmem:[%s7732_s3 + $0x44] ss:$8 sps:$4 sm:$0xff]  }
  0xc8   :  { %2960 = vmatprep.subr.bf16.mxu0 %v4654_v56  ;;  %3153 = vmatprep.subr.bf16.mxu1 %v4657_v59  ;;  %v4715_v56 = vld [vmem:[%s7732_s3 + $0x1c0] ss:$8 sps:$4 sm:$0xff]   ;;  %v4720_v59 = vld [vmem:[%s7732_s3 + $0xb4] ss:$8 sps:$4 sm:$0xff]  }
  0xca   :  { %2961 = vmatpush1.bf16.msra.mxu0 %v4652_v60  ;;  %3154 = vmatpush1.bf16.msra.mxu1 %v4655_v62  ;;  %v4721_v60 = vld [vmem:[%s7732_s3 + $0x1b0] ss:$8 sps:$4 sm:$0xff]   ;;  %v4726_v62 = vld [vmem:[%s7732_s3 + $0xa4] ss:$8 sps:$4 sm:$0xff]  }
  0xcb   :  { %2962 = vmatprep.subr.bf16.mxu0 %v4660_v63  ;;  %3155 = vmatprep.subr.bf16.mxu1 %v4663_v7  ;;  %v4729_v63 = vld [vmem:[%s7732_s3 + $0x1a4] ss:$8 sps:$4 sm:$0xff]   ;;  %v4724_v7 = vld [vmem:[%s7732_s3 + $0xa0] ss:$8 sps:$4 sm:$0xff]  }
  0xcd   :  { %1451 = vmatmul.mubr.bf16.gmra.mxu0 %v5181_v22  ;;  %1644 = vmatmul.mubr.bf16.gmra.mxu1 %v5181_v22  ;;  %v4675_v22 = vld [vmem:[%s7732_s3 + $0x134] ss:$8 sps:$4 sm:$0xff]  }
  0xce   :  { %1460 = vmatprep.mubr.bf16.mxu0 %v5190_v26  ;;  %1653 = vmatprep.mubr.bf16.mxu1 %v5190_v26  ;;  %v4670_v26 = vld [vmem:[%s7732_s3 + $0x30] ss:$8 sps:$4 sm:$0xff]  }
  0xcf   :  { %2963 = vmatpush1.bf16.msra.mxu0 %v4658_v0  ;;  %3156 = vmatpush1.bf16.msra.mxu1 %v4661_v1  ;;  %v4727_v0 = vld [vmem:[%s7732_s3 + $0x1a0] ss:$8 sps:$4 sm:$0xff]   ;;  %v4732_v1 = vld [vmem:[%s7732_s3 + $0x94] ss:$8 sps:$4 sm:$0xff]  }
  0xd0   :  { %2964 = vmatprep.subr.bf16.mxu0 %v4666_v14  ;;  %3157 = vmatprep.subr.bf16.mxu1 %v4669_v2  ;;  %v4733_v14 = vld [vmem:[%s7732_s3 + $0x190] ss:$8 sps:$4 sm:$0xff]   ;;  %v4738_v2 = vld [vmem:[%s7732_s3 + $0x84] ss:$8 sps:$4 sm:$0xff]  }
  0xd3   :  { %2965 = vmatpush1.bf16.msra.mxu0 %v4664_v3  ;;  %3158 = vmatpush1.bf16.msra.mxu1 %v4667_v4  ;;  %v4741_v3 = vld [vmem:[%s7732_s3 + $0x184] ss:$8 sps:$4 sm:$0xff]   ;;  %v4736_v4 = vld [vmem:[%s7732_s3 + $0x80] ss:$8 sps:$4 sm:$0xff]  }
  0xd4   :  { %2966 = vmatprep.subr.bf16.mxu0 %v4672_v5  ;;  %3159 = vmatprep.subr.bf16.mxu1 %v4675_v22  ;;  %v4739_v5 = vld [vmem:[%s7732_s3 + $0x180] ss:$8 sps:$4 sm:$0xff]   ;;  %v4744_v22 = vld [vmem:[%s7732_s3 + $0x274] ss:$8 sps:$4 sm:$0xff]  }
  0xd5   :  { %1461 = vmatmul.mubr.bf16.gmra.mxu0 %v5220_v39  ;;  %1654 = vmatmul.mubr.bf16.gmra.mxu1 %v5220_v39  ;;  %v4687_v39 = vld [vmem:[%s7732_s3 + $0x114] ss:$8 sps:$4 sm:$0xff]  }
  0xd6   :  { %1470 = vmatprep.mubr.bf16.mxu0 %v5231_v43  ;;  %1663 = vmatprep.mubr.bf16.mxu1 %v5231_v43  ;;  %v4682_v43 = vld [vmem:[%s7732_s3 + $0x10] ss:$8 sps:$4 sm:$0xff]  }
  0xd7   :  { %2967 = vmatpush1.bf16.msra.mxu0 %v4670_v26  ;;  %3160 = vmatpush1.bf16.msra.mxu1 %v4673_v6 }
  0xd8   :  { %2968 = vmatprep.subr.bf16.mxu0 %v4678_v8  ;;  %3161 = vmatprep.subr.bf16.mxu1 %v4681_v9 }
  0xdb   :  { %2969 = vmatpush1.bf16.msra.mxu0 %v4676_v11  ;;  %3162 = vmatpush1.bf16.msra.mxu1 %v4679_v13 }
  0xdc   :  { %2970 = vmatprep.subr.bf16.mxu0 %v4684_v15  ;;  %3163 = vmatprep.subr.bf16.mxu1 %v4687_v39 }
  0xdd   :  { %1471 = vmatmul.mubr.bf16.gmra.mxu0 %v5258_v57  ;;  %1664 = vmatmul.mubr.bf16.gmra.mxu1 %v5258_v57  ;;  %v4699_v57 = vld [vmem:[%s7732_s3 + $0x1f4] ss:$8 sps:$4 sm:$0xff]  }
  0xde   :  { %1480 = vmatprep.mubr.bf16.mxu0 %v5269_v61  ;;  %1673 = vmatprep.mubr.bf16.mxu1 %v5269_v61  ;;  %v4694_v61 = vld [vmem:[%s7732_s3 + $0xf0] ss:$8 sps:$4 sm:$0xff]  }
  0xdf   :  { %2971 = vmatpush1.bf16.msra.mxu0 %v4682_v43  ;;  %3164 = vmatpush1.bf16.msra.mxu1 %v4685_v18 }
  0xe0   :  { %2972 = vmatprep.subr.bf16.mxu0 %v4690_v19  ;;  %3165 = vmatprep.subr.bf16.mxu1 %v4693_v20 }
  0xe3   :  { %2973 = vmatpush1.bf16.msra.mxu0 %v4688_v21  ;;  %3166 = vmatpush1.bf16.msra.mxu1 %v4691_v23 }
  0xe4   :  { %2974 = vmatprep.subr.bf16.mxu0 %v4696_v24  ;;  %3167 = vmatprep.subr.bf16.mxu1 %v4699_v57 }
  0xe5   :  { %1481 = vmatmul.mubr.bf16.gmra.mxu0 %v5296_v12  ;;  %1674 = vmatmul.mubr.bf16.gmra.mxu1 %v5296_v12  ;;  %v4711_v12 = vld [vmem:[%s7732_s3 + $0x1d4] ss:$8 sps:$4 sm:$0xff]  }
  0xe6   :  { %1490 = vmatprep.mubr.bf16.mxu0 %v5307_v17  ;;  %1683 = vmatprep.mubr.bf16.mxu1 %v5307_v17  ;;  %v4706_v17 = vld [vmem:[%s7732_s3 + $0xd0] ss:$8 sps:$4 sm:$0xff]  }
  0xe7   :  { %2975 = vmatpush2.bf16.msra.mxu0 %v4694_v61  ;;  %3168 = vmatpush2.bf16.msra.mxu1 %v4697_v25 }
  0xe8   :  { %2976 = vmatprep.subr.bf16.mxu0 %v4702_v27  ;;  %3169 = vmatprep.subr.bf16.mxu1 %v4705_v28 }
  0xeb   :  { %2977 = vmatpush2.bf16.msra.mxu0 %v4700_v29  ;;  %3170 = vmatpush2.bf16.msra.mxu1 %v4703_v30 }
  0xec   :  { %2978 = vmatprep.subr.bf16.mxu0 %v4708_v31  ;;  %3171 = vmatprep.subr.bf16.mxu1 %v4711_v12 }
  0xed   :  { %1491 = vmatmul.mubr.bf16.gmra.mxu0 %v5334_v33  ;;  %1684 = vmatmul.mubr.bf16.gmra.mxu1 %v5334_v33  ;;  %v4723_v33 = vld [vmem:[%s7732_s3 + $0x1b4] ss:$8 sps:$4 sm:$0xff]  }
  0xee   :  { %1500 = vmatprep.mubr.bf16.mxu0 %v5345_v37  ;;  %1693 = vmatprep.mubr.bf16.mxu1 %v5345_v37  ;;  %v4718_v37 = vld [vmem:[%s7732_s3 + $0xb0] ss:$8 sps:$4 sm:$0xff]  }
  0xef   :  { %2979 = vmatpush2.bf16.msra.mxu0 %v4706_v17  ;;  %3172 = vmatpush2.bf16.msra.mxu1 %v4709_v34 }
  0xf0   :  { %2980 = vmatprep.subr.bf16.mxu0 %v4714_v52  ;;  %3173 = vmatprep.subr.bf16.mxu1 %v4717_v54  ;;  %v182_v52 = vlaneseq }
  0xf3   :  { %2981 = vmatpush2.bf16.msra.mxu0 %v4712_v55  ;;  %3174 = vmatpush2.bf16.msra.mxu1 %v4715_v56 }
  0xf4   :  { %2982 = vmatprep.subr.bf16.mxu0 %v4720_v59  ;;  %3175 = vmatprep.subr.bf16.mxu1 %v4723_v33  ;;  %v5869_v33 = vshrl.u32 %v182_v52, 7 }
  0xf5   :  { %1501 = vmatmul.mubr.bf16.gmra.mxu0 %v5372_v53  ;;  %1694 = vmatmul.mubr.bf16.gmra.mxu1 %v5372_v53  ;;  %v4735_v53 = vld [vmem:[%s7732_s3 + $0x194] ss:$8 sps:$4 sm:$0xff]  }
  0xf6   :  { %1510 = vmatprep.mubr.bf16.mxu0 %v5383_v58  ;;  %1703 = vmatprep.mubr.bf16.mxu1 %v5383_v58  ;;  %v4730_v58 = vld [vmem:[%s7732_s3 + $0x90] ss:$8 sps:$4 sm:$0xff]   ;;  %7757 = vst [vmem:[#allocation2_spill] sm:$0xff] %v5869_v33 }
  0xf7   :  { %2983 = vmatpush2.bf16.msra.mxu0 %v4718_v37  ;;  %3176 = vmatpush2.bf16.msra.mxu1 %v4721_v60  ;;  %v7736_v60 = vsub.s32 1, %v5869_v33 }
  0xf8   :  { %2984 = vmatprep.subr.bf16.mxu0 %v4726_v62  ;;  %3177 = vmatprep.subr.bf16.mxu1 %v4729_v63  ;;  %v196_v62 = vsub.s32 3, %v5869_v33 }
  0xfb   :  { %2985 = vmatpush2.bf16.msra.mxu0 %v4724_v7  ;;  %3178 = vmatpush2.bf16.msra.mxu1 %v4727_v0  ;;  %v180_v0 = vld [vmem:[%s7733_s2] sm:$0xff] }
  0xfc   :  { %2986 = vmatprep.subr.bf16.mxu0 %v4732_v1  ;;  %3179 = vmatprep.subr.bf16.mxu1 %v4735_v53  ;;  %v5894_v53 = vrot.slane %v180_v0, %v7736_v60 }
  0xfd   :  { %1511 = vmatmul.mubr.bf16.gmra.mxu0 %v5410_v10  ;;  %1704 = vmatmul.mubr.bf16.gmra.mxu1 %v5410_v10  ;;  %v4747_v10 = vld [vmem:[%s7732_s3 + $0x374] ss:$8 sps:$4 sm:$0xff]  }
  0xfe   :  { %1520 = vmatprep.mubr.bf16.mxu0 %v5421_v16  ;;  %1713 = vmatprep.mubr.bf16.mxu1 %v5421_v16 }
  0xff   :  { %2987 = vmatpush2.bf16.msra.mxu0 %v4730_v58  ;;  %3180 = vmatpush2.bf16.msra.mxu1 %v4733_v14  ;;  %v5898_v58 = vrot.slane %v180_v0, %v196_v62 }
 0x100   :  { %2988 = vmatprep.subr.bf16.mxu0 %v4738_v2  ;;  %3181 = vmatprep.subr.bf16.mxu1 %v4741_v3  ;;  %v7737_v3 = vsub.s32 0, %v5869_v33 }
 0x103   :  { %2989 = vmatpush2.bf16.msra.mxu0 %v4736_v4  ;;  %3182 = vmatpush2.bf16.msra.mxu1 %v4739_v5 }
 0x104   :  { %3344 = vmatprep.subr.bf16.mxu0 %v4744_v22  ;;  %3537 = vmatprep.subr.bf16.mxu1 %v4747_v10  ;;  %v192_v22 = vsub.s32 2, %v5869_v33 }
 0x105   :  { %v5771_v16 = vpop.f32.mrf.mxu0  ;;  %1521 = vmatmul.mubr.bf16.gmra.mxu0 %v5439_v32  ;;  %v5774_v26 = vpop.f32.mrf.mxu1  ;;  %1714 = vmatmul.mubr.bf16.gmra.mxu1 %v5439_v32 }
 0x106   :  { %1530 = vmatprep.mubr.bf16.mxu0 %v5447_v35  ;;  %1723 = vmatprep.mubr.bf16.mxu1 %v5447_v35 }
 0x107   :  { %v5778_v6 = vpop.f32.mrf.mxu0  ;;  %v5781_v8 = vpop.f32.mrf.mxu1 }
 0x108   :  { %v1059_v10 = vadd.f32 %v5778_v6, %v5894_v53 }
 0x109   :  { %v5783_v9 = vpop.f32.mrf.mxu0  ;;  %v5785_v11 = vpop.f32.mrf.mxu1 }
 0x10b   :  { %v5787_v13 = vpop.f32.mrf.mxu0  ;;  %v5789_v15 = vpop.f32.mrf.mxu1 }
 0x10c   :  { %v1256_v4 = vadd.f32 %v5789_v15, %v5898_v58 }
 0x10d   :  { %v5791_v39 = vpop.f32.mrf.mxu0  ;;  %1531 = vmatmul.mubr.bf16.gmra.mxu0 %v5456_v36  ;;  %v5794_v32 = vpop.f32.mrf.mxu1  ;;  %1724 = vmatmul.mubr.bf16.gmra.mxu1 %v5456_v36 }
 0x10e   :  { %1540 = vmatprep.mubr.bf16.mxu0 %v5461_v38  ;;  %1733 = vmatprep.mubr.bf16.mxu1 %v5461_v38  ;;  %v1805_v6 = vmax.f32 %v1256_v4, 0.0 }
 0x10f   :  { %v5798_v35 = vpop.f32.mrf.mxu0  ;;  %v5801_v43 = vpop.f32.mrf.mxu1 }
 0x111   :  { %v5803_v18 = vpop.f32.mrf.mxu0  ;;  %v5805_v19 = vpop.f32.mrf.mxu1 }
 0x113   :  { %v5807_v20 = vpop.f32.mrf.mxu0  ;;  %v5809_v21 = vpop.f32.mrf.mxu1 }
 0x115   :  { %v5811_v23 = vpop.f32.mrf.mxu0  ;;  %1541 = vmatmul.mubr.bf16.gmra.mxu0 %v5470_v40  ;;  %v5814_v36 = vpop.f32.mrf.mxu1  ;;  %1734 = vmatmul.mubr.bf16.gmra.mxu1 %v5470_v40 }
 0x116   :  { %1550 = vmatprep.mubr.bf16.mxu0 %v5475_v41  ;;  %1743 = vmatprep.mubr.bf16.mxu1 %v5475_v41 }
 0x117   :  { %v5818_v38 = vpop.f32.mrf.mxu0  ;;  %v5821_v24 = vpop.f32.mrf.mxu1 }
 0x119   :  { %v5823_v57 = vpop.f32.mrf.mxu0  ;;  %v5825_v61 = vpop.f32.mrf.mxu1 }
 0x11b   :  { %v5827_v25 = vpop.f32.mrf.mxu0  ;;  %v5829_v27 = vpop.f32.mrf.mxu1 }
 0x11d   :  { %v5831_v28 = vpop.f32.mrf.mxu0  ;;  %1551 = vmatmul.mubr.bf16.gmra.mxu0 %v5484_v42  ;;  %v5834_v40 = vpop.f32.mrf.mxu1  ;;  %1744 = vmatmul.mubr.bf16.gmra.mxu1 %v5484_v42 }
 0x11e   :  { %1560 = vmatprep.mubr.bf16.mxu0 %v5489_v44  ;;  %1753 = vmatprep.mubr.bf16.mxu1 %v5489_v44 }
 0x11f   :  { %v5838_v41 = vpop.f32.mrf.mxu0  ;;  %v5841_v29 = vpop.f32.mrf.mxu1 }
 0x121   :  { %v5843_v30 = vpop.f32.mrf.mxu0  ;;  %v5845_v31 = vpop.f32.mrf.mxu1 }
 0x123   :  { %v5847_v12 = vpop.f32.mrf.mxu0  ;;  %v5849_v17 = vpop.f32.mrf.mxu1 }
 0x125   :  { %v5851_v34 = vpop.f32.mrf.mxu0  ;;  %1561 = vmatmul.mubr.bf16.gmra.mxu0 %v5498_v45  ;;  %v5854_v42 = vpop.f32.mrf.mxu1  ;;  %1754 = vmatmul.mubr.bf16.gmra.mxu1 %v5498_v45 }
 0x126   :  { %1570 = vmatprep.mubr.bf16.mxu0 %v5503_v46  ;;  %1763 = vmatprep.mubr.bf16.mxu1 %v5503_v46 }
 0x127   :  { %v5858_v44 = vpop.f32.mrf.mxu0  ;;  %v5861_v54 = vpop.f32.mrf.mxu1 }
 0x129   :  { %v5863_v55 = vpop.f32.mrf.mxu0  ;;  %v5865_v56 = vpop.f32.mrf.mxu1 }
 0x12b   :  { %v5867_v59 = vpop.f32.mrf.mxu0  ;;  %v5871_v37 = vpop.f32.mrf.mxu1 }
 0x12d   :  { %v5873_v45 = vpop.f32.mrf.mxu0  ;;  %1571 = vmatmul.mubr.bf16.gmra.mxu0 %v5512_v47  ;;  %v5877_v46 = vpop.f32.mrf.mxu1  ;;  %1764 = vmatmul.mubr.bf16.gmra.mxu1 %v5512_v47 }
 0x12e   :  { %7758 = vst [vmem:[#allocation3_spill] sm:$0xff] %v5877_v46  ;;  %1580 = vmatprep.mubr.bf16.mxu0 %v5517_v48  ;;  %1773 = vmatprep.mubr.bf16.mxu1 %v5517_v48  ;;  %v1063_v48 = vadd.f32 %v5787_v13, %v5894_v53  ;;  %v1252_v13 = vadd.f32 %v5781_v8, %v5898_v58  ;;  %v1795_v46 = vmax.f32 %v1059_v10, 0.0 }
 0x12f   :  { %v5882_v63 = vpop.f32.mrf.mxu0  ;;  %v5885_v7 = vpop.f32.mrf.mxu1 }
 0x130   :  { %v1803_v15 = vmax.f32 %v1063_v48, 0.0  ;;  %v1797_v8 = vmax.f32 %v1252_v13, 0.0 }
 0x131   :  { %v5890_v1 = vpop.f32.mrf.mxu0  ;;  %v5896_v47 = vpop.f32.mrf.mxu1 }
 0x132   :  { %7759 = vst [vmem:[#allocation4_spill] sm:$0xff] %v5896_v47  ;;  %v2051_v33 = vpack.c.bf16 %v1803_v15, %v1795_v46 }
 0x133   :  { %v5900_v14 = vpop.f32.mrf.mxu0  ;;  %v5904_v2 = vpop.f32.mrf.mxu1 }
 0x135   :  { %v5909_v5 = vpop.f32.mrf.mxu0  ;;  %1581 = vmatmul.mubr.bf16.gmra.mxu0 %v5526_v49  ;;  %v5915_v52 = vpop.f32.mrf.mxu1  ;;  %1774 = vmatmul.mubr.bf16.gmra.mxu1 %v5526_v49  ;;  %v5932_v49 = vrot.slane %v180_v0, %v192_v22  ;;  %v1266_v22 = vadd.f32 %v5809_v21, %v5898_v58  ;;  %v1262_v21 = vadd.f32 %v5801_v43, %v5898_v58 }
 0x136   :  { %7760 = vst [vmem:[#allocation5_spill] sm:$0xff] %v5909_v5  ;;  %7761 = vst [vmem:[#allocation6_spill] sm:$0xff] %v5915_v52  ;;  %1590 = vmatprep.mubr.bf16.mxu0 %v5531_v50  ;;  %1783 = vmatprep.mubr.bf16.mxu1 %v5531_v50  ;;  %v5928_v5 = vrot.slane %v180_v0, %v7737_v3  ;;  %v1073_v3 = vadd.f32 %v5807_v20, %v5894_v53 }
 0x137   :  { %v5921_v62 = vpop.f32.mrf.mxu0  ;;  %v5924_v60 = vpop.f32.mrf.mxu1  ;;  %v1254_v48 = vadd.f32 %v5785_v11, %v5932_v49  ;;  %v1250_v11 = vadd.f32 %v5774_v26, %v5932_v49  ;;  %v1069_v20 = vadd.f32 %v5798_v35, %v5894_v53 }
 0x138   :  { %7762 = vst [vmem:[#allocation7_spill] sm:$0xff] %v5921_v62  ;;  %v1061_v62 = vadd.f32 %v5783_v9, %v5928_v5  ;;  %v1057_v0 = vadd.f32 %v5771_v16, %v5928_v5  ;;  %v2053_v9 = vpack.c.bf16 %v1805_v6, %v1797_v8  ;;  %v1819_v6 = vmax.f32 %v1073_v3, 0.0  ;;  %v4742_v3 = vld [vmem:[%s7732_s3 + $0x270] ss:$8 sps:$4 sm:$0xff]  }
 0x139   :  { %v5930_v52 = vpop.f32.mrf.mxu0  ;;  %v5934_v47 = vpop.f32.mrf.mxu1  ;;  %v1804_v15 = vmax.f32 %v1254_v48, 0.0  ;;  %v1796_v35 = vmax.f32 %v1250_v11, 0.0  ;;  %v1071_v43 = vadd.f32 %v5803_v18, %v5928_v5  ;;  %v4745_v18 = vld [vmem:[%s7732_s3 + $0x370] ss:$8 sps:$4 sm:$0xff]  }
 0x13a   :  { %7763 = vst [vmem:[#allocation8_spill] sm:$0xff] %v5930_v52  ;;  %7764 = vst [vmem:[#allocation9_spill] sm:$0xff] %v5934_v47  ;;  %v1802_v16 = vmax.f32 %v1061_v62, 0.0  ;;  %v1794_v26 = vmax.f32 %v1057_v0, 0.0  ;;  %v1264_v62 = vadd.f32 %v5805_v19, %v5932_v49  ;;  %v4750_v19 = vld [vmem:[%s7732_s3 + $0x264] ss:$8 sps:$4 sm:$0xff]  }
 0x13b   :  { %v5938_v50 = vpop.f32.mrf.mxu0  ;;  %v5944_v4 = vpop.f32.mrf.mxu1  ;;  %v2052_v0 = vpack.c.bf16 %v1804_v15, %v1796_v35  ;;  %v4753_v15 = vld [vmem:[%s7732_s3 + $0x364] ss:$8 sps:$4 sm:$0xff]  }
 0x13d   :  { %v5950_v10 = vpop.f32.mrf.mxu0  ;;  %1591 = vmatmul.mubr.bf16.gmra.mxu0 %v5540_v51  ;;  %v5957_v13 = vpop.f32.mrf.mxu1  ;;  %1784 = vmatmul.mubr.bf16.gmra.mxu1 %v5540_v51  ;;  %v2050_v51 = vpack.c.bf16 %v1802_v16, %v1794_v26  ;;  %v1260_v16 = vadd.f32 %v5794_v32, %v5932_v49  ;;  %v1820_v32 = vmax.f32 %v1264_v62, 0.0 }
 0x13e   :  { %7765 = vst [vmem:[#allocation10_spill] sm:$0xff] %v5950_v10  ;;  %7766 = vst [vmem:[#allocation11_spill] sm:$0xff] %v5957_v13  ;;  %2990 = vmatprep.mubr.bf16.mxu0 %v2051_v33  ;;  %3183 = vmatprep.mubr.bf16.mxu1 %v2053_v9  ;;  %v1821_v10 = vmax.f32 %v1266_v22, 0.0  ;;  %v1811_v13 = vmax.f32 %v1069_v20, 0.0  ;;  %v1813_v33 = vmax.f32 %v1262_v21, 0.0  ;;  %v1083_v22 = vadd.f32 %v5827_v25, %v5894_v53 }
 0x13f   :  { %v5962_v46 = vpop.f32.mrf.mxu0  ;;  %v5964_v8 = vpop.f32.mrf.mxu1  ;;  %v1067_v20 = vadd.f32 %v5791_v39, %v5928_v5  ;;  %v1276_v25 = vadd.f32 %v5829_v27, %v5898_v58  ;;  %v1818_v39 = vmax.f32 %v1071_v43, 0.0  ;;  %v1272_v27 = vadd.f32 %v5821_v24, %v5898_v58  ;;  %v4756_v24 = vld [vmem:[%s7732_s3 + $0x254] ss:$8 sps:$4 sm:$0xff]  }
 0x140   :  { %v2059_v11 = vpack.c.bf16 %v1819_v6, %v1811_v13  ;;  %v2061_v13 = vpack.c.bf16 %v1821_v10, %v1813_v33  ;;  %v1079_v6 = vadd.f32 %v5818_v38, %v5894_v53  ;;  %v4748_v10 = vld [vmem:[%s7732_s3 + $0x260] ss:$8 sps:$4 sm:$0xff]   ;;  %v1812_v62 = vmax.f32 %v1260_v16, 0.0 }
 0x141   :  { %v5966_v47 = vpop.f32.mrf.mxu0  ;;  %v5968_v52 = vpop.f32.mrf.mxu1  ;;  %v4751_v38 = vld [vmem:[%s7732_s3 + $0x360] ss:$8 sps:$4 sm:$0xff]   ;;  %v1810_v43 = vmax.f32 %v1067_v20, 0.0  ;;  %v1077_v20 = vadd.f32 %v5811_v23, %v5928_v5  ;;  %v1829_v16 = vmax.f32 %v1272_v27, 0.0  ;;  %v4757_v23 = vld [vmem:[%s7732_s3 + $0x350] ss:$8 sps:$4 sm:$0xff]   ;;  %v1286_v27 = vadd.f32 %v5849_v17, %v5898_v58 }
 0x142   :  { %v1282_v17 = vadd.f32 %v5841_v29, %v5898_v58  ;;  %v4768_v29 = vld [vmem:[%s7732_s3 + $0x234] ss:$8 sps:$4 sm:$0xff]  }
 0x143   :  { %v5974_v48 = vpop.f32.mrf.mxu0  ;;  %v5981_v9 = vpop.f32.mrf.mxu1 }
 0x145   :  { %v5995_v21 = vpop.f32.mrf.mxu0  ;;  %2991 = vmatmul.mubr.bf16.vlgmr.msra.gmra.mxu0 %v2050_v51  ;;  %v6002_v26 = vpop.f32.mrf.mxu1  ;;  %3184 = vmatmul.mubr.bf16.vlgmr.msra.gmra.mxu1 %v2052_v0  ;;  %v1835_v51 = vmax.f32 %v1083_v22, 0.0  ;;  %v4759_v22 = vld [vmem:[%s7732_s3 + $0x354] ss:$8 sps:$4 sm:$0xff]  }
 0x146   :  { %7767 = vst [vmem:[#allocation12_spill] sm:$0xff] %v5995_v21  ;;  %7768 = vst [vmem:[#allocation13_spill] sm:$0xff] %v6002_v26  ;;  %3000 = vmatprep.mubr.bf16.mxu0 %v2059_v11  ;;  %3193 = vmatprep.mubr.bf16.mxu1 %v2061_v13  ;;  %v1827_v11 = vmax.f32 %v1079_v6, 0.0  ;;  %v2058_v13 = vpack.c.bf16 %v1818_v39, %v1810_v43  ;;  %v2060_v26 = vpack.c.bf16 %v1820_v32, %v1812_v62  ;;  %v4762_v32 = vld [vmem:[%s7732_s3 + $0x244] ss:$8 sps:$4 sm:$0xff]  }
 0x147   :  { %3345 = vmatpush1.bf16.msra.mxu0 %v4742_v3  ;;  %v6006_v35 = vpop.f32.mrf.mxu0  ;;  %v6011_v33 = vpop.f32.mrf.mxu1  ;;  %3538 = vmatpush1.bf16.msra.mxu1 %v4745_v18  ;;  %v1837_v3 = vmax.f32 %v1276_v25, 0.0  ;;  %v1081_v18 = vadd.f32 %v5823_v57, %v5928_v5  ;;  %v1274_v6 = vadd.f32 %v5825_v61, %v5932_v49  ;;  %v1093_v57 = vadd.f32 %v5847_v12, %v5894_v53 }
 0x148   :  { %3346 = vmatprep.subr.bf16.mxu0 %v4750_v19  ;;  %3539 = vmatprep.subr.bf16.mxu1 %v4753_v15  ;;  %v4754_v15 = vld [vmem:[%s7732_s3 + $0x250] ss:$8 sps:$4 sm:$0xff]   ;;  %v2067_v39 = vpack.c.bf16 %v1835_v51, %v1827_v11  ;;  %v1270_v51 = vadd.f32 %v5814_v36, %v5932_v49  ;;  %v4763_v36 = vld [vmem:[%s7732_s3 + $0x340] ss:$8 sps:$4 sm:$0xff]  }
 0x149   :  { %v6019_v0 = vpop.f32.mrf.mxu0  ;;  %v6026_v19 = vpop.f32.mrf.mxu1  ;;  %v2069_v12 = vpack.c.bf16 %v1837_v3, %v1829_v16  ;;  %v4760_v3 = vld [vmem:[%s7732_s3 + $0x240] ss:$8 sps:$4 sm:$0xff]   ;;  %v1851_v11 = vmax.f32 %v1093_v57, 0.0  ;;  %v4771_v16 = vld [vmem:[%s7732_s3 + $0x334] ss:$8 sps:$4 sm:$0xff]  }
 0x14b   :  { %v6030_v25 = vpop.f32.mrf.mxu0  ;;  %3347 = vmatpush1.bf16.msra.mxu0 %v4748_v10  ;;  %v6039_v21 = vpop.f32.mrf.mxu1  ;;  %3540 = vmatpush1.bf16.msra.mxu1 %v4751_v38  ;;  %v4765_v10 = vld [vmem:[%s7732_s3 + $0x344] ss:$8 sps:$4 sm:$0xff]   ;;  %v1834_v38 = vmax.f32 %v1081_v18, 0.0  ;;  %v1853_v18 = vmax.f32 %v1286_v27, 0.0  ;;  %v1284_v27 = vadd.f32 %v5845_v31, %v5932_v49 }
 0x14c   :  { %3348 = vmatprep.subr.bf16.mxu0 %v4756_v24  ;;  %3541 = vmatprep.subr.bf16.mxu1 %v4759_v22  ;;  %v1089_v24 = vadd.f32 %v5838_v41, %v5894_v53  ;;  %v1826_v41 = vmax.f32 %v1077_v20, 0.0  ;;  %v1836_v22 = vmax.f32 %v1274_v6, 0.0  ;;  %v4774_v31 = vld [vmem:[%s7732_s3 + $0x224] ss:$8 sps:$4 sm:$0xff]  }
 0x14d   :  { %v6049_v61 = vpop.f32.mrf.mxu0  ;;  %3001 = vmatmul.mubr.bf16.gmra.mxu0 %v2058_v13  ;;  %v6058_v43 = vpop.f32.mrf.mxu1  ;;  %3194 = vmatmul.mubr.bf16.gmra.mxu1 %v2060_v26 }
 0x14e   :  { %3010 = vmatprep.mubr.bf16.mxu0 %v2067_v39  ;;  %3203 = vmatprep.mubr.bf16.mxu1 %v2069_v12  ;;  %v2066_v20 = vpack.c.bf16 %v1834_v38, %v1826_v41  ;;  %v1843_v6 = vmax.f32 %v1089_v24, 0.0  ;;  %v1087_v39 = vadd.f32 %v5831_v28, %v5928_v5  ;;  %v1103_v38 = vadd.f32 %v5867_v59, %v5894_v53 }
 0x14f   :  { %v6062_v62 = vpop.f32.mrf.mxu0  ;;  %3349 = vmatpush1.bf16.msra.mxu0 %v4754_v15  ;;  %v6070_v26 = vpop.f32.mrf.mxu1  ;;  %3542 = vmatpush1.bf16.msra.mxu1 %v4757_v23  ;;  %v1828_v15 = vmax.f32 %v1270_v51, 0.0  ;;  %v1845_v23 = vmax.f32 %v1282_v17, 0.0  ;;  %v1280_v17 = vadd.f32 %v5834_v40, %v5932_v49 }
 0x150   :  { %3350 = vmatprep.subr.bf16.mxu0 %v4762_v32  ;;  %3543 = vmatprep.subr.bf16.mxu1 %v4765_v10  ;;  %v1091_v32 = vadd.f32 %v5843_v30, %v5928_v5  ;;  %v4766_v10 = vld [vmem:[%s7732_s3 + $0x230] ss:$8 sps:$4 sm:$0xff]   ;;  %v2075_v28 = vpack.c.bf16 %v1851_v11, %v1843_v6  ;;  %v1842_v6 = vmax.f32 %v1087_v39, 0.0  ;;  %v1097_v39 = vadd.f32 %v5851_v34, %v5928_v5 }
 0x151   :  { %v6075_v13 = vpop.f32.mrf.mxu0  ;;  %v6080_v57 = vpop.f32.mrf.mxu1  ;;  %v2068_v51 = vpack.c.bf16 %v1836_v22, %v1828_v15  ;;  %v4769_v30 = vld [vmem:[%s7732_s3 + $0x330] ss:$8 sps:$4 sm:$0xff]   ;;  %v2077_v41 = vpack.c.bf16 %v1853_v18, %v1845_v23  ;;  %v1099_v22 = vadd.f32 %v5858_v44, %v5894_v53  ;;  %v4772_v18 = vld [vmem:[%s7732_s3 + $0x220] ss:$8 sps:$4 sm:$0xff]   ;;  %v1844_v23 = vmax.f32 %v1280_v17, 0.0 }
 0x152   :  { %v1850_v40 = vmax.f32 %v1091_v32, 0.0  ;;  %v4775_v44 = vld [vmem:[%s7732_s3 + $0x320] ss:$8 sps:$4 sm:$0xff]   ;;  %v4781_v34 = vld [vmem:[%s7732_s3 + $0x310] ss:$8 sps:$4 sm:$0xff]  }
 0x153   :  { %v6088_v12 = vpop.f32.mrf.mxu0  ;;  %3351 = vmatpush1.bf16.msra.mxu0 %v4760_v3  ;;  %v6095_v24 = vpop.f32.mrf.mxu1  ;;  %3544 = vmatpush1.bf16.msra.mxu1 %v4763_v36  ;;  %v1296_v3 = vadd.f32 %v5871_v37, %v5898_v58  ;;  %v4777_v36 = vld [vmem:[%s7732_s3 + $0x324] ss:$8 sps:$4 sm:$0xff]   ;;  %v1292_v37 = vadd.f32 %v5861_v54, %v5898_v58  ;;  %v4780_v54 = vld [vmem:[%s7732_s3 + $0x214] ss:$8 sps:$4 sm:$0xff]  }
 0x154   :  { %3352 = vmatprep.subr.bf16.mxu0 %v4768_v29  ;;  %3545 = vmatprep.subr.bf16.mxu1 %v4771_v16  ;;  %v1852_v29 = vmax.f32 %v1284_v27, 0.0  ;;  %v1867_v16 = vmax.f32 %v1103_v38, 0.0  ;;  %v1101_v38 = vadd.f32 %v5863_v55, %v5928_v5  ;;  %v1113_v55 = vadd.f32 %v5900_v14, %v5894_v53 }
 0x155   :  { %v6107_v59 = vpop.f32.mrf.mxu0  ;;  %3011 = vmatmul.mubr.bf16.gmra.mxu0 %v2066_v20  ;;  %v6114_v11 = vpop.f32.mrf.mxu1  ;;  %3204 = vmatmul.mubr.bf16.gmra.mxu1 %v2068_v51  ;;  %v1869_v32 = vmax.f32 %v1296_v3, 0.0  ;;  %v1859_v51 = vmax.f32 %v1099_v22, 0.0  ;;  %v1861_v17 = vmax.f32 %v1292_v37, 0.0  ;;  %v1306_v37 = vadd.f32 %v5904_v2, %v5898_v58 }
 0x156   :  { %3020 = vmatprep.mubr.bf16.mxu0 %v2075_v28  ;;  %3213 = vmatprep.mubr.bf16.mxu1 %v2077_v41  ;;  %v4778_v41 = vld [vmem:[%s7732_s3 + $0x210] ss:$8 sps:$4 sm:$0xff]   ;;  %v1302_v2 = vadd.f32 %v5885_v7, %v5898_v58  ;;  %v4792_v7 = vld [vmem:[%s7732_s3 + $0x2f4] ss:$8 sps:$4 sm:$0xff]  }
 0x157   :  { %v6118_v15 = vpop.f32.mrf.mxu0  ;;  %3353 = vmatpush1.bf16.msra.mxu0 %v4766_v10  ;;  %v6123_v20 = vpop.f32.mrf.mxu1  ;;  %3546 = vmatpush1.bf16.msra.mxu1 %v4769_v30  ;;  %v4783_v10 = vld [vmem:[%s7732_s3 + $0x314] ss:$8 sps:$4 sm:$0xff]   ;;  %v2074_v30 = vpack.c.bf16 %v1850_v40, %v1842_v6  ;;  %v2083_v40 = vpack.c.bf16 %v1867_v16, %v1859_v51  ;;  %v2085_v14 = vpack.c.bf16 %v1869_v32, %v1861_v17  ;;  %v4784_v32 = vld [vmem:[%s7732_s3 + $0x200] ss:$8 sps:$4 sm:$0xff]   ;;  %v1883_v51 = vmax.f32 %v1113_v55, 0.0 }
 0x158   :  { %3354 = vmatprep.subr.bf16.mxu0 %v4774_v31  ;;  %3547 = vmatprep.subr.bf16.mxu1 %v4777_v36  ;;  %v2076_v31 = vpack.c.bf16 %v1852_v29, %v1844_v23  ;;  %v1294_v36 = vadd.f32 %v5865_v56, %v5932_v49  ;;  %v4786_v29 = vld [vmem:[%s7732_s3 + $0x204] ss:$8 sps:$4 sm:$0xff]   ;;  %v1290_v16 = vadd.f32 %v5854_v42, %v5932_v49  ;;  %v4787_v42 = vld [vmem:[%s7732_s3 + $0x300] ss:$8 sps:$4 sm:$0xff]   ;;  %v4795_v17 = vld [vmem:[%s7732_s3 + $0x3f4] ss:$8 sps:$4 sm:$0xff]  }
 0x159   :  { %v6131_v27 = vpop.f32.mrf.mxu0  ;;  %v6138_v28 = vpop.f32.mrf.mxu1 }
 0x15b   :  { %v6142_v3 = vpop.f32.mrf.mxu0  ;;  %3355 = vmatpush1.bf16.msra.mxu0 %v4772_v18  ;;  %v6151_v22 = vpop.f32.mrf.mxu1  ;;  %3548 = vmatpush1.bf16.msra.mxu1 %v4775_v44  ;;  %v4789_v18 = vld [vmem:[%s7732_s3 + $0x304] ss:$8 sps:$4 sm:$0xff]   ;;  %v1866_v44 = vmax.f32 %v1101_v38, 0.0 }
 0x15c   :  { %3356 = vmatprep.subr.bf16.mxu0 %v4780_v54  ;;  %3549 = vmatprep.subr.bf16.mxu1 %v4783_v10  ;;  %v1109_v54 = vadd.f32 %v5882_v63, %v5894_v53  ;;  %v1858_v63 = vmax.f32 %v1097_v39, 0.0  ;;  %v1868_v10 = vmax.f32 %v1294_v36, 0.0 }
 0x15d   :  { %v6161_v56 = vpop.f32.mrf.mxu0  ;;  %3021 = vmatmul.mubr.bf16.gmra.mxu0 %v2074_v30  ;;  %v6170_v6 = vpop.f32.mrf.mxu1  ;;  %3214 = vmatmul.mubr.bf16.gmra.mxu1 %v2076_v31  ;;  %v1885_v30 = vmax.f32 %v1306_v37, 0.0  ;;  %v7770_v37 = vld [vmem:[#allocation4_spill] sm:$0xff] }
 0x15e   :  { %7769 = vst [vmem:[#allocation14_spill] sm:$0xff] %v6170_v6  ;;  %3030 = vmatprep.mubr.bf16.mxu0 %v2083_v40  ;;  %3223 = vmatprep.mubr.bf16.mxu1 %v2085_v14  ;;  %v2082_v39 = vpack.c.bf16 %v1866_v44, %v1858_v63  ;;  %v1875_v36 = vmax.f32 %v1109_v54, 0.0  ;;  %v1107_v40 = vadd.f32 %v5873_v45, %v5928_v5 }
 0x15f   :  { %v6174_v23 = vpop.f32.mrf.mxu0  ;;  %3357 = vmatpush1.bf16.msra.mxu0 %v4778_v41  ;;  %v6182_v38 = vpop.f32.mrf.mxu1  ;;  %3550 = vmatpush1.bf16.msra.mxu1 %v4781_v34  ;;  %v1860_v41 = vmax.f32 %v1290_v16, 0.0  ;;  %v1877_v34 = vmax.f32 %v1302_v2, 0.0  ;;  %v1304_v14 = vadd.f32 %v7770_v37, %v5932_v49  ;;  %v4790_v16 = vld [vmem:[%s7732_s3 + $0x2f0] ss:$8 sps:$4 sm:$0xff]   ;;  %v1123_v54 = vadd.f32 %v5938_v50, %v5894_v53  ;;  %v4798_v2 = vld [vmem:[%s7732_s3 + $0x2e4] ss:$8 sps:$4 sm:$0xff]  }
 0x160   :  { %3358 = vmatprep.subr.bf16.mxu0 %v4786_v29  ;;  %3551 = vmatprep.subr.bf16.mxu1 %v4789_v18  ;;  %v1111_v29 = vadd.f32 %v5890_v1, %v5928_v5  ;;  %v2091_v45 = vpack.c.bf16 %v1883_v51, %v1875_v36  ;;  %v4793_v1 = vld [vmem:[%s7732_s3 + $0x3f0] ss:$8 sps:$4 sm:$0xff]  }
 0x161   :  { %v6187_v31 = vpop.f32.mrf.mxu0  ;;  %v6192_v55 = vpop.f32.mrf.mxu1  ;;  %v2084_v44 = vpack.c.bf16 %v1868_v10, %v1860_v41  ;;  %v1316_v10 = vadd.f32 %v5944_v4, %v5898_v58  ;;  %v2093_v51 = vpack.c.bf16 %v1885_v30, %v1877_v34  ;;  %v1884_v6 = vmax.f32 %v1304_v14, 0.0  ;;  %v4796_v30 = vld [vmem:[%s7732_s3 + $0x2e0] ss:$8 sps:$4 sm:$0xff]  }
 0x162   :  { %v1312_v4 = vadd.f32 %v5924_v60, %v5898_v58  ;;  %v4804_v60 = vld [vmem:[%s7732_s3 + $0x2d4] ss:$8 sps:$4 sm:$0xff]   ;;  %v1874_v14 = vmax.f32 %v1107_v40, 0.0 }
 0x163   :  { %v6200_v18 = vpop.f32.mrf.mxu0  ;;  %3359 = vmatpush1.bf16.msra.mxu0 %v4784_v32  ;;  %v6207_v63 = vpop.f32.mrf.mxu1  ;;  %3552 = vmatpush1.bf16.msra.mxu1 %v4787_v42  ;;  %v7771_v32 = vld [vmem:[#allocation3_spill] sm:$0xff] }
 0x164   :  { %3360 = vmatprep.subr.bf16.mxu0 %v4792_v7  ;;  %v1300_v37 = vadd.f32 %v7771_v32, %v5932_v49  ;;  %3553 = vmatprep.subr.bf16.mxu1 %v4795_v17  ;;  %v4801_v42 = vld [vmem:[%s7732_s3 + $0x3e4] ss:$8 sps:$4 sm:$0xff]   ;;  %v1882_v32 = vmax.f32 %v1111_v29, 0.0  ;;  %v1899_v17 = vmax.f32 %v1123_v54, 0.0  ;;  %v4799_v29 = vld [vmem:[%s7732_s3 + $0x3e0] ss:$8 sps:$4 sm:$0xff]  }
 0x165   :  { %v6219_v50 = vpop.f32.mrf.mxu0  ;;  %3031 = vmatmul.mubr.bf16.gmra.mxu0 %v2082_v39  ;;  %v7773_v7 = vld [vmem:[#allocation7_spill] sm:$0xff]  ;;  %v6226_v36 = vpop.f32.mrf.mxu1  ;;  %3224 = vmatmul.mubr.bf16.gmra.mxu1 %v2084_v44  ;;  %v4807_v54 = vld [vmem:[%s7732_s3 + $0x3d4] ss:$8 sps:$4 sm:$0xff]  }
 0x166   :  { %7772 = vst [vmem:[#allocation4_spill] sm:$0xff] %v6219_v50  ;;  %v1119_v41 = vadd.f32 %v7773_v7, %v5894_v53  ;;  %7774 = vst [vmem:[#allocation3_spill] sm:$0xff] %v6226_v36  ;;  %3040 = vmatprep.mubr.bf16.mxu0 %v2091_v45  ;;  %3233 = vmatprep.mubr.bf16.mxu1 %v2093_v51  ;;  %v1876_v44 = vmax.f32 %v1300_v37, 0.0  ;;  %v2090_v36 = vpack.c.bf16 %v1882_v32, %v1874_v14  ;;  %v4805_v32 = vld [vmem:[%s7732_s3 + $0x3d0] ss:$8 sps:$4 sm:$0xff]  }
 0x167   :  { %v6230_v39 = vpop.f32.mrf.mxu0  ;;  %3361 = vmatpush2.bf16.msra.mxu0 %v4790_v16  ;;  %v6235_v34 = vpop.f32.mrf.mxu1  ;;  %3554 = vmatpush2.bf16.msra.mxu1 %v4793_v1  ;;  %v1901_v16 = vmax.f32 %v1316_v10, 0.0  ;;  %v1893_v37 = vmax.f32 %v1312_v4, 0.0  ;;  %v4810_v4 = vld [vmem:[%s7732_s3 + $0x2c4] ss:$8 sps:$4 sm:$0xff]  }
 0x168   :  { %7775 = vst [vmem:[#allocation7_spill] sm:$0xff] %v6235_v34  ;;  %3362 = vmatprep.subr.bf16.mxu0 %v4798_v2  ;;  %3555 = vmatprep.subr.bf16.mxu1 %v4801_v42  ;;  %v1891_v1 = vmax.f32 %v1119_v41, 0.0  ;;  %v7777_v2 = vld [vmem:[#allocation8_spill] sm:$0xff]  ;;  %v2092_v50 = vpack.c.bf16 %v1884_v6, %v1876_v44  ;;  %v7779_v34 = vld [vmem:[#allocation5_spill] sm:$0xff]  ;;  %v1129_v44 = vadd.f32 %v5962_v46, %v5894_v53 }
 0x169   :  { %v6243_v45 = vpop.f32.mrf.mxu0  ;;  %v1121_v51 = vadd.f32 %v7777_v2, %v5928_v5  ;;  %v6250_v7 = vpop.f32.mrf.mxu1  ;;  %v1117_v40 = vadd.f32 %v7779_v34, %v5928_v5  ;;  %v4802_v42 = vld [vmem:[%s7732_s3 + $0x2d0] ss:$8 sps:$4 sm:$0xff]   ;;  %v1133_v2 = vadd.f32 %v5974_v48, %v5894_v53  ;;  %v2101_v48 = vpack.c.bf16 %v1901_v16, %v1893_v37  ;;  %v4808_v16 = vld [vmem:[%s7732_s3 + $0x2c0] ss:$8 sps:$4 sm:$0xff]  }
 0x16a   :  { %7776 = vst [vmem:[#allocation15_spill] sm:$0xff] %v6243_v45  ;;  %7778 = vst [vmem:[#allocation8_spill] sm:$0xff] %v6250_v7  ;;  %v7780_v41 = vld [vmem:[#allocation9_spill] sm:$0xff]  ;;  %v2099_v6 = vpack.c.bf16 %v1899_v17, %v1891_v1  ;;  %v4813_v17 = vld [vmem:[%s7732_s3 + $0x3c4] ss:$8 sps:$4 sm:$0xff]  }
 0x16b   :  { %v6254_v10 = vpop.f32.mrf.mxu0  ;;  %3363 = vmatpush2.bf16.msra.mxu0 %v4796_v30  ;;  %v1314_v45 = vadd.f32 %v7780_v41, %v5932_v49  ;;  %v6263_v7 = vpop.f32.mrf.mxu1  ;;  %3556 = vmatpush2.bf16.msra.mxu1 %v4799_v29  ;;  %v1326_v30 = vadd.f32 %v5981_v9, %v5898_v58  ;;  %v7781_v29 = vld [vmem:[#allocation6_spill] sm:$0xff]  ;;  %v1898_v14 = vmax.f32 %v1121_v51, 0.0  ;;  %v1322_v9 = vadd.f32 %v5964_v8, %v5898_v58  ;;  %v4816_v8 = vld [vmem:[%s7732_s3 + $0x2b4] ss:$8 sps:$4 sm:$0xff]  }
 0x16c   :  { %3364 = vmatprep.subr.bf16.mxu0 %v4804_v60  ;;  %3557 = vmatprep.subr.bf16.mxu1 %v4807_v54  ;;  %v1310_v60 = vadd.f32 %v7781_v29, %v5932_v49  ;;  %v4811_v54 = vld [vmem:[%s7732_s3 + $0x3c0] ss:$8 sps:$4 sm:$0xff]   ;;  %v1890_v46 = vmax.f32 %v1117_v40, 0.0  ;;  %v1915_v37 = vmax.f32 %v1133_v2, 0.0 }
 0x16d   :  { %v6273_v34 = vpop.f32.mrf.mxu0  ;;  %3041 = vmatmul.mubr.bf16.gmra.mxu0 %v2090_v36  ;;  %v6282_v1 = vpop.f32.mrf.mxu1  ;;  %3234 = vmatmul.mubr.bf16.gmra.mxu1 %v2092_v50  ;;  %v1900_v51 = vmax.f32 %v1314_v45, 0.0  ;;  %v1907_v45 = vmax.f32 %v1129_v44, 0.0  ;;  %v1909_v29 = vmax.f32 %v1322_v9, 0.0  ;;  %v1143_v44 = vadd.f32 %v6030_v25, %v5894_v53 }
 0x16e   :  { %7782 = vst [vmem:[#allocation5_spill] sm:$0xff] %v6282_v1  ;;  %3050 = vmatprep.mubr.bf16.mxu0 %v2099_v6  ;;  %3243 = vmatprep.mubr.bf16.mxu1 %v2101_v48  ;;  %v4819_v6 = vld [vmem:[%s7732_s3 + $0x3b4] ss:$8 sps:$4 sm:$0xff]   ;;  %v1892_v48 = vmax.f32 %v1310_v60, 0.0  ;;  %v2098_v40 = vpack.c.bf16 %v1898_v14, %v1890_v46  ;;  %v1131_v1 = vadd.f32 %v5966_v47, %v5928_v5  ;;  %v4814_v60 = vld [vmem:[%s7732_s3 + $0x2b0] ss:$8 sps:$4 sm:$0xff]  }
 0x16f   :  { %v6286_v36 = vpop.f32.mrf.mxu0  ;;  %3365 = vmatpush2.bf16.msra.mxu0 %v4802_v42  ;;  %v6294_v50 = vpop.f32.mrf.mxu1  ;;  %3558 = vmatpush2.bf16.msra.mxu1 %v4805_v32  ;;  %v1917_v42 = vmax.f32 %v1326_v30, 0.0  ;;  %v7783_v32 = vld [vmem:[#allocation10_spill] sm:$0xff]  ;;  %v1324_v30 = vadd.f32 %v5968_v52, %v5932_v49  ;;  %v2107_v9 = vpack.c.bf16 %v1915_v37, %v1907_v45  ;;  %v4817_v47 = vld [vmem:[%s7732_s3 + $0x3b0] ss:$8 sps:$4 sm:$0xff]  }
 0x170   :  { %3366 = vmatprep.subr.bf16.mxu0 %v4810_v4  ;;  %3559 = vmatprep.subr.bf16.mxu1 %v4813_v17  ;;  %v1127_v4 = vadd.f32 %v7783_v32, %v5928_v5  ;;  %v2100_v14 = vpack.c.bf16 %v1900_v51, %v1892_v48  ;;  %v4822_v52 = vld [vmem:[%s7732_s3 + $0x2a4] ss:$8 sps:$4 sm:$0xff]   ;;  %v1336_v51 = vadd.f32 %v6039_v21, %v5898_v58  ;;  %v1914_v45 = vmax.f32 %v1131_v1, 0.0 }
 0x171   :  { %v6299_v41 = vpop.f32.mrf.mxu0  ;;  %v6304_v2 = vpop.f32.mrf.mxu1  ;;  %v2109_v37 = vpack.c.bf16 %v1917_v42, %v1909_v29  ;;  %v1332_v21 = vadd.f32 %v6011_v33, %v5898_v58  ;;  %v4820_v42 = vld [vmem:[%s7732_s3 + $0x2a0] ss:$8 sps:$4 sm:$0xff]   ;;  %v4828_v33 = vld [vmem:[%s7732_s3 + $0x294] ss:$8 sps:$4 sm:$0xff]  }
 0x172   :  { %v1906_v1 = vmax.f32 %v1127_v4, 0.0  ;;  %v4826_v4 = vld [vmem:[%s7732_s3 + $0x290] ss:$8 sps:$4 sm:$0xff]  }
 0x173   :  { %v6312_v17 = vpop.f32.mrf.mxu0  ;;  %3367 = vmatpush2.bf16.msra.mxu0 %v4808_v16  ;;  %v6319_v46 = vpop.f32.mrf.mxu1  ;;  %3560 = vmatpush2.bf16.msra.mxu1 %v4811_v54  ;;  %v7784_v16 = vld [vmem:[#allocation11_spill] sm:$0xff] }
 0x174   :  { %3368 = vmatprep.subr.bf16.mxu0 %v4816_v8  ;;  %v1320_v32 = vadd.f32 %v7784_v16, %v5932_v49  ;;  %3561 = vmatprep.subr.bf16.mxu1 %v4819_v6  ;;  %v4825_v54 = vld [vmem:[%s7732_s3 + $0x3a4] ss:$8 sps:$4 sm:$0xff]   ;;  %v1139_v8 = vadd.f32 %v6006_v35, %v5894_v53  ;;  %v1916_v16 = vmax.f32 %v1324_v30, 0.0  ;;  %v1931_v6 = vmax.f32 %v1143_v44, 0.0  ;;  %v4823_v35 = vld [vmem:[%s7732_s3 + $0x3a0] ss:$8 sps:$4 sm:$0xff]  }
 0x175   :  { %v6331_v25 = vpop.f32.mrf.mxu0  ;;  %3051 = vmatmul.mubr.bf16.gmra.mxu0 %v2098_v40  ;;  %v6338_v48 = vpop.f32.mrf.mxu1  ;;  %3244 = vmatmul.mubr.bf16.gmra.mxu1 %v2100_v14  ;;  %v4831_v44 = vld [vmem:[%s7732_s3 + $0x394] ss:$8 sps:$4 sm:$0xff]  }
 0x176   :  { %7785 = vst [vmem:[#allocation9_spill] sm:$0xff] %v6331_v25  ;;  %7786 = vst [vmem:[#allocation6_spill] sm:$0xff] %v6338_v48  ;;  %3060 = vmatprep.mubr.bf16.mxu0 %v2107_v9  ;;  %3253 = vmatprep.mubr.bf16.mxu1 %v2109_v37  ;;  %v1908_v30 = vmax.f32 %v1320_v32, 0.0  ;;  %v1923_v9 = vmax.f32 %v1139_v8, 0.0  ;;  %v1925_v48 = vmax.f32 %v1332_v21, 0.0  ;;  %v1141_v25 = vadd.f32 %v6019_v0, %v5928_v5 }
 0x177   :  { %v6342_v40 = vpop.f32.mrf.mxu0  ;;  %3369 = vmatpush2.bf16.msra.mxu0 %v4814_v60  ;;  %v6347_v29 = vpop.f32.mrf.mxu1  ;;  %3562 = vmatpush2.bf16.msra.mxu1 %v4817_v47  ;;  %v1933_v60 = vmax.f32 %v1336_v51, 0.0  ;;  %v1334_v32 = vadd.f32 %v6026_v19, %v5932_v49  ;;  %v1153_v51 = vadd.f32 %v6088_v12, %v5894_v53  ;;  %v4829_v0 = vld [vmem:[%s7732_s3 + $0x390] ss:$8 sps:$4 sm:$0xff]   ;;  %v1346_v19 = vadd.f32 %v6095_v24, %v5898_v58 }
 0x178   :  { %7787 = vst [vmem:[#allocation10_spill] sm:$0xff] %v6347_v29  ;;  %3370 = vmatprep.subr.bf16.mxu0 %v4822_v52  ;;  %3563 = vmatprep.subr.bf16.mxu1 %v4825_v54  ;;  %v2106_v52 = vpack.c.bf16 %v1914_v45, %v1906_v1  ;;  %v2108_v37 = vpack.c.bf16 %v1916_v16, %v1908_v30  ;;  %v4834_v45 = vld [vmem:[%s7732_s3 + $0x284] ss:$8 sps:$4 sm:$0xff]   ;;  %v7788_v16 = vld [vmem:[#allocation12_spill] sm:$0xff]  ;;  %v1930_v24 = vmax.f32 %v1141_v25, 0.0 }
 0x179   :  { %v6355_v14 = vpop.f32.mrf.mxu0  ;;  %v6360_v47 = vpop.f32.mrf.mxu1  ;;  %v2115_v8 = vpack.c.bf16 %v1931_v6, %v1923_v9  ;;  %v1137_v21 = vadd.f32 %v7788_v16, %v5928_v5  ;;  %v4837_v6 = vld [vmem:[%s7732_s3 + $0x384] ss:$8 sps:$4 sm:$0xff]   ;;  %v1149_v1 = vadd.f32 %v6062_v62, %v5894_v53  ;;  %v1342_v9 = vadd.f32 %v6070_v26, %v5898_v58  ;;  %v4835_v62 = vld [vmem:[%s7732_s3 + $0x380] ss:$8 sps:$4 sm:$0xff]  }
 0x17a   :  { %v1949_v26 = vmax.f32 %v1346_v19, 0.0  ;;  %v1163_v19 = vadd.f32 %v6142_v3, %v5894_v53  ;;  %v1159_v3 = vadd.f32 %v6118_v15, %v5894_v53 }
 0x17b   :  { %v6364_v29 = vpop.f32.mrf.mxu0  ;;  %3371 = vmatpush2.bf16.msra.mxu0 %v4820_v42  ;;  %v6373_v54 = vpop.f32.mrf.mxu1  ;;  %3564 = vmatpush2.bf16.msra.mxu1 %v4823_v35  ;;  %v2117_v42 = vpack.c.bf16 %v1933_v60, %v1925_v48  ;;  %v7789_v35 = vld [vmem:[#allocation13_spill] sm:$0xff]  ;;  %v4832_v60 = vld [vmem:[%s7732_s3 + $0x280] ss:$8 sps:$4 sm:$0xff]   ;;  %v1922_v25 = vmax.f32 %v1137_v21, 0.0  ;;  %v1344_v21 = vadd.f32 %v6080_v57, %v5932_v49  ;;  %v1340_v57 = vadd.f32 %v6058_v43, %v5932_v49 }
 0x17c   :  { %3372 = vmatprep.subr.bf16.mxu0 %v4828_v33  ;;  %3565 = vmatprep.subr.bf16.mxu1 %v4831_v44  ;;  %v1330_v33 = vadd.f32 %v7789_v35, %v5932_v49  ;;  %v1932_v44 = vmax.f32 %v1334_v32, 0.0  ;;  %v1941_v32 = vmax.f32 %v1342_v9, 0.0 }
 0x17d   :  { %v6385_v12 = vpop.f32.mrf.mxu0  ;;  %3061 = vmatmul.mubr.bf16.gmra.mxu0 %v2106_v52  ;;  %v6394_v30 = vpop.f32.mrf.mxu1  ;;  %3254 = vmatmul.mubr.bf16.gmra.mxu1 %v2108_v37  ;;  %v1947_v52 = vmax.f32 %v1153_v51, 0.0  ;;  %v2114_v35 = vpack.c.bf16 %v1930_v24, %v1922_v25  ;;  %v1151_v51 = vadd.f32 %v6075_v13, %v5928_v5  ;;  %v1356_v13 = vadd.f32 %v6151_v22, %v5898_v58 }
 0x17e   :  { %3070 = vmatprep.mubr.bf16.mxu0 %v2115_v8  ;;  %3263 = vmatprep.mubr.bf16.mxu1 %v2117_v42  ;;  %v1939_v8 = vmax.f32 %v1149_v1, 0.0  ;;  %v1147_v1 = vadd.f32 %v6049_v61, %v5928_v5  ;;  %v2125_v9 = vpack.c.bf16 %v1949_v26, %v1941_v32  ;;  %v1352_v61 = vadd.f32 %v6123_v20, %v5898_v58 }
 0x17f   :  { %v6398_v48 = vpop.f32.mrf.mxu0  ;;  %3373 = vmatpush2.bf16.msra.mxu0 %v4826_v4  ;;  %v6403_v16 = vpop.f32.mrf.mxu1  ;;  %3566 = vmatpush2.bf16.msra.mxu1 %v4829_v0  ;;  %v1924_v4 = vmax.f32 %v1330_v33, 0.0  ;;  %v1965_v43 = vmax.f32 %v1356_v13, 0.0  ;;  %v1940_v15 = vmax.f32 %v1340_v57, 0.0  ;;  %v1161_v20 = vadd.f32 %v6131_v27, %v5928_v5 }
 0x180   :  { %3374 = vmatprep.subr.bf16.mxu0 %v4834_v45  ;;  %3567 = vmatprep.subr.bf16.mxu1 %v4837_v6  ;;  %v2123_v33 = vpack.c.bf16 %v1947_v52, %v1939_v8  ;;  %v1948_v52 = vmax.f32 %v1344_v21, 0.0  ;;  %v1938_v26 = vmax.f32 %v1147_v1, 0.0  ;;  %v1955_v8 = vmax.f32 %v1159_v3, 0.0 }
 0x181   :  { %v6408_v37 = vpop.f32.mrf.mxu0  ;;  %v6410_v42 = vpop.f32.mrf.mxu1  ;;  %v2116_v45 = vpack.c.bf16 %v1932_v44, %v1924_v4  ;;  %v1946_v44 = vmax.f32 %v1151_v51, 0.0  ;;  %v1957_v51 = vmax.f32 %v1352_v61, 0.0  ;;  %v1354_v21 = vadd.f32 %v6138_v28, %v5932_v49 }
 0x182   :  { %v1366_v57 = vadd.f32 %v6207_v63, %v5898_v58  ;;  %v1169_v28 = vadd.f32 %v6174_v23, %v5894_v53  ;;  %v1962_v61 = vmax.f32 %v1161_v20, 0.0 }
 0x183   :  { %v6414_v0 = vpop.f32.mrf.mxu0  ;;  %3375 = vmatpush2.bf16.msra.mxu0 %v4832_v60  ;;  %v6420_v6 = vpop.f32.mrf.mxu1  ;;  %3568 = vmatpush2.bf16.msra.mxu1 %v4835_v62  ;;  %v1963_v62 = vmax.f32 %v1163_v19, 0.0  ;;  %v2122_v32 = vpack.c.bf16 %v1946_v44, %v1938_v26  ;;  %v1173_v19 = vadd.f32 %v6200_v18, %v5894_v53  ;;  %v2133_v27 = vpack.c.bf16 %v1965_v43, %v1957_v51 }
 0x184   :  { %v1350_v44 = vadd.f32 %v6114_v11, %v5932_v49  ;;  %v1981_v11 = vmax.f32 %v1366_v57, 0.0 }
 0x185   :  { %v6426_v24 = vpop.f32.mrf.mxu0  ;;  %3071 = vmatmul.mubr.bf16.gmra.mxu0 %v2114_v35  ;;  %v6432_v60 = vpop.f32.mrf.mxu1  ;;  %3264 = vmatmul.mubr.bf16.gmra.mxu1 %v2116_v45  ;;  %v2131_v13 = vpack.c.bf16 %v1963_v62, %v1955_v8  ;;  %v1979_v62 = vmax.f32 %v1173_v19, 0.0  ;;  %v1971_v8 = vmax.f32 %v1169_v28, 0.0  ;;  %v1183_v19 = vadd.f32 %v6254_v10, %v5894_v53 }
 0x186   :  { %3080 = vmatprep.mubr.bf16.mxu0 %v2123_v33  ;;  %3273 = vmatprep.mubr.bf16.mxu1 %v2125_v9  ;;  %v2124_v33 = vpack.c.bf16 %v1948_v52, %v1940_v15  ;;  %v1157_v9 = vadd.f32 %v6107_v59, %v5928_v5  ;;  %v1362_v59 = vadd.f32 %v6182_v38, %v5898_v58  ;;  %v1964_v52 = vmax.f32 %v1354_v21, 0.0 }
 0x187   :  { %v6436_v22 = vpop.f32.mrf.mxu0  ;;  %v6438_v25 = vpop.f32.mrf.mxu1  ;;  %v1956_v23 = vmax.f32 %v1350_v44, 0.0  ;;  %v1171_v38 = vadd.f32 %v6187_v31, %v5928_v5  ;;  %v1364_v21 = vadd.f32 %v6192_v55, %v5932_v49  ;;  %v2139_v57 = vpack.c.bf16 %v1979_v62, %v1971_v8 }
 0x188   :  { %v1954_v43 = vmax.f32 %v1157_v9, 0.0  ;;  %v1973_v20 = vmax.f32 %v1362_v59, 0.0  ;;  %v1376_v44 = vadd.f32 %v6263_v7, %v5898_v58  ;;  %v1179_v55 = vadd.f32 %v6230_v39, %v5894_v53 }
 0x189   :  { %v6440_v4 = vpop.f32.mrf.mxu0  ;;  %v6442_v35 = vpop.f32.mrf.mxu1 }
 0x18a   :  { %v2130_v51 = vpack.c.bf16 %v1962_v61, %v1954_v43  ;;  %v2141_v31 = vpack.c.bf16 %v1981_v11, %v1973_v20  ;;  %v7791_v61 = vld [vmem:[#allocation14_spill] sm:$0xff]  ;;  %v1980_v43 = vmax.f32 %v1364_v21, 0.0  ;;  %v7796_v21 = vld [vmem:[#allocation8_spill] sm:$0xff] }
 0x18b   :  { %v6446_v45 = vpop.f32.mrf.mxu0  ;;  %v6452_v1 = vpop.f32.mrf.mxu1  ;;  %v1360_v59 = vadd.f32 %v7791_v61, %v5932_v49  ;;  %v1987_v61 = vmax.f32 %v1179_v55, 0.0  ;;  %v7797_v55 = vld [vmem:[#allocation4_spill] sm:$0xff] }
 0x18d   :  { %v6458_v3 = vpop.f32.mrf.mxu0  ;;  %3081 = vmatmul.mubr.bf16.gmra.mxu0 %v2122_v32  ;;  %v6464_v18 = vpop.f32.mrf.mxu1  ;;  %3274 = vmatmul.mubr.bf16.gmra.mxu1 %v2124_v33  ;;  %v1972_v39 = vmax.f32 %v1360_v59, 0.0 }
 0x18e   :  { %3090 = vmatprep.mubr.bf16.mxu0 %v2131_v13  ;;  %3283 = vmatprep.mubr.bf16.mxu1 %v2133_v27  ;;  %v2132_v13 = vpack.c.bf16 %v1964_v52, %v1956_v23  ;;  %v1167_v27 = vadd.f32 %v6161_v56, %v5928_v5  ;;  %v1978_v52 = vmax.f32 %v1171_v38, 0.0  ;;  %v7793_v56 = vld [vmem:[#allocation7_spill] sm:$0xff]  ;;  %v1995_v23 = vmax.f32 %v1183_v19, 0.0 }
 0x18f   :  { %v6468_v63 = vpop.f32.mrf.mxu0  ;;  %v6470_v26 = vpop.f32.mrf.mxu1  ;;  %v1372_v62 = vadd.f32 %v7793_v56, %v5898_v58  ;;  %v1374_v19 = vadd.f32 %v7796_v21, %v5932_v49 }
 0x190   :  { %v1970_v8 = vmax.f32 %v1167_v27, 0.0  ;;  %v1193_v27 = vadd.f32 %v6312_v17, %v5894_v53  ;;  %v2147_v59 = vpack.c.bf16 %v1995_v23, %v1987_v61  ;;  %v1382_v61 = vadd.f32 %v6294_v50, %v5898_v58 }
 0x191   :  { %v6472_v15 = vpop.f32.mrf.mxu0  ;;  %v6474_v32 = vpop.f32.mrf.mxu1  ;;  %v1989_v38 = vmax.f32 %v1372_v62, 0.0  ;;  %v1996_v21 = vmax.f32 %v1374_v19, 0.0  ;;  %v1191_v50 = vadd.f32 %v6299_v41, %v5928_v5  ;;  %v1384_v19 = vadd.f32 %v6304_v2, %v5932_v49 }
 0x192   :  { %v1199_v2 = vadd.f32 %v6342_v40, %v5894_v53 }
 0x193   :  { %v6478_v33 = vpop.f32.mrf.mxu0  ;;  %v6484_v9 = vpop.f32.mrf.mxu1 }
 0x195   :  { %v6490_v28 = vpop.f32.mrf.mxu0  ;;  %3091 = vmatmul.mubr.bf16.gmra.mxu0 %v2130_v51  ;;  %v6496_v10 = vpop.f32.mrf.mxu1  ;;  %3284 = vmatmul.mubr.bf16.gmra.mxu1 %v2132_v13  ;;  %v1997_v51 = vmax.f32 %v1376_v44, 0.0  ;;  %v2138_v13 = vpack.c.bf16 %v1978_v52, %v1970_v8  ;;  %v1386_v52 = vadd.f32 %v6319_v46, %v5898_v58 }
 0x196   :  { %7790 = vst [vmem:[#allocation11_spill] sm:$0xff] %v6490_v28  ;;  %7792 = vst [vmem:[#allocation12_spill] sm:$0xff] %v6496_v10  ;;  %3100 = vmatprep.mubr.bf16.mxu0 %v2139_v57  ;;  %3293 = vmatprep.mubr.bf16.mxu1 %v2141_v31  ;;  %v7795_v57 = vld [vmem:[#allocation15_spill] sm:$0xff]  ;;  %v2140_v28 = vpack.c.bf16 %v1980_v43, %v1972_v39 }
 0x197   :  { %v6500_v7 = vpop.f32.mrf.mxu0  ;;  %v6502_v11 = vpop.f32.mrf.mxu1  ;;  %v1181_v56 = vadd.f32 %v7795_v57, %v5928_v5  ;;  %v2149_v8 = vpack.c.bf16 %v1997_v51, %v1989_v38  ;;  %v7799_v43 = vld [vmem:[#allocation3_spill] sm:$0xff]  ;;  %v1189_v57 = vadd.f32 %v6286_v36, %v5894_v53 }
 0x198   :  { %v1370_v39 = vadd.f32 %v7799_v43, %v5932_v49 }
 0x199   :  { %v6504_v20 = vpop.f32.mrf.mxu0  ;;  %v6506_v10 = vpop.f32.mrf.mxu1  ;;  %v1994_v23 = vmax.f32 %v1181_v56, 0.0  ;;  %v2005_v56 = vmax.f32 %v1382_v61, 0.0  ;;  %v7802_v61 = vld [vmem:[#allocation5_spill] sm:$0xff] }
 0x19a   :  { %7794 = vst [vmem:[#allocation13_spill] sm:$0xff] %v6506_v10  ;;  %v1177_v10 = vadd.f32 %v7797_v55, %v5928_v5  ;;  %v2013_v55 = vmax.f32 %v1386_v52, 0.0  ;;  %v1988_v36 = vmax.f32 %v1370_v39, 0.0  ;;  %v1187_v39 = vadd.f32 %v6273_v34, %v5928_v5  ;;  %v7804_v34 = vld [vmem:[#allocation10_spill] sm:$0xff] }
 0x19b   :  { %v6510_v31 = vpop.f32.mrf.mxu0  ;;  %v6516_v44 = vpop.f32.mrf.mxu1 }
 0x19c   :  { %v1986_v38 = vmax.f32 %v1177_v10, 0.0  ;;  %v1203_v10 = vadd.f32 %v6364_v29, %v5894_v53  ;;  %v2157_v41 = vpack.c.bf16 %v2013_v55, %v2005_v56 }
 0x19d   :  { %v6522_v62 = vpop.f32.mrf.mxu0  ;;  %3101 = vmatmul.mubr.bf16.gmra.mxu0 %v2138_v13  ;;  %v6528_v17 = vpop.f32.mrf.mxu1  ;;  %3294 = vmatmul.mubr.bf16.gmra.mxu1 %v2140_v28  ;;  %v2011_v13 = vmax.f32 %v1193_v27, 0.0 }
 0x19e   :  { %7798 = vst [vmem:[#allocation14_spill] sm:$0xff] %v6522_v62  ;;  %7800 = vst [vmem:[#allocation7_spill] sm:$0xff] %v6528_v17  ;;  %3110 = vmatprep.mubr.bf16.mxu0 %v2147_v59  ;;  %3303 = vmatprep.mubr.bf16.mxu1 %v2149_v8  ;;  %v2003_v62 = vmax.f32 %v1189_v57, 0.0  ;;  %v2146_v28 = vpack.c.bf16 %v1994_v23, %v1986_v38  ;;  %v2148_v8 = vpack.c.bf16 %v1996_v21, %v1988_v36 }
 0x19f   :  { %v6532_v46 = vpop.f32.mrf.mxu0  ;;  %v6534_v51 = vpop.f32.mrf.mxu1  ;;  %v1396_v57 = vadd.f32 %v6373_v54, %v5898_v58  ;;  %v1380_v21 = vadd.f32 %v7802_v61, %v5932_v49  ;;  %v2012_v38 = vmax.f32 %v1384_v19, 0.0  ;;  %v2027_v36 = vmax.f32 %v1203_v10, 0.0 }
 0x1a0   :  { %v2155_v52 = vpack.c.bf16 %v2011_v13, %v2003_v62  ;;  %v2010_v62 = vmax.f32 %v1191_v50, 0.0  ;;  %v1392_v13 = vadd.f32 %v7804_v34, %v5898_v58  ;;  %v1394_v19 = vadd.f32 %v6360_v47, %v5932_v49 }
 0x1a1   :  { %v6536_v43 = vpop.f32.mrf.mxu0  ;;  %v6538_v17 = vpop.f32.mrf.mxu1  ;;  %v2029_v56 = vmax.f32 %v1396_v57, 0.0  ;;  %v2004_v40 = vmax.f32 %v1380_v21, 0.0  ;;  %v1213_v10 = vadd.f32 %v6414_v0, %v5894_v53  ;;  %v7806_v21 = vld [vmem:[#allocation9_spill] sm:$0xff]  ;;  %v1209_v47 = vadd.f32 %v6398_v48, %v5894_v53  ;;  %v7809_v0 = vld [vmem:[#allocation2_spill] sm:$0xff] }
 0x1a2   :  { %v2021_v50 = vmax.f32 %v1392_v13, 0.0 }
 0x1a3   :  { %v6542_v59 = vpop.f32.mrf.mxu0  ;;  %v6548_v27 = vpop.f32.mrf.mxu1  ;;  %v2156_v34 = vpack.c.bf16 %v2012_v38, %v2004_v40  ;;  %v7808_v38 = vld [vmem:[#allocation6_spill] sm:$0xff]  ;;  %v204_v40 = vsub.s32 5, %v7809_v0 }
 0x1a5   :  { %v6554_v23 = vpop.f32.mrf.mxu0  ;;  %3111 = vmatmul.mubr.bf16.gmra.mxu0 %v2146_v28  ;;  %v6560_v29 = vpop.f32.mrf.mxu1  ;;  %3304 = vmatmul.mubr.bf16.gmra.mxu1 %v2148_v8  ;;  %v2002_v28 = vmax.f32 %v1187_v39, 0.0 }
 0x1a6   :  { %7801 = vst [vmem:[#allocation15_spill] sm:$0xff] %v6554_v23  ;;  %7803 = vst [vmem:[#allocation8_spill] sm:$0xff] %v6560_v29  ;;  %3120 = vmatprep.mubr.bf16.mxu0 %v2155_v52  ;;  %3313 = vmatprep.mubr.bf16.mxu1 %v2157_v41  ;;  %v2019_v23 = vmax.f32 %v1199_v2, 0.0  ;;  %v1201_v52 = vadd.f32 %v6355_v14, %v5928_v5  ;;  %v1197_v2 = vadd.f32 %v7806_v21, %v5928_v5 }
 0x1a7   :  { %v6564_v54 = vpop.f32.mrf.mxu0  ;;  %v6566_v55 = vpop.f32.mrf.mxu1  ;;  %v2154_v8 = vpack.c.bf16 %v2010_v62, %v2002_v28  ;;  %v1406_v62 = vadd.f32 %v6420_v6, %v5898_v58  ;;  %v2165_v14 = vpack.c.bf16 %v2029_v56, %v2021_v50  ;;  %v1390_v28 = vadd.f32 %v7808_v38, %v5932_v49 }
 0x1a8   :  { %v2163_v57 = vpack.c.bf16 %v2027_v36, %v2019_v23  ;;  %v2026_v23 = vmax.f32 %v1201_v52, 0.0  ;;  %v1402_v6 = vadd.f32 %v6403_v16, %v5898_v58  ;;  %v212_v36 = vsub.s32 7, %v7809_v0  ;;  %v4903_v52 = vld [vmem:[%s7733_s2] sm:$0xff] }
 0x1a9   :  { %v6568_v61 = vpop.f32.mrf.mxu0  ;;  %v6570_v29 = vpop.f32.mrf.mxu1  ;;  %v2043_v50 = vmax.f32 %v1213_v10, 0.0  ;;  %v2018_v53 = vmax.f32 %v1197_v2, 0.0  ;;  %v2045_v48 = vmax.f32 %v1406_v62, 0.0  ;;  %v6607_v58 = vrot.slane %v4903_v52, %v204_v40 }
 0x1aa   :  { %7805 = vst [vmem:[#allocation4_spill] sm:$0xff] %v6570_v29  ;;  %v6613_v10 = vrot.slane %v4903_v52, %v212_v36 }
 0x1ab   :  { %v6574_v41 = vpop.f32.mrf.mxu0  ;;  %v6580_v39 = vpop.f32.mrf.mxu1 }
 0x1ad   :  { %v6586_v13 = vpop.f32.mrf.mxu0  ;;  %3121 = vmatmul.mubr.bf16.gmra.mxu0 %v2154_v8  ;;  %v6593_v29 = vpop.f32.mrf.mxu1  ;;  %3314 = vmatmul.mubr.bf16.gmra.mxu1 %v2156_v34  ;;  %v2028_v8 = vmax.f32 %v1394_v19, 0.0  ;;  %v2035_v34 = vmax.f32 %v1209_v47, 0.0  ;;  %v1211_v19 = vadd.f32 %v6408_v37, %v5928_v5  ;;  %v1449_v47 = vadd.f32 %v6446_v45, %v6607_v58 }
 0x1ae   :  { %7807 = vst [vmem:[#allocation3_spill] sm:$0xff] %v6586_v13  ;;  %7810 = vst [vmem:[#allocation5_spill] sm:$0xff] %v6593_v29  ;;  %3130 = vmatprep.mubr.bf16.mxu0 %v2163_v57  ;;  %3323 = vmatprep.mubr.bf16.mxu1 %v2165_v14  ;;  %v2020_v29 = vmax.f32 %v1390_v28, 0.0  ;;  %v2162_v57 = vpack.c.bf16 %v2026_v23, %v2018_v53  ;;  %v2037_v14 = vmax.f32 %v1402_v6, 0.0  ;;  %v200_v6 = vsub.s32 4, %v7809_v0 }
 0x1af   :  { %v6598_v56 = vpop.f32.mrf.mxu0  ;;  %v6600_v21 = vpop.f32.mrf.mxu1  ;;  %v1404_v28 = vadd.f32 %v6410_v42, %v5932_v49  ;;  %v2171_v13 = vpack.c.bf16 %v2043_v50, %v2035_v34  ;;  %v1207_v23 = vadd.f32 %v6385_v12, %v5928_v5  ;;  %v1642_v37 = vadd.f32 %v6452_v1, %v6613_v10 }
 0x1b0   :  { %v2164_v62 = vpack.c.bf16 %v2028_v8, %v2020_v29  ;;  %v2173_v29 = vpack.c.bf16 %v2045_v48, %v2037_v14  ;;  %v1400_v42 = vadd.f32 %v6394_v30, %v5932_v49  ;;  %v208_v45 = vsub.s32 6, %v7809_v0 }
 0x1b1   :  { %v6602_v38 = vpop.f32.mrf.mxu0  ;;  %v6609_v16 = vpop.f32.mrf.mxu1  ;;  %v1445_v8 = vadd.f32 %v6436_v22, %v6607_v58  ;;  %v2042_v5 = vmax.f32 %v1211_v19, 0.0  ;;  %v1638_v12 = vadd.f32 %v6438_v25, %v6613_v10  ;;  %v2044_v53 = vmax.f32 %v1404_v28, 0.0 }
 0x1b2   :  { %v1807_v48 = vmax.f32 %v1449_v47, 0.0  ;;  %v2034_v49 = vmax.f32 %v1207_v23, 0.0  ;;  %v6643_v30 = vrot.slane %v4903_v52, %v200_v6  ;;  %v2036_v14 = vmax.f32 %v1400_v42, 0.0 }
 0x1b3   :  { %v6615_v2 = vpop.f32.mrf.mxu0  ;;  %v6621_v40 = vpop.f32.mrf.mxu1  ;;  %v1459_v6 = vadd.f32 %v6478_v33, %v6607_v58 }
 0x1b4   :  { %v2170_v25 = vpack.c.bf16 %v2042_v5, %v2034_v49  ;;  %v1447_v28 = vadd.f32 %v6440_v4, %v6643_v30  ;;  %v2172_v0 = vpack.c.bf16 %v2044_v53, %v2036_v14  ;;  %v1443_v42 = vadd.f32 %v6426_v24, %v6643_v30 }
 0x1b5   :  { %v6628_v36 = vpop.f32.mrf.mxu0  ;;  %3131 = vmatmul.mubr.bf16.gmra.mxu0 %v2162_v57  ;;  %v6635_v50 = vpop.f32.mrf.mxu1  ;;  %3324 = vmatmul.mubr.bf16.gmra.mxu1 %v2164_v62  ;;  %v1809_v57 = vmax.f32 %v1642_v37, 0.0  ;;  %v6647_v62 = vrot.slane %v4903_v52, %v208_v45  ;;  %v1652_v45 = vadd.f32 %v6484_v9, %v6613_v10  ;;  %v1648_v24 = vadd.f32 %v6470_v26, %v6613_v10 }
 0x1b6   :  { %3140 = vmatprep.mubr.bf16.mxu0 %v2171_v13  ;;  %3333 = vmatprep.mubr.bf16.mxu1 %v2173_v29  ;;  %v1799_v13 = vmax.f32 %v1445_v8, 0.0  ;;  %v1801_v29 = vmax.f32 %v1638_v12, 0.0  ;;  %v1806_v12 = vmax.f32 %v1447_v28, 0.0  ;;  %v1457_v26 = vadd.f32 %v6472_v15, %v6643_v30 }
 0x1b7   :  { %v6639_v1 = vpop.f32.mrf.mxu0  ;;  %v6641_v34 = vpop.f32.mrf.mxu1  ;;  %v1640_v23 = vadd.f32 %v6442_v35, %v6647_v62  ;;  %v1636_v5 = vadd.f32 %v6432_v60, %v6647_v62  ;;  %v1455_v35 = vadd.f32 %v6468_v63, %v6607_v58  ;;  %v1825_v60 = vmax.f32 %v1652_v45, 0.0 }
 0x1b8   :  { %v2055_v52 = vpack.c.bf16 %v1807_v48, %v1799_v13  ;;  %v2057_v4 = vpack.c.bf16 %v1809_v57, %v1801_v29  ;;  %v1823_v48 = vmax.f32 %v1459_v6, 0.0  ;;  %v1798_v57 = vmax.f32 %v1443_v42, 0.0 }
 0x1b9   :  { %v6645_v22 = vpop.f32.mrf.mxu0  ;;  %v6649_v19 = vpop.f32.mrf.mxu1  ;;  %v1808_v53 = vmax.f32 %v1640_v23, 0.0  ;;  %v1800_v63 = vmax.f32 %v1636_v5, 0.0  ;;  %v1815_v13 = vmax.f32 %v1455_v35, 0.0  ;;  %v1817_v29 = vmax.f32 %v1648_v24, 0.0 }
 0x1ba   :  { %v1650_v23 = vadd.f32 %v6474_v32, %v6647_v62  ;;  %v1469_v6 = vadd.f32 %v6510_v31, %v6607_v58  ;;  %v1662_v5 = vadd.f32 %v6516_v44, %v6613_v10  ;;  %v1465_v32 = vadd.f32 %v6500_v7, %v6607_v58 }
 0x1bb   :  { %v6653_v47 = vpop.f32.mrf.mxu0  ;;  %v6659_v37 = vpop.f32.mrf.mxu1  ;;  %v2063_v45 = vpack.c.bf16 %v1823_v48, %v1815_v13  ;;  %v2065_v15 = vpack.c.bf16 %v1825_v60, %v1817_v29  ;;  %v1822_v24 = vmax.f32 %v1457_v26, 0.0 }
 0x1bc   :  { %v1839_v48 = vmax.f32 %v1469_v6, 0.0  ;;  %v1831_v13 = vmax.f32 %v1465_v32, 0.0 }
 0x1bd   :  { %v6665_v8 = vpop.f32.mrf.mxu0  ;;  %3141 = vmatmul.mubr.bf16.gmra.mxu0 %v2170_v25  ;;  %v6671_v33 = vpop.f32.mrf.mxu1  ;;  %3334 = vmatmul.mubr.bf16.gmra.mxu1 %v2172_v0  ;;  %v2054_v0 = vpack.c.bf16 %v1806_v12, %v1798_v57  ;;  %v1646_v12 = vadd.f32 %v6464_v18, %v6647_v62  ;;  %v1841_v18 = vmax.f32 %v1662_v5, 0.0 }
 0x1be   :  { %3376 = vmatprep.mubr.bf16.mxu0 %v2055_v52  ;;  %3569 = vmatprep.mubr.bf16.mxu1 %v2057_v4  ;;  %v2056_v52 = vpack.c.bf16 %v1808_v53, %v1800_v63  ;;  %v1453_v4 = vadd.f32 %v6458_v3, %v6643_v30  ;;  %v1658_v3 = vadd.f32 %v6502_v11, %v6613_v10  ;;  %v1824_v53 = vmax.f32 %v1650_v23, 0.0  ;;  %v7811_v23 = vld [vmem:[#allocation13_spill] sm:$0xff] }
 0x1bf   :  { %v6675_v9 = vpop.f32.mrf.mxu0  ;;  %v6677_v49 = vpop.f32.mrf.mxu1  ;;  %v1816_v7 = vmax.f32 %v1646_v12, 0.0  ;;  %v1467_v11 = vadd.f32 %v6504_v20, %v6643_v30  ;;  %v1660_v6 = vadd.f32 %v7811_v23, %v6647_v62  ;;  %v7812_v12 = vld [vmem:[#allocation11_spill] sm:$0xff] }
 0x1c0   :  { %v1814_v60 = vmax.f32 %v1453_v4, 0.0  ;;  %v1833_v26 = vmax.f32 %v1658_v3, 0.0  ;;  %v1479_v4 = vadd.f32 %v6542_v59, %v6607_v58  ;;  %v1463_v32 = vadd.f32 %v7812_v12, %v6643_v30 }
 0x1c1   :  { %v6679_v14 = vpop.f32.mrf.mxu0  ;;  %v6681_v25 = vpop.f32.mrf.mxu1  ;;  %v1840_v23 = vmax.f32 %v1660_v6, 0.0  ;;  %v1670_v6 = vadd.f32 %v6538_v17, %v6647_v62  ;;  %v1485_v17 = vadd.f32 %v6564_v54, %v6607_v58 }
 0x1c2   :  { %v2062_v29 = vpack.c.bf16 %v1822_v24, %v1814_v60  ;;  %v1672_v24 = vadd.f32 %v6548_v27, %v6613_v10  ;;  %v2073_v20 = vpack.c.bf16 %v1841_v18, %v1833_v26  ;;  %v1830_v26 = vmax.f32 %v1463_v32, 0.0 }
 0x1c3   :  { %v6685_v28 = vpop.f32.mrf.mxu0  ;;  %v6691_v42 = vpop.f32.mrf.mxu1 }
 0x1c4   :  { %v1857_v12 = vmax.f32 %v1672_v24, 0.0 }
 0x1c5   :  { %v6697_v35 = vpop.f32.mrf.mxu0  ;;  %3377 = vmatmul.mubr.bf16.vlgmr.msra.gmra.mxu0 %v2054_v0  ;;  %v6703_v31 = vpop.f32.mrf.mxu1  ;;  %3570 = vmatmul.mubr.bf16.vlgmr.msra.gmra.mxu1 %v2056_v52 }
 0x1c6   :  { %3386 = vmatprep.mubr.bf16.mxu0 %v2063_v45  ;;  %3579 = vmatprep.mubr.bf16.mxu1 %v2065_v15  ;;  %v2064_v45 = vpack.c.bf16 %v1824_v53, %v1816_v7  ;;  %v2071_v15 = vpack.c.bf16 %v1839_v48, %v1831_v13  ;;  %v7814_v53 = vld [vmem:[#allocation12_spill] sm:$0xff]  ;;  %v1475_v7 = vadd.f32 %v6532_v46, %v6607_v58  ;;  %v1838_v48 = vmax.f32 %v1467_v11, 0.0 }
 0x1c7   :  { %v6707_v44 = vpop.f32.mrf.mxu0  ;;  %v6709_v57 = vpop.f32.mrf.mxu1  ;;  %v1656_v60 = vadd.f32 %v7814_v53, %v6647_v62  ;;  %v1668_v13 = vadd.f32 %v6534_v51, %v6613_v10  ;;  %v1477_v51 = vadd.f32 %v6536_v43, %v6643_v30 }
 0x1c9   :  { %v6711_v63 = vpop.f32.mrf.mxu0  ;;  %v6713_v0 = vpop.f32.mrf.mxu1  ;;  %v1832_v46 = vmax.f32 %v1656_v60, 0.0  ;;  %v1849_v11 = vmax.f32 %v1668_v13, 0.0  ;;  %v7816_v60 = vld [vmem:[#allocation14_spill] sm:$0xff] }
 0x1cb   :  { %v6717_v52 = vpop.f32.mrf.mxu0  ;;  %v6723_v5 = vpop.f32.mrf.mxu1  ;;  %v2081_v43 = vpack.c.bf16 %v1857_v12, %v1849_v11 }
 0x1cd   :  { %v6729_v3 = vpop.f32.mrf.mxu0  ;;  %3387 = vmatmul.mubr.bf16.gmra.mxu0 %v2062_v29  ;;  %v6735_v59 = vpop.f32.mrf.mxu1  ;;  %3580 = vmatmul.mubr.bf16.gmra.mxu1 %v2064_v45  ;;  %v1855_v29 = vmax.f32 %v1479_v4, 0.0  ;;  %v2070_v45 = vpack.c.bf16 %v1838_v48, %v1830_v26  ;;  %v1489_v4 = vadd.f32 %v6574_v41, %v6607_v58  ;;  %v1682_v48 = vadd.f32 %v6580_v39, %v6613_v10 }
 0x1ce   :  { %7813 = vst [vmem:[#allocation10_spill] sm:$0xff] %v6729_v3  ;;  %7815 = vst [vmem:[#allocation9_spill] sm:$0xff] %v6735_v59  ;;  %3396 = vmatprep.mubr.bf16.mxu0 %v2071_v15  ;;  %3589 = vmatprep.mubr.bf16.mxu1 %v2073_v20  ;;  %v1847_v3 = vmax.f32 %v1475_v7, 0.0  ;;  %v2072_v20 = vpack.c.bf16 %v1840_v23, %v1832_v46  ;;  %v1473_v7 = vadd.f32 %v7816_v60, %v6643_v30  ;;  %v7818_v23 = vld [vmem:[#allocation7_spill] sm:$0xff] }
 0x1cf   :  { %v6739_v27 = vpop.f32.mrf.mxu0  ;;  %v6741_v18 = vpop.f32.mrf.mxu1  ;;  %v1666_v26 = vadd.f32 %v7818_v23, %v6647_v62  ;;  %v1856_v46 = vmax.f32 %v1670_v6, 0.0  ;;  %v1873_v60 = vmax.f32 %v1682_v48, 0.0  ;;  %v7821_v6 = vld [vmem:[#allocation4_spill] sm:$0xff] }
 0x1d0   :  { %v2079_v24 = vpack.c.bf16 %v1855_v29, %v1847_v3  ;;  %v1854_v3 = vmax.f32 %v1477_v51, 0.0  ;;  %v1678_v29 = vadd.f32 %v6566_v55, %v6613_v10  ;;  %v1846_v11 = vmax.f32 %v1473_v7, 0.0 }
 0x1d1   :  { %v6743_v53 = vpop.f32.mrf.mxu0  ;;  %v6745_v59 = vpop.f32.mrf.mxu1  ;;  %v1848_v54 = vmax.f32 %v1666_v26, 0.0  ;;  %v1487_v55 = vadd.f32 %v6568_v61, %v6643_v30  ;;  %v1499_v7 = vadd.f32 %v6615_v2, %v6607_v58 }
 0x1d2   :  { %v1865_v51 = vmax.f32 %v1678_v29, 0.0 }
 0x1d3   :  { %v6749_v15 = vpop.f32.mrf.mxu0  ;;  %v6755_v32 = vpop.f32.mrf.mxu1 }
 0x1d4   :  { %v2089_v61 = vpack.c.bf16 %v1873_v60, %v1865_v51 }
 0x1d5   :  { %v6761_v13 = vpop.f32.mrf.mxu0  ;;  %3397 = vmatmul.mubr.bf16.gmra.mxu0 %v2070_v45  ;;  %v6767_v41 = vpop.f32.mrf.mxu1  ;;  %3590 = vmatmul.mubr.bf16.gmra.mxu1 %v2072_v20  ;;  %v1871_v45 = vmax.f32 %v1489_v4, 0.0  ;;  %v2078_v20 = vpack.c.bf16 %v1854_v3, %v1846_v11  ;;  %v1680_v4 = vadd.f32 %v7821_v6, %v6647_v62  ;;  %v1692_v3 = vadd.f32 %v6621_v40, %v6613_v10 }
 0x1d6   :  { %7817 = vst [vmem:[#allocation6_spill] sm:$0xff] %v6761_v13  ;;  %7819 = vst [vmem:[#allocation13_spill] sm:$0xff] %v6767_v41  ;;  %3406 = vmatprep.mubr.bf16.mxu0 %v2079_v24  ;;  %3599 = vmatprep.mubr.bf16.mxu1 %v2081_v43  ;;  %v1863_v13 = vmax.f32 %v1485_v17, 0.0  ;;  %v2080_v43 = vpack.c.bf16 %v1856_v46, %v1848_v54  ;;  %v7822_v17 = vld [vmem:[#allocation15_spill] sm:$0xff]  ;;  %v7824_v46 = vld [vmem:[#allocation8_spill] sm:$0xff]  ;;  %v1495_v54 = vadd.f32 %v6598_v56, %v6607_v58 }
 0x1d7   :  { %v6771_v39 = vpop.f32.mrf.mxu0  ;;  %v6773_v12 = vpop.f32.mrf.mxu1  ;;  %v1676_v11 = vadd.f32 %v7824_v46, %v6647_v62  ;;  %v1872_v6 = vmax.f32 %v1680_v4, 0.0  ;;  %v1690_v4 = vadd.f32 %v6609_v16, %v6647_v62  ;;  %v1505_v16 = vadd.f32 %v6639_v1, %v6607_v58 }
 0x1d8   :  { %v2087_v26 = vpack.c.bf16 %v1871_v45, %v1863_v13  ;;  %v1870_v13 = vmax.f32 %v1487_v55, 0.0  ;;  %v1688_v45 = vadd.f32 %v6600_v21, %v6613_v10  ;;  %v1497_v21 = vadd.f32 %v6602_v38, %v6643_v30 }
 0x1d9   :  { %v6775_v23 = vpop.f32.mrf.mxu0  ;;  %v6777_v41 = vpop.f32.mrf.mxu1  ;;  %v1864_v56 = vmax.f32 %v1676_v11, 0.0  ;;  %v7826_v11 = vld [vmem:[#allocation3_spill] sm:$0xff] }
 0x1da   :  { %7820 = vst [vmem:[#allocation11_spill] sm:$0xff] %v6777_v41  ;;  %v1483_v41 = vadd.f32 %v7822_v17, %v6643_v30  ;;  %v1889_v17 = vmax.f32 %v1692_v3, 0.0  ;;  %v1881_v55 = vmax.f32 %v1688_v45, 0.0 }
 0x1db   :  { %v6781_v24 = vpop.f32.mrf.mxu0  ;;  %v6787_v48 = vpop.f32.mrf.mxu1 }
 0x1dc   :  { %v1862_v51 = vmax.f32 %v1483_v41, 0.0  ;;  %v1509_v41 = vadd.f32 %v6653_v47, %v6607_v58  ;;  %v2097_v38 = vpack.c.bf16 %v1889_v17, %v1881_v55 }
 0x1dd   :  { %v6793_v29 = vpop.f32.mrf.mxu0  ;;  %3407 = vmatmul.mubr.bf16.gmra.mxu0 %v2078_v20  ;;  %v6799_v2 = vpop.f32.mrf.mxu1  ;;  %3600 = vmatmul.mubr.bf16.gmra.mxu1 %v2080_v43  ;;  %v1887_v20 = vmax.f32 %v1499_v7, 0.0 }
 0x1de   :  { %7823 = vst [vmem:[#allocation12_spill] sm:$0xff] %v6793_v29  ;;  %7825 = vst [vmem:[#allocation14_spill] sm:$0xff] %v6799_v2  ;;  %3416 = vmatprep.mubr.bf16.mxu0 %v2087_v26  ;;  %3609 = vmatprep.mubr.bf16.mxu1 %v2089_v61  ;;  %v1879_v29 = vmax.f32 %v1495_v54, 0.0  ;;  %v2086_v43 = vpack.c.bf16 %v1870_v13, %v1862_v51  ;;  %v2088_v61 = vpack.c.bf16 %v1872_v6, %v1864_v56  ;;  %v7828_v6 = vld [vmem:[#allocation5_spill] sm:$0xff] }
 0x1df   :  { %v6803_v40 = vpop.f32.mrf.mxu0  ;;  %v6805_v60 = vpop.f32.mrf.mxu1  ;;  %v1493_v54 = vadd.f32 %v7826_v11, %v6643_v30  ;;  %v1702_v13 = vadd.f32 %v6659_v37, %v6613_v10  ;;  %v1686_v51 = vadd.f32 %v7828_v6, %v6647_v62  ;;  %v1888_v56 = vmax.f32 %v1690_v4, 0.0 }
 0x1e0   :  { %v2095_v3 = vpack.c.bf16 %v1887_v20, %v1879_v29  ;;  %v1886_v29 = vmax.f32 %v1497_v21, 0.0  ;;  %v1698_v20 = vadd.f32 %v6641_v34, %v6613_v10  ;;  %v1507_v34 = vadd.f32 %v6645_v22, %v6643_v30 }
 0x1e1   :  { %v6807_v46 = vpop.f32.mrf.mxu0  ;;  %v6809_v2 = vpop.f32.mrf.mxu1  ;;  %v1878_v55 = vmax.f32 %v1493_v54, 0.0  ;;  %v1905_v11 = vmax.f32 %v1702_v13, 0.0  ;;  %v1880_v1 = vmax.f32 %v1686_v51, 0.0  ;;  %v1700_v4 = vadd.f32 %v6649_v19, %v6647_v62 }
 0x1e2   :  { %v1897_v21 = vmax.f32 %v1698_v20, 0.0  ;;  %v1503_v51 = vadd.f32 %v6628_v36, %v6643_v30  ;;  %v1696_v20 = vadd.f32 %v6635_v50, %v6647_v62  ;;  %v1515_v19 = vadd.f32 %v6675_v9, %v6607_v58 }
 0x1e3   :  { %v6813_v26 = vpop.f32.mrf.mxu0  ;;  %v6819_v7 = vpop.f32.mrf.mxu1  ;;  %v1708_v36 = vadd.f32 %v6677_v49, %v6613_v10  ;;  %v1517_v49 = vadd.f32 %v6679_v14, %v6643_v30 }
 0x1e4   :  { %v2105_v22 = vpack.c.bf16 %v1905_v11, %v1897_v21  ;;  %v1894_v11 = vmax.f32 %v1503_v51, 0.0  ;;  %v1896_v9 = vmax.f32 %v1696_v20, 0.0  ;;  %v1513_v20 = vadd.f32 %v6665_v8, %v6643_v30 }
 0x1e5   :  { %v6825_v45 = vpop.f32.mrf.mxu0  ;;  %3417 = vmatmul.mubr.bf16.gmra.mxu0 %v2086_v43  ;;  %v6831_v47 = vpop.f32.mrf.mxu1  ;;  %3610 = vmatmul.mubr.bf16.gmra.mxu1 %v2088_v61  ;;  %v1903_v43 = vmax.f32 %v1509_v41, 0.0  ;;  %v2094_v61 = vpack.c.bf16 %v1886_v29, %v1878_v55  ;;  %v1519_v41 = vadd.f32 %v6685_v28, %v6607_v58  ;;  %v1718_v8 = vadd.f32 %v6709_v57, %v6613_v10 }
 0x1e6   :  { %7827 = vst [vmem:[#allocation7_spill] sm:$0xff] %v6825_v45  ;;  %7829 = vst [vmem:[#allocation4_spill] sm:$0xff] %v6831_v47  ;;  %3426 = vmatprep.mubr.bf16.mxu0 %v2095_v3  ;;  %3619 = vmatprep.mubr.bf16.mxu1 %v2097_v38  ;;  %v1895_v45 = vmax.f32 %v1505_v16, 0.0  ;;  %v2096_v38 = vpack.c.bf16 %v1888_v56, %v1880_v1  ;;  %v1712_v16 = vadd.f32 %v6691_v42, %v6613_v10 }
 0x1e7   :  { %v6835_v37 = vpop.f32.mrf.mxu0  ;;  %v6837_v17 = vpop.f32.mrf.mxu1  ;;  %v1904_v56 = vmax.f32 %v1700_v4, 0.0  ;;  %v1710_v4 = vadd.f32 %v6681_v25, %v6647_v62  ;;  %v1525_v25 = vadd.f32 %v6707_v44, %v6607_v58  ;;  %v1527_v57 = vadd.f32 %v6711_v63, %v6643_v30 }
 0x1e8   :  { %v2103_v13 = vpack.c.bf16 %v1903_v43, %v1895_v45  ;;  %v1902_v45 = vmax.f32 %v1507_v34, 0.0  ;;  %v1919_v43 = vmax.f32 %v1519_v41, 0.0  ;;  %v1921_v50 = vmax.f32 %v1712_v16, 0.0 }
 0x1e9   :  { %v6839_v6 = vpop.f32.mrf.mxu0  ;;  %v6841_v47 = vpop.f32.mrf.mxu1  ;;  %v1913_v34 = vmax.f32 %v1708_v36, 0.0  ;;  %v1529_v41 = vadd.f32 %v6717_v52, %v6607_v58  ;;  %v1706_v36 = vadd.f32 %v6671_v33, %v6647_v62 }
 0x1eb   :  { %v6845_v3 = vpop.f32.mrf.mxu0  ;;  %v6851_v54 = vpop.f32.mrf.mxu1  ;;  %v2113_v14 = vpack.c.bf16 %v1921_v50, %v1913_v34  ;;  %v1912_v44 = vmax.f32 %v1706_v36, 0.0  ;;  %v1523_v36 = vadd.f32 %v6697_v35, %v6643_v30  ;;  %v1728_v35 = vadd.f32 %v6741_v18, %v6613_v10 }
 0x1ec   :  { %v1537_v18 = vadd.f32 %v6743_v53, %v6643_v30  ;;  %v7837_v53 = vld [vmem:[#allocation10_spill] sm:$0xff] }
 0x1ed   :  { %v6857_v29 = vpop.f32.mrf.mxu0  ;;  %3427 = vmatmul.mubr.bf16.gmra.mxu0 %v2094_v61  ;;  %v6863_v28 = vpop.f32.mrf.mxu1  ;;  %3620 = vmatmul.mubr.bf16.gmra.mxu1 %v2096_v38  ;;  %v1911_v61 = vmax.f32 %v1515_v19, 0.0  ;;  %v2102_v38 = vpack.c.bf16 %v1902_v45, %v1894_v11  ;;  %v1722_v19 = vadd.f32 %v6723_v5, %v6613_v10  ;;  %v1935_v11 = vmax.f32 %v1529_v41, 0.0 }
 0x1ee   :  { %3436 = vmatprep.mubr.bf16.mxu0 %v2103_v13  ;;  %3629 = vmatprep.mubr.bf16.mxu1 %v2105_v22  ;;  %v2104_v22 = vpack.c.bf16 %v1904_v56, %v1896_v9  ;;  %v1918_v56 = vmax.f32 %v1517_v49, 0.0  ;;  %v1910_v9 = vmax.f32 %v1513_v20, 0.0  ;;  %v1929_v49 = vmax.f32 %v1718_v8, 0.0 }
 0x1ef   :  { %v6867_v42 = vpop.f32.mrf.mxu0  ;;  %v6869_v55 = vpop.f32.mrf.mxu1  ;;  %v2111_v16 = vpack.c.bf16 %v1919_v43, %v1911_v61  ;;  %v1920_v43 = vmax.f32 %v1710_v4, 0.0  ;;  %v1937_v33 = vmax.f32 %v1722_v19, 0.0  ;;  %v1720_v4 = vadd.f32 %v6713_v0, %v6647_v62 }
 0x1f0   :  { %v1539_v41 = vadd.f32 %v6749_v15, %v6607_v58  ;;  %v1716_v8 = vadd.f32 %v6703_v31, %v6647_v62  ;;  %v1535_v0 = vadd.f32 %v6739_v27, %v6607_v58  ;;  %v1926_v27 = vmax.f32 %v1523_v36, 0.0 }
 0x1f1   :  { %v6871_v1 = vpop.f32.mrf.mxu0  ;;  %v6873_v21 = vpop.f32.mrf.mxu1  ;;  %v2121_v63 = vpack.c.bf16 %v1937_v33, %v1929_v49 }
 0x1f2   :  { %v1951_v31 = vmax.f32 %v1539_v41, 0.0  ;;  %v1943_v49 = vmax.f32 %v1535_v0, 0.0  ;;  %v1730_v41 = vadd.f32 %v6745_v59, %v6647_v62  ;;  %v1742_v59 = vadd.f32 %v6787_v48, %v6613_v10 }
 0x1f3   :  { %v6877_v13 = vpop.f32.mrf.mxu0  ;;  %v6883_v51 = vpop.f32.mrf.mxu1 }
 0x1f5   :  { %v6889_v45 = vpop.f32.mrf.mxu0  ;;  %3437 = vmatmul.mubr.bf16.gmra.mxu0 %v2102_v38  ;;  %v6895_v52 = vpop.f32.mrf.mxu1  ;;  %3630 = vmatmul.mubr.bf16.gmra.mxu1 %v2104_v22  ;;  %v1927_v38 = vmax.f32 %v1525_v25, 0.0  ;;  %v2110_v22 = vpack.c.bf16 %v1918_v56, %v1910_v9  ;;  %v1732_v25 = vadd.f32 %v6755_v32, %v6613_v10  ;;  %v1936_v9 = vmax.f32 %v1720_v4, 0.0 }
 0x1f6   :  { %3446 = vmatprep.mubr.bf16.mxu0 %v2111_v16  ;;  %3639 = vmatprep.mubr.bf16.mxu1 %v2113_v14  ;;  %v2112_v14 = vpack.c.bf16 %v1920_v43, %v1912_v44  ;;  %v1934_v43 = vmax.f32 %v1527_v57, 0.0  ;;  %v1945_v4 = vmax.f32 %v1728_v35, 0.0  ;;  %v7838_v35 = vld [vmem:[#allocation9_spill] sm:$0xff] }
 0x1f7   :  { %v6899_v5 = vpop.f32.mrf.mxu0  ;;  %v6901_v50 = vpop.f32.mrf.mxu1  ;;  %v2119_v19 = vpack.c.bf16 %v1935_v11, %v1927_v38  ;;  %v2306_v11 = vld [vmem:[%s7734_s4] sm:$0x3]  ;;  %v1953_v44 = vmax.f32 %v1732_v25, 0.0 }
 0x1f9   :  { %v6903_v61 = vpop.f32.mrf.mxu0  ;;  %v6905_v34 = vpop.f32.mrf.mxu1 }
 0x1fb   :  { %v6909_v16 = vpop.f32.mrf.mxu0  ;;  %v6915_v20 = vpop.f32.mrf.mxu1 }
 0x1fd   :  { %v6921_v56 = vpop.f32.mrf.mxu0  ;;  %3447 = vmatmul.mubr.bf16.gmra.mxu0 %v2110_v22  ;;  %v6927_v15 = vpop.f32.mrf.mxu1  ;;  %3640 = vmatmul.mubr.bf16.gmra.mxu1 %v2112_v14  ;;  %v1928_v22 = vmax.f32 %v1716_v8, 0.0  ;;  %v7834_v14 = vld [vmem:[#allocation2_spill] sm:$0xff] }
 0x1fe   :  { %7830 = vst [vmem:[#allocation15_spill] sm:$0xff] %v6921_v56  ;;  %7831 = vst [vmem:[#allocation8_spill] sm:$0xff] %v6927_v15  ;;  %3456 = vmatprep.mubr.bf16.mxu0 %v2119_v19  ;;  %3649 = vmatprep.mubr.bf16.mxu1 %v2121_v63  ;;  %v7835_v19 = vsub.s32 0, %v7834_v14  ;;  %v2118_v15 = vpack.c.bf16 %v1934_v43, %v1926_v27  ;;  %v7836_v25 = vsub.s32 1, %v7834_v14  ;;  %v1950_v14 = vmax.f32 %v1537_v18, 0.0 }
 0x1ff   :  { %v6931_v32 = vpop.f32.mrf.mxu0  ;;  %v6936_v33 = vpop.f32.mrf.mxu1  ;;  %v2120_v0 = vpack.c.bf16 %v1936_v9, %v1928_v22  ;;  %v1533_v56 = vadd.f32 %v7837_v53, %v6643_v30  ;;  %v2127_v43 = vpack.c.bf16 %v1951_v31, %v1943_v49  ;;  %v1726_v27 = vadd.f32 %v7838_v35, %v6647_v62 }
 0x200   :  { %v6946_v63 = vrot.slane %v2306_v11, %v7835_v19  ;;  %v6954_v8 = vrot.slane %v2306_v11, %v7836_v25  ;;  %v2129_v11 = vpack.c.bf16 %v1953_v44, %v1945_v4  ;;  %v1545_v9 = vadd.f32 %v6771_v39, %v6607_v58 }
 0x201   :  { %v6938_v38 = vpop.f32.mrf.mxu0  ;;  %v6942_v57 = vpop.f32.mrf.mxu1  ;;  %v1738_v31 = vadd.f32 %v6773_v12, %v6613_v10  ;;  %v1942_v53 = vmax.f32 %v1533_v56, 0.0  ;;  %v1944_v18 = vmax.f32 %v1726_v27, 0.0  ;;  %v1547_v39 = vadd.f32 %v6775_v23, %v6643_v30 }
 0x202   :  { %7832 = vst [vmem:[#allocation3_spill] sm:$0xff] %v6938_v38  ;;  %7833 = vst [vmem:[#allocation5_spill] sm:$0xff] %v6942_v57  ;;  %v1549_v57 = vadd.f32 %v6781_v24, %v6607_v58  ;;  %v1952_v24 = vmax.f32 %v1730_v41, 0.0  ;;  %v1959_v41 = vmax.f32 %v1545_v9, 0.0  ;;  %v1559_v23 = vadd.f32 %v6813_v26, %v6607_v58 }
 0x203   :  { %v6950_v36 = vpop.f32.mrf.mxu0  ;;  %v6960_v19 = vpop.f32.mrf.mxu1 }
 0x204   :  { %v1967_v48 = vmax.f32 %v1549_v57, 0.0  ;;  %v2128_v56 = vpack.c.bf16 %v1952_v24, %v1944_v18  ;;  %v7840_v57 = vld [vmem:[#allocation6_spill] sm:$0xff] }
 0x205   :  { %v2992_v38 = vpop.f32.mrf.mxu0  ;;  %3457 = vmatmul.mubr.bf16.gmra.mxu0 %v2118_v15  ;;  %v3185_v25 = vpop.f32.mrf.mxu1  ;;  %3650 = vmatmul.mubr.bf16.gmra.mxu1 %v2120_v0  ;;  %v2126_v0 = vpack.c.bf16 %v1950_v14, %v1942_v53 }
 0x206   :  { %v2993_v22 = vadd.f32 %v2992_v38, %v6946_v63  ;;  %3466 = vmatprep.mubr.bf16.mxu0 %v2127_v43  ;;  %3659 = vmatprep.mubr.bf16.mxu1 %v2129_v11  ;;  %v1969_v38 = vmax.f32 %v1742_v59, 0.0  ;;  %v2135_v53 = vpack.c.bf16 %v1967_v48, %v1959_v41 }
 0x207   :  { %v2994_v49 = vpop.f32.mrf.mxu0  ;;  %v3187_v44 = vpop.f32.mrf.mxu1 }
 0x208   :  { %v6971_v35 = vadd.f32 %v3185_v25, %v2993_v22  ;;  %v2995_v15 = vadd.f32 %v2994_v49, %v6954_v8  ;;  %v1543_v22 = vadd.f32 %v7840_v57, %v6643_v30  ;;  %v1961_v25 = vmax.f32 %v1738_v31, 0.0  ;;  %v7841_v49 = vld [vmem:[#allocation11_spill] sm:$0xff] }
 0x209   :  { %v2996_v4 = vpop.f32.mrf.mxu0  ;;  %v3189_v11 = vpop.f32.mrf.mxu1  ;;  %v1740_v27 = vadd.f32 %v7841_v49, %v6647_v62  ;;  %v1752_v31 = vadd.f32 %v6819_v7, %v6613_v10  ;;  %v1555_v57 = vadd.f32 %v6803_v40, %v6607_v58 }
 0x20a   :  { %7839 = vst [vmem:[#allocation2_spill] sm:$0xff] %v6971_v35  ;;  %v6976_v43 = vadd.f32 %v3187_v44, %v2995_v15  ;;  %v2997_v12 = vadd.f32 %v2996_v4, %v6946_v63  ;;  %v7842_v15 = vld [vmem:[#allocation13_spill] sm:$0xff]  ;;  %v1966_v44 = vmax.f32 %v1547_v39, 0.0  ;;  %v2137_v4 = vpack.c.bf16 %v1969_v38, %v1961_v25 }
 0x20b   :  { %v2998_v35 = vpop.f32.mrf.mxu0  ;;  %v3191_v9 = vpop.f32.mrf.mxu1  ;;  %v1736_v24 = vadd.f32 %v7842_v15, %v6647_v62  ;;  %v1958_v48 = vmax.f32 %v1543_v22, 0.0  ;;  %v1968_v41 = vmax.f32 %v1740_v27, 0.0  ;;  %v1748_v39 = vadd.f32 %v6805_v60, %v6613_v10 }
 0x20c   :  { %v6985_v59 = vadd.f32 %v3189_v11, %v2997_v12  ;;  %v2999_v14 = vadd.f32 %v2998_v35, %v6954_v8  ;;  %v1983_v11 = vmax.f32 %v1559_v23, 0.0  ;;  %v1975_v15 = vmax.f32 %v1555_v57, 0.0  ;;  %v7843_v23 = vld [vmem:[#allocation12_spill] sm:$0xff] }
 0x20d   :  { %v3002_v18 = vpop.f32.mrf.mxu0  ;;  %3467 = vmatmul.mubr.bf16.gmra.mxu0 %v2126_v0  ;;  %v3195_v35 = vpop.f32.mrf.mxu1  ;;  %3660 = vmatmul.mubr.bf16.gmra.mxu1 %v2128_v56  ;;  %v1960_v25 = vmax.f32 %v1736_v24, 0.0  ;;  %v2134_v49 = vpack.c.bf16 %v1966_v44, %v1958_v48  ;;  %v1557_v56 = vadd.f32 %v6807_v46, %v6643_v30  ;;  %v1750_v24 = vadd.f32 %v6809_v2, %v6647_v62  ;;  %v7844_v48 = vld [vmem:[#allocation14_spill] sm:$0xff] }
 0x20e   :  { %v6994_v26 = vadd.f32 %v3191_v9, %v2999_v14  ;;  %v3003_v12 = vadd.f32 %v3002_v18, %v6946_v63  ;;  %3476 = vmatprep.mubr.bf16.mxu0 %v2135_v53  ;;  %3669 = vmatprep.mubr.bf16.mxu1 %v2137_v4  ;;  %v1985_v14 = vmax.f32 %v1752_v31, 0.0  ;;  %v1553_v18 = vadd.f32 %v7843_v23, %v6643_v30 }
 0x20f   :  { %v3004_v7 = vpop.f32.mrf.mxu0  ;;  %v3197_v40 = vpop.f32.mrf.mxu1  ;;  %v2136_v53 = vpack.c.bf16 %v1968_v41, %v1960_v25  ;;  %v1977_v4 = vmax.f32 %v1748_v39, 0.0  ;;  %v1569_v31 = vadd.f32 %v6845_v3, %v6607_v58  ;;  %v1746_v41 = vadd.f32 %v7844_v48, %v6647_v62 }
 0x210   :  { %v6999_v0 = vadd.f32 %v3195_v35, %v3003_v12  ;;  %v3005_v38 = vadd.f32 %v3004_v7, %v6954_v8  ;;  %v2143_v35 = vpack.c.bf16 %v1983_v11, %v1975_v15  ;;  %v1762_v7 = vadd.f32 %v6851_v54, %v6613_v10 }
 0x211   :  { %v3006_v9 = vpop.f32.mrf.mxu0  ;;  %v3199_v27 = vpop.f32.mrf.mxu1  ;;  %v1982_v2 = vmax.f32 %v1557_v56, 0.0  ;;  %v1984_v11 = vmax.f32 %v1750_v24, 0.0  ;;  %v1758_v15 = vadd.f32 %v6837_v17, %v6613_v10  ;;  %v1567_v23 = vadd.f32 %v6839_v6, %v6643_v30 }
 0x212   :  { %v7004_v22 = vadd.f32 %v3197_v40, %v3005_v38  ;;  %v3007_v60 = vadd.f32 %v3006_v9, %v6946_v63  ;;  %v2145_v38 = vpack.c.bf16 %v1985_v14, %v1977_v4  ;;  %v1565_v40 = vadd.f32 %v6835_v37, %v6607_v58 }
 0x213   :  { %v3008_v44 = vpop.f32.mrf.mxu0  ;;  %v3201_v12 = vpop.f32.mrf.mxu1  ;;  %v2001_v4 = vmax.f32 %v1762_v7, 0.0  ;;  %v1993_v48 = vmax.f32 %v1758_v15, 0.0  ;;  %v1579_v6 = vadd.f32 %v6877_v13, %v6607_v58  ;;  %v1772_v15 = vadd.f32 %v6883_v51, %v6613_v10 }
 0x214   :  { %v7013_v57 = vadd.f32 %v3199_v27, %v3007_v60  ;;  %v3009_v46 = vadd.f32 %v3008_v44, %v6954_v8  ;;  %v1974_v60 = vmax.f32 %v1553_v18, 0.0  ;;  %v1976_v27 = vmax.f32 %v1746_v41, 0.0 }
 0x215   :  { %v3012_v39 = vpop.f32.mrf.mxu0  ;;  %3477 = vmatmul.mubr.bf16.gmra.mxu0 %v2134_v49  ;;  %v3205_v9 = vpop.f32.mrf.mxu1  ;;  %3670 = vmatmul.mubr.bf16.gmra.mxu1 %v2136_v53  ;;  %v1999_v49 = vmax.f32 %v1569_v31, 0.0  ;;  %v1991_v24 = vmax.f32 %v1565_v40, 0.0  ;;  %v7845_v31 = vld [vmem:[#allocation7_spill] sm:$0xff]  ;;  %v1760_v41 = vadd.f32 %v6841_v47, %v6647_v62  ;;  %v2153_v47 = vpack.c.bf16 %v2001_v4, %v1993_v48 }
 0x216   :  { %v7022_v3 = vadd.f32 %v3201_v12, %v3009_v46  ;;  %v3013_v25 = vadd.f32 %v3012_v39, %v6946_v63  ;;  %3486 = vmatprep.mubr.bf16.mxu0 %v2143_v35  ;;  %3679 = vmatprep.mubr.bf16.mxu1 %v2145_v38  ;;  %v2142_v44 = vpack.c.bf16 %v1982_v2, %v1974_v60 }
 0x217   :  { %v3014_v54 = vpop.f32.mrf.mxu0  ;;  %v3207_v37 = vpop.f32.mrf.mxu1  ;;  %v2144_v18 = vpack.c.bf16 %v1984_v11, %v1976_v27  ;;  %v1563_v35 = vadd.f32 %v7845_v31, %v6643_v30  ;;  %v2151_v40 = vpack.c.bf16 %v1999_v49, %v1991_v24  ;;  %v1998_v11 = vmax.f32 %v1567_v23, 0.0 }
 0x218   :  { %v7027_v14 = vadd.f32 %v3205_v9, %v3013_v25  ;;  %v3015_v56 = vadd.f32 %v3014_v54, %v6954_v8  ;;  %v7846_v25 = vld [vmem:[#allocation4_spill] sm:$0xff]  ;;  %v1575_v60 = vadd.f32 %v6867_v42, %v6607_v58  ;;  %v2000_v27 = vmax.f32 %v1760_v41, 0.0 }
 0x219   :  { %v3016_v53 = vpop.f32.mrf.mxu0  ;;  %v3209_v12 = vpop.f32.mrf.mxu1  ;;  %v1756_v9 = vadd.f32 %v7846_v25, %v6647_v62  ;;  %v1990_v49 = vmax.f32 %v1563_v35, 0.0  ;;  %v1768_v23 = vadd.f32 %v6869_v55, %v6613_v10  ;;  %v1589_v25 = vadd.f32 %v6909_v16, %v6607_v58 }
 0x21a   :  { %v7032_v46 = vadd.f32 %v3207_v37, %v3015_v56  ;;  %v3017_v17 = vadd.f32 %v3016_v53, %v6946_v63  ;;  %v2015_v53 = vmax.f32 %v1579_v6, 0.0  ;;  %v2007_v48 = vmax.f32 %v1575_v60, 0.0 }
 0x21b   :  { %v3018_v39 = vpop.f32.mrf.mxu0  ;;  %v3211_v2 = vpop.f32.mrf.mxu1  ;;  %v1992_v24 = vmax.f32 %v1756_v9, 0.0  ;;  %v1573_v6 = vadd.f32 %v6857_v29, %v6643_v30  ;;  %v1782_v29 = vadd.f32 %v6915_v20, %v6613_v10 }
 0x21c   :  { %v7041_v7 = vadd.f32 %v3209_v12, %v3017_v17  ;;  %v3019_v38 = vadd.f32 %v3018_v39, %v6954_v8  ;;  %v2150_v17 = vpack.c.bf16 %v1998_v11, %v1990_v49  ;;  %v2017_v12 = vmax.f32 %v1772_v15, 0.0 }
 0x21d   :  { %v3022_v54 = vpop.f32.mrf.mxu0  ;;  %3487 = vmatmul.mubr.bf16.gmra.mxu0 %v2142_v44  ;;  %v3215_v37 = vpop.f32.mrf.mxu1  ;;  %3680 = vmatmul.mubr.bf16.gmra.mxu1 %v2144_v18  ;;  %v1577_v18 = vadd.f32 %v6871_v1, %v6643_v30  ;;  %v2152_v39 = vpack.c.bf16 %v2000_v27, %v1992_v24  ;;  %v2159_v15 = vpack.c.bf16 %v2015_v53, %v2007_v48  ;;  %v2033_v24 = vmax.f32 %v1782_v29, 0.0 }
 0x21e   :  { %v7050_v13 = vadd.f32 %v3211_v2, %v3019_v38  ;;  %v3023_v56 = vadd.f32 %v3022_v54, %v6946_v63  ;;  %3496 = vmatprep.mubr.bf16.mxu0 %v2151_v40  ;;  %3689 = vmatprep.mubr.bf16.mxu1 %v2153_v47  ;;  %v2009_v38 = vmax.f32 %v1768_v23, 0.0  ;;  %v1770_v2 = vadd.f32 %v6873_v21, %v6647_v62 }
 0x21f   :  { %v3024_v51 = vpop.f32.mrf.mxu0  ;;  %v3217_v42 = vpop.f32.mrf.mxu1  ;;  %v1766_v54 = vadd.f32 %v6863_v28, %v6647_v62  ;;  %v2014_v21 = vmax.f32 %v1577_v18, 0.0  ;;  %v1778_v28 = vadd.f32 %v6901_v50, %v6613_v10  ;;  %v2006_v23 = vmax.f32 %v1573_v6, 0.0 }
 0x220   :  { %v7055_v44 = vadd.f32 %v3215_v37, %v3023_v56  ;;  %v3025_v4 = vadd.f32 %v3024_v51, %v6954_v8  ;;  %v2161_v60 = vpack.c.bf16 %v2017_v12, %v2009_v38  ;;  %v1585_v56 = vadd.f32 %v6899_v5, %v6607_v58 }
 0x221   :  { %v3026_v31 = vpop.f32.mrf.mxu0  ;;  %v3219_v41 = vpop.f32.mrf.mxu1  ;;  %v2016_v27 = vmax.f32 %v1770_v2, 0.0  ;;  %v2031_v51 = vmax.f32 %v1589_v25, 0.0  ;;  %v2158_v12 = vpack.c.bf16 %v2014_v21, %v2006_v23  ;;  %v1780_v6 = vadd.f32 %v6905_v34, %v6647_v62 }
 0x222   :  { %v7060_v35 = vadd.f32 %v3217_v42, %v3025_v4  ;;  %v3027_v55 = vadd.f32 %v3026_v31, %v6946_v63  ;;  %v2008_v42 = vmax.f32 %v1766_v54, 0.0  ;;  %v2023_v31 = vmax.f32 %v1585_v56, 0.0 }
 0x223   :  { %v3028_v40 = vpop.f32.mrf.mxu0  ;;  %v3221_v11 = vpop.f32.mrf.mxu1  ;;  %v1599_v2 = vadd.f32 %v6950_v36, %v6607_v58  ;;  %v1776_v54 = vadd.f32 %v6895_v52, %v6647_v62  ;;  %v1595_v36 = vadd.f32 %v6931_v32, %v6607_v58  ;;  %v2032_v56 = vmax.f32 %v1780_v6, 0.0 }
 0x224   :  { %v7069_v9 = vadd.f32 %v3219_v41, %v3027_v55  ;;  %v3029_v1 = vadd.f32 %v3028_v40, %v6954_v8  ;;  %v2160_v50 = vpack.c.bf16 %v2016_v27, %v2008_v42  ;;  %v2025_v41 = vmax.f32 %v1778_v28, 0.0 }
 0x225   :  { %v3032_v47 = vpop.f32.mrf.mxu0  ;;  %3497 = vmatmul.mubr.bf16.gmra.mxu0 %v2150_v17  ;;  %v3225_v49 = vpop.f32.mrf.mxu1  ;;  %3690 = vmatmul.mubr.bf16.gmra.mxu1 %v2152_v39  ;;  %v1587_v39 = vadd.f32 %v6903_v61, %v6643_v30  ;;  %v1792_v61 = vadd.f32 %v6960_v19, %v6613_v10  ;;  %v1788_v52 = vadd.f32 %v6936_v33, %v6613_v10  ;;  %v2024_v28 = vmax.f32 %v1776_v54, 0.0 }
 0x226   :  { %v7078_v16 = vadd.f32 %v3221_v11, %v3029_v1  ;;  %v3033_v37 = vadd.f32 %v3032_v47, %v6946_v63  ;;  %3506 = vmatprep.mubr.bf16.mxu0 %v2159_v15  ;;  %3699 = vmatprep.mubr.bf16.mxu1 %v2161_v60  ;;  %v2167_v11 = vpack.c.bf16 %v2031_v51, %v2023_v31  ;;  %v2039_v51 = vmax.f32 %v1595_v36, 0.0 }
 0x227   :  { %v3034_v20 = vpop.f32.mrf.mxu0  ;;  %v3227_v5 = vpop.f32.mrf.mxu1  ;;  %v1583_v15 = vadd.f32 %v6889_v45, %v6643_v30  ;;  %v2169_v29 = vpack.c.bf16 %v2033_v24, %v2025_v41  ;;  %v2030_v45 = vmax.f32 %v1587_v39, 0.0  ;;  %v2168_v10 = vpack.c.bf16 %v2032_v56, %v2024_v28 }
 0x228   :  { %v7083_v53 = vadd.f32 %v3225_v49, %v3033_v37  ;;  %v3035_v4 = vadd.f32 %v3034_v20, %v6954_v8  ;;  %v2047_v37 = vmax.f32 %v1599_v2, 0.0  ;;  %v2049_v20 = vmax.f32 %v1792_v61, 0.0 }
 0x229   :  { %v3036_v17 = vpop.f32.mrf.mxu0  ;;  %v3229_v55 = vpop.f32.mrf.mxu1  ;;  %v2022_v32 = vmax.f32 %v1583_v15, 0.0  ;;  %v2041_v33 = vmax.f32 %v1788_v52, 0.0 }
 0x22a   :  { %v7086_v48 = vadd.f32 %v3227_v5, %v3035_v4  ;;  %v3037_v18 = vadd.f32 %v3036_v17, %v6946_v63  ;;  %v7847_v17 = vld [vmem:[#allocation3_spill] sm:$0xff]  ;;  %v2175_v6 = vpack.c.bf16 %v2047_v37, %v2039_v51 }
 0x22b   :  { %v3038_v38 = vpop.f32.mrf.mxu0  ;;  %v3231_v1 = vpop.f32.mrf.mxu1  ;;  %v2166_v24 = vpack.c.bf16 %v2030_v45, %v2022_v32 }
 0x22c   :  { %v7095_v40 = vadd.f32 %v3229_v55, %v3037_v18  ;;  %v3039_v25 = vadd.f32 %v3038_v38, %v6954_v8  ;;  %v7848_v18 = vld [vmem:[#allocation5_spill] sm:$0xff]  ;;  %v7849_v38 = vld [vmem:[#allocation15_spill] sm:$0xff] }
 0x22d   :  { %v3042_v34 = vpop.f32.mrf.mxu0  ;;  %3507 = vmatmul.mubr.bf16.gmra.mxu0 %v2158_v12  ;;  %v3235_v21 = vpop.f32.mrf.mxu1  ;;  %3700 = vmatmul.mubr.bf16.gmra.mxu1 %v2160_v50  ;;  %v1597_v12 = vadd.f32 %v7847_v17, %v6643_v30  ;;  %v1790_v55 = vadd.f32 %v7848_v18, %v6647_v62  ;;  %v1593_v2 = vadd.f32 %v7849_v38, %v6643_v30 }
 0x22e   :  { %v7106_v47 = vadd.f32 %v3231_v1, %v3039_v25  ;;  %v3043_v60 = vadd.f32 %v3042_v34, %v6946_v63  ;;  %3516 = vmatprep.mubr.bf16.mxu0 %v2167_v11  ;;  %3709 = vmatprep.mubr.bf16.mxu1 %v2169_v29  ;;  %v2177_v1 = vpack.c.bf16 %v2049_v20, %v2041_v33  ;;  %v7850_v11 = vld [vmem:[#allocation8_spill] sm:$0xff] }
 0x22f   :  { %v3044_v19 = vpop.f32.mrf.mxu0  ;;  %v3237_v58 = vpop.f32.mrf.mxu1  ;;  %v1786_v15 = vadd.f32 %v7850_v11, %v6647_v62  ;;  %v2046_v29 = vmax.f32 %v1597_v12, 0.0  ;;  %v2038_v56 = vmax.f32 %v1593_v2, 0.0 }
 0x230   :  { %v7111_v49 = vadd.f32 %v3235_v21, %v3043_v60  ;;  %v3045_v27 = vadd.f32 %v3044_v19, %v6954_v8  ;;  %v2048_v60 = vmax.f32 %v1790_v55, 0.0 }
 0x231   :  { %v3046_v23 = vpop.f32.mrf.mxu0  ;;  %v3239_v42 = vpop.f32.mrf.mxu1  ;;  %v2040_v19 = vmax.f32 %v1786_v15, 0.0 }
 0x232   :  { %v7114_v4 = vadd.f32 %v3237_v58, %v3045_v27  ;;  %v3047_v5 = vadd.f32 %v3046_v23, %v6946_v63  ;;  %v2174_v58 = vpack.c.bf16 %v2046_v29, %v2038_v56 }
 0x233   :  { %v3048_v31 = vpop.f32.mrf.mxu0  ;;  %v3241_v39 = vpop.f32.mrf.mxu1  ;;  %v2176_v28 = vpack.c.bf16 %v2048_v60, %v2040_v19 }
 0x234   :  { %v7121_v50 = vadd.f32 %v3239_v42, %v3047_v5  ;;  %v3049_v41 = vadd.f32 %v3048_v31, %v6954_v8 }
 0x235   :  { %v3052_v25 = vpop.f32.mrf.mxu0  ;;  %3517 = vmatmul.mubr.bf16.gmra.mxu0 %v2166_v24  ;;  %v3245_v34 = vpop.f32.mrf.mxu1  ;;  %3710 = vmatmul.mubr.bf16.gmra.mxu1 %v2168_v10 }
 0x236   :  { %v7128_v54 = vadd.f32 %v3241_v39, %v3049_v41  ;;  %v3053_v61 = vadd.f32 %v3052_v25, %v6946_v63  ;;  %3526 = vmatprep.mubr.bf16.mxu0 %v2175_v6  ;;  %3719 = vmatprep.mubr.bf16.mxu1 %v2177_v1 }
 0x237   :  { %v3054_v36 = vpop.f32.mrf.mxu0  ;;  %v3247_v45 = vpop.f32.mrf.mxu1 }
 0x238   :  { %v7131_v21 = vadd.f32 %v3245_v34, %v3053_v61  ;;  %v3055_v30 = vadd.f32 %v3054_v36, %v6954_v8 }
 0x239   :  { %v3056_v52 = vpop.f32.mrf.mxu0  ;;  %v3249_v27 = vpop.f32.mrf.mxu1 }
 0x23a   :  { %v7134_v62 = vadd.f32 %v3247_v45, %v3055_v30  ;;  %v3057_v37 = vadd.f32 %v3056_v52, %v6946_v63 }
 0x23b   :  { %v3058_v32 = vpop.f32.mrf.mxu0  ;;  %v3251_v51 = vpop.f32.mrf.mxu1 }
 0x23c   :  { %v7137_v20 = vadd.f32 %v3249_v27, %v3057_v37  ;;  %v3059_v23 = vadd.f32 %v3058_v32, %v6954_v8 }
 0x23d   :  { %v3062_v5 = vpop.f32.mrf.mxu0  ;;  %3527 = vmatmul.mubr.bf16.gmra.mxu0 %v2174_v58  ;;  %v3255_v10 = vpop.f32.mrf.mxu1  ;;  %3720 = vmatmul.mubr.bf16.gmra.mxu1 %v2176_v28 }
 0x23e   :  { %v7140_v42 = vadd.f32 %v3251_v51, %v3059_v23  ;;  %v3063_v24 = vadd.f32 %v3062_v5, %v6946_v63 }
 0x23f   :  { %v3064_v33 = vpop.f32.mrf.mxu0  ;;  %v3257_v31 = vpop.f32.mrf.mxu1 }
 0x240   :  { %v7143_v17 = vadd.f32 %v3255_v10, %v3063_v24  ;;  %v3065_v12 = vadd.f32 %v3064_v33, %v6954_v8 }
 0x241   :  { %v3066_v18 = vpop.f32.mrf.mxu0  ;;  %v3259_v39 = vpop.f32.mrf.mxu1 }
 0x242   :  { %v7146_v55 = vadd.f32 %v3257_v31, %v3065_v12  ;;  %v3067_v41 = vadd.f32 %v3066_v18, %v6946_v63 }
 0x243   :  { %v3068_v6 = vpop.f32.mrf.mxu0  ;;  %v3261_v25 = vpop.f32.mrf.mxu1 }
 0x244   :  { %v7149_v38 = vadd.f32 %v3259_v39, %v3067_v41  ;;  %v3069_v2 = vadd.f32 %v3068_v6, %v6954_v8 }
 0x245   :  { %v3072_v1 = vpop.f32.mrf.mxu0  ;;  %v3265_v61 = vpop.f32.mrf.mxu1 }
 0x246   :  { %v7152_v11 = vadd.f32 %v3261_v25, %v3069_v2  ;;  %v3073_v15 = vadd.f32 %v3072_v1, %v6946_v63 }
 0x247   :  { %v3074_v34 = vpop.f32.mrf.mxu0  ;;  %v3267_v60 = vpop.f32.mrf.mxu1 }
 0x248   :  { %v7155_v29 = vadd.f32 %v3265_v61, %v3073_v15  ;;  %v3075_v36 = vadd.f32 %v3074_v34, %v6954_v8 }
 0x249   :  { %v3076_v30 = vpop.f32.mrf.mxu0  ;;  %v3269_v52 = vpop.f32.mrf.mxu1 }
 0x24a   :  { %v7158_v45 = vadd.f32 %v3267_v60, %v3075_v36  ;;  %v3077_v56 = vadd.f32 %v3076_v30, %v6946_v63 }
 0x24b   :  { %v3078_v19 = vpop.f32.mrf.mxu0  ;;  %v3271_v58 = vpop.f32.mrf.mxu1 }
 0x24c   :  { %v7161_v37 = vadd.f32 %v3269_v52, %v3077_v56  ;;  %v3079_v27 = vadd.f32 %v3078_v19, %v6954_v8 }
 0x24d   :  { %v3082_v32 = vpop.f32.mrf.mxu0  ;;  %v3275_v51 = vpop.f32.mrf.mxu1 }
 0x24e   :  { %v7164_v28 = vadd.f32 %v3271_v58, %v3079_v27  ;;  %v3083_v23 = vadd.f32 %v3082_v32, %v6946_v63 }
 0x24f   :  { %v3084_v5 = vpop.f32.mrf.mxu0  ;;  %v3277_v33 = vpop.f32.mrf.mxu1 }
 0x250   :  { %v7167_v24 = vadd.f32 %v3275_v51, %v3083_v23  ;;  %v3085_v10 = vadd.f32 %v3084_v5, %v6954_v8 }
 0x251   :  { %v3086_v12 = vpop.f32.mrf.mxu0  ;;  %v3279_v41 = vpop.f32.mrf.mxu1 }
 0x252   :  { %v7170_v31 = vadd.f32 %v3277_v33, %v3085_v10  ;;  %v3087_v18 = vadd.f32 %v3086_v12, %v6946_v63 }
 0x253   :  { %v3088_v39 = vpop.f32.mrf.mxu0  ;;  %v3281_v25 = vpop.f32.mrf.mxu1 }
 0x254   :  { %v7173_v6 = vadd.f32 %v3279_v41, %v3087_v18  ;;  %v3089_v2 = vadd.f32 %v3088_v39, %v6954_v8 }
 0x255   :  { %v3092_v1 = vpop.f32.mrf.mxu0  ;;  %v3285_v34 = vpop.f32.mrf.mxu1 }
 0x256   :  { %v7176_v15 = vadd.f32 %v3281_v25, %v3089_v2  ;;  %v3093_v61 = vadd.f32 %v3092_v1, %v6946_v63 }
 0x257   :  { %v3094_v36 = vpop.f32.mrf.mxu0  ;;  %v3287_v56 = vpop.f32.mrf.mxu1 }
 0x258   :  { %v7179_v60 = vadd.f32 %v3285_v34, %v3093_v61  ;;  %v3095_v30 = vadd.f32 %v3094_v36, %v6954_v8 }
 0x259   :  { %v3096_v52 = vpop.f32.mrf.mxu0  ;;  %v3289_v58 = vpop.f32.mrf.mxu1 }
 0x25a   :  { %v7182_v19 = vadd.f32 %v3287_v56, %v3095_v30  ;;  %v3097_v27 = vadd.f32 %v3096_v52, %v6946_v63 }
 0x25b   :  { %v3098_v32 = vpop.f32.mrf.mxu0  ;;  %v3291_v5 = vpop.f32.mrf.mxu1 }
 0x25c   :  { %v7185_v23 = vadd.f32 %v3289_v58, %v3097_v27  ;;  %v3099_v51 = vadd.f32 %v3098_v32, %v6954_v8 }
 0x25d   :  { %v3102_v10 = vpop.f32.mrf.mxu0  ;;  %v3295_v18 = vpop.f32.mrf.mxu1 }
 0x25e   :  { %v7188_v33 = vadd.f32 %v3291_v5, %v3099_v51  ;;  %v3103_v12 = vadd.f32 %v3102_v10, %v6946_v63 }
 0x25f   :  { %v3104_v41 = vpop.f32.mrf.mxu0  ;;  %v3297_v25 = vpop.f32.mrf.mxu1 }
 0x260   :  { %v7191_v39 = vadd.f32 %v3295_v18, %v3103_v12  ;;  %v3105_v2 = vadd.f32 %v3104_v41, %v6954_v8 }
 0x261   :  { %v3106_v1 = vpop.f32.mrf.mxu0  ;;  %v3299_v36 = vpop.f32.mrf.mxu1 }
 0x262   :  { %v7194_v61 = vadd.f32 %v3297_v25, %v3105_v2  ;;  %v3107_v34 = vadd.f32 %v3106_v1, %v6946_v63 }
 0x263   :  { %v3108_v30 = vpop.f32.mrf.mxu0  ;;  %v3301_v27 = vpop.f32.mrf.mxu1 }
 0x264   :  { %v7197_v56 = vadd.f32 %v3299_v36, %v3107_v34  ;;  %v3109_v52 = vadd.f32 %v3108_v30, %v6954_v8 }
 0x265   :  { %v3112_v58 = vpop.f32.mrf.mxu0  ;;  %v3305_v5 = vpop.f32.mrf.mxu1 }
 0x266   :  { %7851 = vst [vmem:[#allocation10_spill] sm:$0xff] %v7197_v56  ;;  %v7200_v32 = vadd.f32 %v3301_v27, %v3109_v52  ;;  %v3113_v51 = vadd.f32 %v3112_v58, %v6946_v63 }
 0x267   :  { %v3114_v10 = vpop.f32.mrf.mxu0  ;;  %v3307_v41 = vpop.f32.mrf.mxu1 }
 0x268   :  { %7852 = vst [vmem:[#allocation9_spill] sm:$0xff] %v7200_v32  ;;  %v7203_v12 = vadd.f32 %v3305_v5, %v3113_v51  ;;  %v3115_v18 = vadd.f32 %v3114_v10, %v6954_v8 }
 0x269   :  { %v3116_v2 = vpop.f32.mrf.mxu0  ;;  %v3309_v34 = vpop.f32.mrf.mxu1 }
 0x26a   :  { %7853 = vst [vmem:[#allocation6_spill] sm:$0xff] %v7203_v12  ;;  %v7206_v25 = vadd.f32 %v3307_v41, %v3115_v18  ;;  %v3117_v1 = vadd.f32 %v3116_v2, %v6946_v63 }
 0x26b   :  { %v3118_v36 = vpop.f32.mrf.mxu0  ;;  %v3311_v27 = vpop.f32.mrf.mxu1 }
 0x26c   :  { %7854 = vst [vmem:[#allocation11_spill] sm:$0xff] %v7206_v25  ;;  %v7209_v30 = vadd.f32 %v3309_v34, %v3117_v1  ;;  %v3119_v52 = vadd.f32 %v3118_v36, %v6954_v8 }
 0x26d   :  { %v3122_v58 = vpop.f32.mrf.mxu0  ;;  %v3315_v5 = vpop.f32.mrf.mxu1 }
 0x26e   :  { %7855 = vst [vmem:[#allocation13_spill] sm:$0xff] %v7209_v30  ;;  %v7212_v32 = vadd.f32 %v3311_v27, %v3119_v52  ;;  %v3123_v51 = vadd.f32 %v3122_v58, %v6946_v63 }
 0x26f   :  { %v3124_v10 = vpop.f32.mrf.mxu0  ;;  %v3317_v41 = vpop.f32.mrf.mxu1 }
 0x270   :  { %7856 = vst [vmem:[#allocation12_spill] sm:$0xff] %v7212_v32  ;;  %v7215_v12 = vadd.f32 %v3315_v5, %v3123_v51  ;;  %v3125_v18 = vadd.f32 %v3124_v10, %v6954_v8 }
 0x271   :  { %v3126_v2 = vpop.f32.mrf.mxu0  ;;  %v3319_v34 = vpop.f32.mrf.mxu1 }
 0x272   :  { %7857 = vst [vmem:[#allocation14_spill] sm:$0xff] %v7215_v12  ;;  %v7218_v25 = vadd.f32 %v3317_v41, %v3125_v18  ;;  %v3127_v1 = vadd.f32 %v3126_v2, %v6946_v63 }
 0x273   :  { %v3128_v36 = vpop.f32.mrf.mxu0  ;;  %v3321_v27 = vpop.f32.mrf.mxu1 }
 0x274   :  { %7858 = vst [vmem:[#allocation7_spill] sm:$0xff] %v7218_v25  ;;  %v7221_v30 = vadd.f32 %v3319_v34, %v3127_v1  ;;  %v3129_v52 = vadd.f32 %v3128_v36, %v6954_v8 }
 0x275   :  { %v3132_v58 = vpop.f32.mrf.mxu0  ;;  %v3325_v5 = vpop.f32.mrf.mxu1 }
 0x276   :  { %7859 = vst [vmem:[#allocation4_spill] sm:$0xff] %v7221_v30  ;;  %v7224_v32 = vadd.f32 %v3321_v27, %v3129_v52  ;;  %v3133_v51 = vadd.f32 %v3132_v58, %v6946_v63 }
 0x277   :  { %v3134_v10 = vpop.f32.mrf.mxu0  ;;  %v3327_v41 = vpop.f32.mrf.mxu1 }
 0x278   :  { %7860 = vst [vmem:[#allocation3_spill] sm:$0xff] %v7224_v32  ;;  %v7227_v12 = vadd.f32 %v3325_v5, %v3133_v51  ;;  %v3135_v18 = vadd.f32 %v3134_v10, %v6954_v8 }
 0x279   :  { %v3136_v2 = vpop.f32.mrf.mxu0  ;;  %v3329_v34 = vpop.f32.mrf.mxu1 }
 0x27a   :  { %7861 = vst [vmem:[#allocation5_spill] sm:$0xff] %v7227_v12  ;;  %v7230_v25 = vadd.f32 %v3327_v41, %v3135_v18  ;;  %v3137_v1 = vadd.f32 %v3136_v2, %v6946_v63 }
 0x27b   :  { %v3138_v36 = vpop.f32.mrf.mxu0  ;;  %v3331_v27 = vpop.f32.mrf.mxu1 }
 0x27c   :  { %7862 = vst [vmem:[#allocation15_spill] sm:$0xff] %v7230_v25  ;;  %v7233_v30 = vadd.f32 %v3329_v34, %v3137_v1  ;;  %v3139_v52 = vadd.f32 %v3138_v36, %v6954_v8 }
 0x27d   :  { %v3142_v58 = vpop.f32.mrf.mxu0  ;;  %v3335_v5 = vpop.f32.mrf.mxu1 }
 0x27e   :  { %7863 = vst [vmem:[#allocation8_spill] sm:$0xff] %v7233_v30  ;;  %v7236_v32 = vadd.f32 %v3331_v27, %v3139_v52  ;;  %v3143_v51 = vadd.f32 %v3142_v58, %v6946_v63 }
 0x27f   :  { %v3144_v10 = vpop.f32.mrf.mxu0  ;;  %v3337_v41 = vpop.f32.mrf.mxu1 }
 0x280   :  { %7864 = vst [vmem:[#allocation16_spill] sm:$0xff] %v7236_v32  ;;  %v7239_v12 = vadd.f32 %v3335_v5, %v3143_v51  ;;  %v3145_v18 = vadd.f32 %v3144_v10, %v6954_v8  ;;  %v7866_v51 = vld [vmem:[#allocation2_spill] sm:$0xff] }
 0x281   :  { %v3146_v2 = vpop.f32.mrf.mxu0  ;;  %v3339_v34 = vpop.f32.mrf.mxu1 }
 0x282   :  { %7865 = vst [vmem:[#allocation17_spill] sm:$0xff] %v7239_v12  ;;  %v7242_v25 = vadd.f32 %v3337_v41, %v3145_v18  ;;  %v3147_v1 = vadd.f32 %v3146_v2, %v6946_v63 }
 0x283   :  { %v3148_v36 = vpop.f32.mrf.mxu0  ;;  %v3341_v27 = vpop.f32.mrf.mxu1 }
 0x284   :  { %v7245_v30 = vadd.f32 %v3339_v34, %v3147_v1  ;;  %v3149_v52 = vadd.f32 %v3148_v36, %v6954_v8 }
 0x285   :  { %v3378_v58 = vpop.f32.mrf.mxu0  ;;  %v3571_v12 = vpop.f32.mrf.mxu1 }
 0x286   :  { %v7248_v32 = vadd.f32 %v3341_v27, %v3149_v52  ;;  %v3379_v5 = vadd.f32 %v3378_v58, %v7866_v51 }
 0x287   :  { %v3380_v10 = vpop.f32.mrf.mxu0  ;;  %v3573_v41 = vpop.f32.mrf.mxu1 }
 0x288   :  { %v7251_v56 = vadd.f32 %v3571_v12, %v3379_v5  ;;  %v3381_v18 = vadd.f32 %v3380_v10, %v6976_v43 }
 0x289   :  { %v3382_v63 = vpop.f32.mrf.mxu0  ;;  %v3575_v34 = vpop.f32.mrf.mxu1 }
 0x28a   :  { %v7254_v2 = vadd.f32 %v3573_v41, %v3381_v18  ;;  %v3383_v1 = vadd.f32 %v3382_v63, %v6985_v59  ;;  %v3730_v58 = vmul.f32 %v7251_v56, %v7251_v56 }
 0x28b   :  { %v3384_v8 = vpop.f32.mrf.mxu0  ;;  %v3577_v27 = vpop.f32.mrf.mxu1 }
 0x28c   :  { %7867 = vst [vmem:[#allocation2_spill] sm:$0xff] %v7254_v2  ;;  %v7257_v36 = vadd.f32 %v3575_v34, %v3383_v1  ;;  %v3385_v52 = vadd.f32 %v3384_v8, %v6994_v26  ;;  %v3731_v12 = vmul.f32 %v7254_v2, %v7254_v2 }
 0x28d   :  { %v3388_v43 = vpop.f32.mrf.mxu0  ;;  %v3581_v10 = vpop.f32.mrf.mxu1 }
 0x28e   :  { %7868 = vst [vmem:[#allocation18_spill] sm:$0xff] %v7257_v36  ;;  %v7264_v51 = vadd.f32 %v3577_v27, %v3385_v52  ;;  %v3389_v5 = vadd.f32 %v3388_v43, %v6999_v0  ;;  %v3794_v59 = vadd.f32 %v3731_v12, %v3730_v58  ;;  %v3732_v41 = vmul.f32 %v7257_v36, %v7257_v36 }
 0x28f   :  { %v3390_v18 = vpop.f32.mrf.mxu0  ;;  %v3583_v34 = vpop.f32.mrf.mxu1 }
 0x290   :  { %v3733_v26 = vmul.f32 %v7264_v51, %v7264_v51  ;;  %v7271_v63 = vadd.f32 %v3581_v10, %v3389_v5  ;;  %v3391_v1 = vadd.f32 %v3390_v18, %v7004_v22  ;;  %3795 = vadd.xlane.f32.xlu0 %v3794_v59 }
 0x291   :  { %v3392_v8 = vpop.f32.mrf.mxu0  ;;  %v3585_v27 = vpop.f32.mrf.mxu1 }
 0x292   :  { %v7274_v52 = vadd.f32 %v3583_v34, %v3391_v1  ;;  %v3393_v0 = vadd.f32 %v3392_v8, %v7013_v57  ;;  %v3797_v58 = vadd.f32 %v3733_v26, %v3732_v41  ;;  %v3734_v5 = vmul.f32 %v7271_v63, %v7271_v63 }
 0x293   :  { %v3394_v12 = vpop.f32.mrf.mxu0  ;;  %v3587_v2 = vpop.f32.mrf.mxu1 }
 0x294   :  { %v7277_v43 = vadd.f32 %v3585_v27, %v3393_v0  ;;  %v3395_v36 = vadd.f32 %v3394_v12, %v7022_v3  ;;  %3798 = vadd.xlane.f32.xlu0 %v3797_v58  ;;  %v3735_v22 = vmul.f32 %v7274_v52, %v7274_v52 }
 0x295   :  { %v3398_v10 = vpop.f32.mrf.mxu0  ;;  %v3591_v18 = vpop.f32.mrf.mxu1 }
 0x296   :  { %v7284_v59 = vadd.f32 %v3587_v2, %v3395_v36  ;;  %v3399_v57 = vadd.f32 %v3398_v10, %v7027_v14  ;;  %v3800_v41 = vadd.f32 %v3735_v22, %v3734_v5  ;;  %v3736_v1 = vmul.f32 %v7277_v43, %v7277_v43 }
 0x297   :  { %v3400_v26 = vpop.f32.mrf.mxu0  ;;  %v3593_v0 = vpop.f32.mrf.mxu1 }
 0x298   :  { %v3737_v3 = vmul.f32 %v7284_v59, %v7284_v59  ;;  %v7291_v34 = vadd.f32 %v3591_v18, %v3399_v57  ;;  %v3401_v8 = vadd.f32 %v3400_v26, %v7032_v46  ;;  %3801 = vadd.xlane.f32.xlu1 %v3800_v41 }
 0x299   :  { %v3402_v27 = vpop.f32.mrf.mxu0  ;;  %v3595_v36 = vpop.f32.mrf.mxu1 }
 0x29a   :  { %v7294_v2 = vadd.f32 %v3593_v0, %v3401_v8  ;;  %v3403_v14 = vadd.f32 %v3402_v27, %v7041_v7  ;;  %v3803_v58 = vadd.f32 %v3737_v3, %v3736_v1  ;;  %v3738_v5 = vmul.f32 %v7291_v34, %v7291_v34 }
 0x29b   :  { %v3404_v12 = vpop.f32.mrf.mxu0  ;;  %v3597_v57 = vpop.f32.mrf.mxu1 }
 0x29c   :  { %v3739_v22 = vmul.f32 %v7294_v2, %v7294_v2  ;;  %v7301_v10 = vadd.f32 %v3595_v36, %v3403_v14  ;;  %v3405_v46 = vadd.f32 %v3404_v12, %v7050_v13  ;;  %3804 = vadd.xlane.f32.xlu1 %v3803_v58 }
 0x29d   :  { %v3408_v18 = vpop.f32.mrf.mxu0  ;;  %v3601_v26 = vpop.f32.mrf.mxu1 }
 0x29e   :  { %v7304_v41 = vadd.f32 %v3597_v57, %v3405_v46  ;;  %v3409_v7 = vadd.f32 %v3408_v18, %v7055_v44  ;;  %v3806_v1 = vadd.f32 %v3739_v22, %v3738_v5  ;;  %v3740_v8 = vmul.f32 %v7301_v10, %v7301_v10 }
 0x29f   :  { %v3410_v3 = vpop.f32.mrf.mxu0  ;;  %v3603_v14 = vpop.f32.mrf.mxu1 }
 0x2a0   :  { %v3741_v0 = vmul.f32 %v7304_v41, %v7304_v41  ;;  %v7311_v27 = vadd.f32 %v3601_v26, %v3409_v7  ;;  %v3411_v13 = vadd.f32 %v3410_v3, %v7060_v35  ;;  %3807 = vadd.xlane.f32.xlu0 %v3806_v1 }
 0x2a1   :  { %v3412_v36 = vpop.f32.mrf.mxu0  ;;  %v3605_v12 = vpop.f32.mrf.mxu1 }
 0x2a2   :  { %v7314_v58 = vadd.f32 %v3603_v14, %v3411_v13  ;;  %v3413_v44 = vadd.f32 %v3412_v36, %v7069_v9  ;;  %v3809_v5 = vadd.f32 %v3741_v0, %v3740_v8  ;;  %v3742_v46 = vmul.f32 %v7311_v27, %v7311_v27 }
 0x2a3   :  { %v3414_v22 = vpop.f32.mrf.mxu0  ;;  %v3607_v7 = vpop.f32.mrf.mxu1 }
 0x2a4   :  { %v3743_v57 = vmul.f32 %v7314_v58, %v7314_v58  ;;  %v7321_v18 = vadd.f32 %v3605_v12, %v3413_v44  ;;  %v3415_v35 = vadd.f32 %v3414_v22, %v7078_v16  ;;  %3810 = vadd.xlane.f32.xlu1 %v3809_v5 }
 0x2a5   :  { %v3418_v26 = vpop.f32.mrf.mxu0  ;;  %v3611_v3 = vpop.f32.mrf.mxu1 }
 0x2a6   :  { %v7324_v1 = vadd.f32 %v3607_v7, %v3415_v35  ;;  %v3419_v9 = vadd.f32 %v3418_v26, %v7083_v53  ;;  %v3812_v8 = vadd.f32 %v3743_v57, %v3742_v46  ;;  %v3744_v13 = vmul.f32 %v7321_v18, %v7321_v18 }
 0x2a7   :  { %v3420_v0 = vpop.f32.mrf.mxu0  ;;  %v3613_v44 = vpop.f32.mrf.mxu1 }
 0x2a8   :  { %v3745_v14 = vmul.f32 %v7324_v1, %v7324_v1  ;;  %v7331_v36 = vadd.f32 %v3611_v3, %v3419_v9  ;;  %v3421_v16 = vadd.f32 %v3420_v0, %v7086_v48  ;;  %3813 = vadd.xlane.f32.xlu0 %v3812_v8 }
 0x2a9   :  { %v3422_v12 = vpop.f32.mrf.mxu0  ;;  %v3615_v22 = vpop.f32.mrf.mxu1 }
 0x2aa   :  { %v7334_v5 = vadd.f32 %v3613_v44, %v3421_v16  ;;  %v3423_v53 = vadd.f32 %v3422_v12, %v7095_v40  ;;  %v3815_v46 = vadd.f32 %v3745_v14, %v3744_v13  ;;  %v3746_v35 = vmul.f32 %v7331_v36, %v7331_v36 }
 0x2ab   :  { %v3424_v57 = vpop.f32.mrf.mxu0  ;;  %v3617_v9 = vpop.f32.mrf.mxu1 }
 0x2ac   :  { %v3747_v7 = vmul.f32 %v7334_v5, %v7334_v5  ;;  %v7341_v26 = vadd.f32 %v3615_v22, %v3423_v53  ;;  %v3425_v48 = vadd.f32 %v3424_v57, %v7106_v47  ;;  %3816 = vadd.xlane.f32.xlu1 %v3815_v46 }
 0x2ad   :  { %v3428_v3 = vpop.f32.mrf.mxu0  ;;  %v3621_v0 = vpop.f32.mrf.mxu1 }
 0x2ae   :  { %v7344_v8 = vadd.f32 %v3617_v9, %v3425_v48  ;;  %v3429_v40 = vadd.f32 %v3428_v3, %v7111_v49  ;;  %v3818_v13 = vadd.f32 %v3747_v7, %v3746_v35  ;;  %v3748_v16 = vmul.f32 %v7341_v26, %v7341_v26 }
 0x2af   :  { %v3430_v14 = vpop.f32.mrf.mxu0  ;;  %v3623_v53 = vpop.f32.mrf.mxu1 }
 0x2b0   :  { %v3749_v44 = vmul.f32 %v7344_v8, %v7344_v8  ;;  %v7351_v12 = vadd.f32 %v3621_v0, %v3429_v40  ;;  %v3431_v47 = vadd.f32 %v3430_v14, %v7114_v4  ;;  %3819 = vadd.xlane.f32.xlu0 %v3818_v13 }
 0x2b1   :  { %v3432_v22 = vpop.f32.mrf.mxu0  ;;  %v3625_v57 = vpop.f32.mrf.mxu1 }
 0x2b2   :  { %v7354_v46 = vadd.f32 %v3623_v53, %v3431_v47  ;;  %v3433_v49 = vadd.f32 %v3432_v22, %v7121_v50  ;;  %v3821_v35 = vadd.f32 %v3749_v44, %v3748_v16  ;;  %v3750_v48 = vmul.f32 %v7351_v12, %v7351_v12 }
 0x2b3   :  { %v3434_v7 = vpop.f32.mrf.mxu0  ;;  %v3627_v40 = vpop.f32.mrf.mxu1 }
 0x2b4   :  { %v3751_v9 = vmul.f32 %v7354_v46, %v7354_v46  ;;  %v7361_v3 = vadd.f32 %v3625_v57, %v3433_v49  ;;  %v3435_v4 = vadd.f32 %v3434_v7, %v7128_v54  ;;  %3822 = vadd.xlane.f32.xlu1 %v3821_v35 }
 0x2b5   :  { %v3438_v0 = vpop.f32.mrf.mxu0  ;;  %v3631_v14 = vpop.f32.mrf.mxu1 }
 0x2b6   :  { %v7364_v13 = vadd.f32 %v3627_v40, %v3435_v4  ;;  %v3439_v50 = vadd.f32 %v3438_v0, %v7131_v21  ;;  %v3824_v16 = vadd.f32 %v3751_v9, %v3750_v48  ;;  %v3752_v47 = vmul.f32 %v7361_v3, %v7361_v3 }
 0x2b7   :  { %v3440_v44 = vpop.f32.mrf.mxu0  ;;  %v3633_v49 = vpop.f32.mrf.mxu1 }
 0x2b8   :  { %v3753_v53 = vmul.f32 %v7364_v13, %v7364_v13  ;;  %v7371_v22 = vadd.f32 %v3631_v14, %v3439_v50  ;;  %v3441_v54 = vadd.f32 %v3440_v44, %v7134_v62  ;;  %3825 = vadd.xlane.f32.xlu0 %v3824_v16 }
 0x2b9   :  { %v3442_v57 = vpop.f32.mrf.mxu0  ;;  %v3635_v7 = vpop.f32.mrf.mxu1 }
 0x2ba   :  { %v7374_v35 = vadd.f32 %v3633_v49, %v3441_v54  ;;  %v3443_v21 = vadd.f32 %v3442_v57, %v7137_v20  ;;  %v3827_v48 = vadd.f32 %v3753_v53, %v3752_v47  ;;  %v3754_v4 = vmul.f32 %v7371_v22, %v7371_v22 }
 0x2bb   :  { %v3444_v9 = vpop.f32.mrf.mxu0  ;;  %v3637_v50 = vpop.f32.mrf.mxu1 }
 0x2bc   :  { %v3755_v40 = vmul.f32 %v7374_v35, %v7374_v35  ;;  %v7381_v0 = vadd.f32 %v3635_v7, %v3443_v21  ;;  %v3445_v62 = vadd.f32 %v3444_v9, %v7140_v42  ;;  %3828 = vadd.xlane.f32.xlu1 %v3827_v48 }
 0x2bd   :  { %v3448_v14 = vpop.f32.mrf.mxu0  ;;  %v3641_v44 = vpop.f32.mrf.mxu1 }
 0x2be   :  { %v7384_v16 = vadd.f32 %v3637_v50, %v3445_v62  ;;  %v3449_v20 = vadd.f32 %v3448_v14, %v7143_v17  ;;  %v3830_v47 = vadd.f32 %v3755_v40, %v3754_v4  ;;  %v3756_v54 = vmul.f32 %v7381_v0, %v7381_v0 }
 0x2bf   :  { %v3450_v53 = vpop.f32.mrf.mxu0  ;;  %v3643_v21 = vpop.f32.mrf.mxu1 }
 0x2c0   :  { %v3757_v49 = vmul.f32 %v7384_v16, %v7384_v16  ;;  %v7391_v57 = vadd.f32 %v3641_v44, %v3449_v20  ;;  %v3451_v42 = vadd.f32 %v3450_v53, %v7146_v55  ;;  %3831 = vadd.xlane.f32.xlu0 %v3830_v47 }
 0x2c1   :  { %v3452_v7 = vpop.f32.mrf.mxu0  ;;  %v3645_v9 = vpop.f32.mrf.mxu1 }
 0x2c2   :  { %v7394_v48 = vadd.f32 %v3643_v21, %v3451_v42  ;;  %v3453_v17 = vadd.f32 %v3452_v7, %v7149_v38  ;;  %v3833_v4 = vadd.f32 %v3757_v49, %v3756_v54  ;;  %v3758_v62 = vmul.f32 %v7391_v57, %v7391_v57 }
 0x2c3   :  { %v3454_v40 = vpop.f32.mrf.mxu0  ;;  %v3647_v20 = vpop.f32.mrf.mxu1 }
 0x2c4   :  { %v3759_v50 = vmul.f32 %v7394_v48, %v7394_v48  ;;  %v7401_v14 = vadd.f32 %v3645_v9, %v3453_v17  ;;  %v3455_v55 = vadd.f32 %v3454_v40, %v7152_v11  ;;  %3834 = vadd.xlane.f32.xlu1 %v3833_v4 }
 0x2c5   :  { %v3458_v44 = vpop.f32.mrf.mxu0  ;;  %v3651_v53 = vpop.f32.mrf.mxu1 }
 0x2c6   :  { %v7404_v47 = vadd.f32 %v3647_v20, %v3455_v55  ;;  %v3459_v38 = vadd.f32 %v3458_v44, %v7155_v29  ;;  %v3836_v54 = vadd.f32 %v3759_v50, %v3758_v62  ;;  %v3760_v42 = vmul.f32 %v7401_v14, %v7401_v14 }
 0x2c7   :  { %v3460_v49 = vpop.f32.mrf.mxu0  ;;  %v3653_v17 = vpop.f32.mrf.mxu1 }
 0x2c8   :  { %v3761_v21 = vmul.f32 %v7404_v47, %v7404_v47  ;;  %v7411_v7 = vadd.f32 %v3651_v53, %v3459_v38  ;;  %v3461_v11 = vadd.f32 %v3460_v49, %v7158_v45  ;;  %3837 = vadd.xlane.f32.xlu0 %v3836_v54 }
 0x2c9   :  { %v3462_v9 = vpop.f32.mrf.mxu0  ;;  %v3655_v40 = vpop.f32.mrf.mxu1 }
 0x2ca   :  { %v7414_v4 = vadd.f32 %v3653_v17, %v3461_v11  ;;  %v3463_v29 = vadd.f32 %v3462_v9, %v7161_v37  ;;  %v3839_v62 = vadd.f32 %v3761_v21, %v3760_v42  ;;  %v3762_v55 = vmul.f32 %v7411_v7, %v7411_v7 }
 0x2cb   :  { %v3464_v50 = vpop.f32.mrf.mxu0  ;;  %v3657_v38 = vpop.f32.mrf.mxu1 }
 0x2cc   :  { %v3763_v20 = vmul.f32 %v7414_v4, %v7414_v4  ;;  %v7421_v44 = vadd.f32 %v3655_v40, %v3463_v29  ;;  %v3465_v45 = vadd.f32 %v3464_v50, %v7164_v28  ;;  %3840 = vadd.xlane.f32.xlu1 %v3839_v62 }
 0x2cd   :  { %v3468_v53 = vpop.f32.mrf.mxu0  ;;  %v3661_v49 = vpop.f32.mrf.mxu1 }
 0x2ce   :  { %v7424_v54 = vadd.f32 %v3657_v38, %v3465_v45  ;;  %v3469_v37 = vadd.f32 %v3468_v53, %v7167_v24  ;;  %v3842_v42 = vadd.f32 %v3763_v20, %v3762_v55  ;;  %v3764_v11 = vmul.f32 %v7421_v44, %v7421_v44 }
 0x2cf   :  { %v3470_v21 = vpop.f32.mrf.mxu0  ;;  %v3663_v29 = vpop.f32.mrf.mxu1 }
 0x2d0   :  { %v3765_v17 = vmul.f32 %v7424_v54, %v7424_v54  ;;  %v7431_v9 = vadd.f32 %v3661_v49, %v3469_v37  ;;  %v3471_v28 = vadd.f32 %v3470_v21, %v7170_v31  ;;  %3843 = vadd.xlane.f32.xlu0 %v3842_v42 }
 0x2d1   :  { %v3472_v40 = vpop.f32.mrf.mxu0  ;;  %v3665_v50 = vpop.f32.mrf.mxu1 }
 0x2d2   :  { %v7434_v62 = vadd.f32 %v3663_v29, %v3471_v28  ;;  %v3473_v24 = vadd.f32 %v3472_v40, %v7173_v6  ;;  %v3845_v55 = vadd.f32 %v3765_v17, %v3764_v11  ;;  %v3766_v45 = vmul.f32 %v7431_v9, %v7431_v9 }
 0x2d3   :  { %v3474_v20 = vpop.f32.mrf.mxu0  ;;  %v3667_v37 = vpop.f32.mrf.mxu1 }
 0x2d4   :  { %v3767_v38 = vmul.f32 %v7434_v62, %v7434_v62  ;;  %v7441_v53 = vadd.f32 %v3665_v50, %v3473_v24  ;;  %v3475_v31 = vadd.f32 %v3474_v20, %v7176_v15  ;;  %3846 = vadd.xlane.f32.xlu1 %v3845_v55 }
 0x2d5   :  { %v3478_v49 = vpop.f32.mrf.mxu0  ;;  %v3671_v21 = vpop.f32.mrf.mxu1 }
 0x2d6   :  { %v7444_v42 = vadd.f32 %v3667_v37, %v3475_v31  ;;  %v3479_v6 = vadd.f32 %v3478_v49, %v7179_v60  ;;  %v3848_v11 = vadd.f32 %v3767_v38, %v3766_v45  ;;  %v3768_v28 = vmul.f32 %v7441_v53, %v7441_v53 }
 0x2d7   :  { %v3480_v17 = vpop.f32.mrf.mxu0  ;;  %v3673_v24 = vpop.f32.mrf.mxu1 }
 0x2d8   :  { %v3769_v29 = vmul.f32 %v7444_v42, %v7444_v42  ;;  %v7451_v40 = vadd.f32 %v3671_v21, %v3479_v6  ;;  %v3481_v15 = vadd.f32 %v3480_v17, %v7182_v19  ;;  %3849 = vadd.xlane.f32.xlu0 %v3848_v11 }
 0x2d9   :  { %v3482_v50 = vpop.f32.mrf.mxu0  ;;  %v3675_v20 = vpop.f32.mrf.mxu1 }
 0x2da   :  { %v7454_v55 = vadd.f32 %v3673_v24, %v3481_v15  ;;  %v3483_v60 = vadd.f32 %v3482_v50, %v7185_v23  ;;  %v3851_v45 = vadd.f32 %v3769_v29, %v3768_v28  ;;  %v3770_v31 = vmul.f32 %v7451_v40, %v7451_v40 }
 0x2db   :  { %v3484_v38 = vpop.f32.mrf.mxu0  ;;  %v3677_v6 = vpop.f32.mrf.mxu1 }
 0x2dc   :  { %v3771_v37 = vmul.f32 %v7454_v55, %v7454_v55  ;;  %v7461_v49 = vadd.f32 %v3675_v20, %v3483_v60  ;;  %v3485_v19 = vadd.f32 %v3484_v38, %v7188_v33  ;;  %3852 = vadd.xlane.f32.xlu1 %v3851_v45  ;;  %v7871_v38 = vld [vmem:[#allocation10_spill] sm:$0xff] }
 0x2dd   :  { %v3488_v21 = vpop.f32.mrf.mxu0  ;;  %v3681_v17 = vpop.f32.mrf.mxu1 }
 0x2de   :  { %v7464_v11 = vadd.f32 %v3677_v6, %v3485_v19  ;;  %v3489_v23 = vadd.f32 %v3488_v21, %v7191_v39  ;;  %v3854_v28 = vadd.f32 %v3771_v37, %v3770_v31  ;;  %v3772_v15 = vmul.f32 %v7461_v49, %v7461_v49 }
 0x2df   :  { %v3490_v29 = vpop.f32.mrf.mxu0  ;;  %v3683_v60 = vpop.f32.mrf.mxu1 }
 0x2e0   :  { %v3773_v24 = vmul.f32 %v7464_v11, %v7464_v11  ;;  %v7471_v50 = vadd.f32 %v3681_v17, %v3489_v23  ;;  %v3491_v33 = vadd.f32 %v3490_v29, %v7194_v61  ;;  %3855 = vadd.xlane.f32.xlu0 %v3854_v28  ;;  %v7873_v17 = vld [vmem:[#allocation9_spill] sm:$0xff] }
 0x2e1   :  { %v3492_v20 = vpop.f32.mrf.mxu0  ;;  %v3685_v19 = vpop.f32.mrf.mxu1 }
 0x2e2   :  { %7869 = vst [vmem:[#allocation19_spill] sm:$0xff] %v7471_v50  ;;  %v7474_v45 = vadd.f32 %v3683_v60, %v3491_v33  ;;  %v3493_v39 = vadd.f32 %v3492_v20, %v7871_v38  ;;  %v3857_v31 = vadd.f32 %v3773_v24, %v3772_v15  ;;  %v3774_v6 = vmul.f32 %v7471_v50, %v7471_v50  ;;  %v7875_v60 = vld [vmem:[#allocation6_spill] sm:$0xff] }
 0x2e3   :  { %v3494_v37 = vpop.f32.mrf.mxu0  ;;  %v3687_v29 = vpop.f32.mrf.mxu1 }
 0x2e4   :  { %7870 = vst [vmem:[#allocation20_spill] sm:$0xff] %v7474_v45  ;;  %v3775_v21 = vmul.f32 %v7474_v45, %v7474_v45  ;;  %v7481_v23 = vadd.f32 %v3685_v19, %v3493_v39  ;;  %v3495_v61 = vadd.f32 %v3494_v37, %v7873_v17  ;;  %3858 = vadd.xlane.f32.xlu1 %v3857_v31  ;;  %v7877_v19 = vld [vmem:[#allocation11_spill] sm:$0xff] }
 0x2e5   :  { %v3498_v28 = vpop.f32.mrf.mxu0  ;;  %v3691_v38 = vpop.f32.mrf.mxu1 }
 0x2e6   :  { %7872 = vst [vmem:[#allocation10_spill] sm:$0xff] %v7481_v23  ;;  %v7484_v33 = vadd.f32 %v3687_v29, %v3495_v61  ;;  %v3499_v20 = vadd.f32 %v3498_v28, %v7875_v60  ;;  %v3860_v15 = vadd.f32 %v3775_v21, %v3774_v6  ;;  %v3776_v50 = vmul.f32 %v7481_v23, %v7481_v23  ;;  %v7879_v29 = vld [vmem:[#allocation13_spill] sm:$0xff] }
 0x2e7   :  { %v3500_v24 = vpop.f32.mrf.mxu0  ;;  %v3693_v17 = vpop.f32.mrf.mxu1 }
 0x2e8   :  { %7874 = vst [vmem:[#allocation9_spill] sm:$0xff] %v7484_v33  ;;  %v3777_v45 = vmul.f32 %v7484_v33, %v7484_v33  ;;  %v7491_v39 = vadd.f32 %v3691_v38, %v3499_v20  ;;  %v3501_v37 = vadd.f32 %v3500_v24, %v7877_v19  ;;  %3861 = vadd.xlane.f32.xlu0 %v3860_v15  ;;  %v7881_v38 = vld [vmem:[#allocation12_spill] sm:$0xff] }
 0x2e9   :  { %v3502_v31 = vpop.f32.mrf.mxu0  ;;  %v3695_v60 = vpop.f32.mrf.mxu1 }
 0x2ea   :  { %7876 = vst [vmem:[#allocation6_spill] sm:$0xff] %v7491_v39  ;;  %v7494_v61 = vadd.f32 %v3693_v17, %v3501_v37  ;;  %v3503_v28 = vadd.f32 %v3502_v31, %v7879_v29  ;;  %v3863_v6 = vadd.f32 %v3777_v45, %v3776_v50  ;;  %v3778_v23 = vmul.f32 %v7491_v39, %v7491_v39  ;;  %v7883_v17 = vld [vmem:[#allocation14_spill] sm:$0xff] }
 0x2eb   :  { %v3504_v21 = vpop.f32.mrf.mxu0  ;;  %v3697_v19 = vpop.f32.mrf.mxu1 }
 0x2ec   :  { %7878 = vst [vmem:[#allocation11_spill] sm:$0xff] %v7494_v61  ;;  %v3779_v33 = vmul.f32 %v7494_v61, %v7494_v61  ;;  %v7501_v20 = vadd.f32 %v3695_v60, %v3503_v28  ;;  %v3505_v24 = vadd.f32 %v3504_v21, %v7881_v38  ;;  %3864 = vadd.xlane.f32.xlu1 %v3863_v6  ;;  %v7885_v60 = vld [vmem:[#allocation7_spill] sm:$0xff] }
 0x2ed   :  { %v3508_v15 = vpop.f32.mrf.mxu0  ;;  %v3701_v29 = vpop.f32.mrf.mxu1 }
 0x2ee   :  { %7880 = vst [vmem:[#allocation13_spill] sm:$0xff] %v7501_v20  ;;  %v7504_v37 = vadd.f32 %v3697_v19, %v3505_v24  ;;  %v3509_v31 = vadd.f32 %v3508_v15, %v7883_v17  ;;  %v3866_v50 = vadd.f32 %v3779_v33, %v3778_v23  ;;  %v3780_v39 = vmul.f32 %v7501_v20, %v7501_v20  ;;  %v7887_v19 = vld [vmem:[#allocation4_spill] sm:$0xff] }
 0x2ef   :  { %v3510_v45 = vpop.f32.mrf.mxu0  ;;  %v3703_v38 = vpop.f32.mrf.mxu1 }
 0x2f0   :  { %7882 = vst [vmem:[#allocation12_spill] sm:$0xff] %v7504_v37  ;;  %v3781_v61 = vmul.f32 %v7504_v37, %v7504_v37  ;;  %v7511_v28 = vadd.f32 %v3701_v29, %v3509_v31  ;;  %v3511_v21 = vadd.f32 %v3510_v45, %v7885_v60  ;;  %3867 = vadd.xlane.f32.xlu0 %v3866_v50  ;;  %v7889_v29 = vld [vmem:[#allocation3_spill] sm:$0xff] }
 0x2f1   :  { %v3512_v6 = vpop.f32.mrf.mxu0  ;;  %v3705_v17 = vpop.f32.mrf.mxu1 }
 0x2f2   :  { %7884 = vst [vmem:[#allocation14_spill] sm:$0xff] %v7511_v28  ;;  %v7514_v24 = vadd.f32 %v3703_v38, %v3511_v21  ;;  %v3513_v15 = vadd.f32 %v3512_v6, %v7887_v19  ;;  %v3869_v23 = vadd.f32 %v3781_v61, %v3780_v39  ;;  %v3782_v20 = vmul.f32 %v7511_v28, %v7511_v28  ;;  %v7891_v38 = vld [vmem:[#allocation5_spill] sm:$0xff] }
 0x2f3   :  { %v3514_v33 = vpop.f32.mrf.mxu0  ;;  %v3707_v60 = vpop.f32.mrf.mxu1 }
 0x2f4   :  { %7886 = vst [vmem:[#allocation7_spill] sm:$0xff] %v7514_v24  ;;  %v3783_v37 = vmul.f32 %v7514_v24, %v7514_v24  ;;  %v7521_v31 = vadd.f32 %v3705_v17, %v3513_v15  ;;  %v3515_v45 = vadd.f32 %v3514_v33, %v7889_v29  ;;  %3870 = vadd.xlane.f32.xlu1 %v3869_v23  ;;  %v7893_v17 = vld [vmem:[#allocation15_spill] sm:$0xff] }
 0x2f5   :  { %v3518_v50 = vpop.f32.mrf.mxu0  ;;  %v3711_v19 = vpop.f32.mrf.mxu1 }
 0x2f6   :  { %7888 = vst [vmem:[#allocation4_spill] sm:$0xff] %v7521_v31  ;;  %v7524_v21 = vadd.f32 %v3707_v60, %v3515_v45  ;;  %v3519_v6 = vadd.f32 %v3518_v50, %v7891_v38  ;;  %v3872_v39 = vadd.f32 %v3783_v37, %v3782_v20  ;;  %v3784_v28 = vmul.f32 %v7521_v31, %v7521_v31  ;;  %v7895_v60 = vld [vmem:[#allocation8_spill] sm:$0xff] }
 0x2f7   :  { %v3520_v61 = vpop.f32.mrf.mxu0  ;;  %v3713_v29 = vpop.f32.mrf.mxu1 }
 0x2f8   :  { %7890 = vst [vmem:[#allocation3_spill] sm:$0xff] %v7524_v21  ;;  %v3785_v24 = vmul.f32 %v7524_v21, %v7524_v21  ;;  %v7531_v15 = vadd.f32 %v3711_v19, %v3519_v6  ;;  %v3521_v33 = vadd.f32 %v3520_v61, %v7893_v17  ;;  %3873 = vadd.xlane.f32.xlu0 %v3872_v39  ;;  %v7896_v19 = vld [vmem:[#allocation16_spill] sm:$0xff] }
 0x2f9   :  { %v3522_v23 = vpop.f32.mrf.mxu0  ;;  %v3715_v38 = vpop.f32.mrf.mxu1 }
 0x2fa   :  { %7892 = vst [vmem:[#allocation5_spill] sm:$0xff] %v7531_v15  ;;  %v7534_v45 = vadd.f32 %v3713_v29, %v3521_v33  ;;  %v3523_v50 = vadd.f32 %v3522_v23, %v7895_v60  ;;  %v3875_v20 = vadd.f32 %v3785_v24, %v3784_v28  ;;  %v3786_v31 = vmul.f32 %v7531_v15, %v7531_v15  ;;  %v7897_v29 = vld [vmem:[#allocation17_spill] sm:$0xff] }
 0x2fb   :  { %v3524_v37 = vpop.f32.mrf.mxu0  ;;  %v3717_v17 = vpop.f32.mrf.mxu1 }
 0x2fc   :  { %7894 = vst [vmem:[#allocation15_spill] sm:$0xff] %v7534_v45  ;;  %v3787_v21 = vmul.f32 %v7534_v45, %v7534_v45  ;;  %v7541_v6 = vadd.f32 %v3715_v38, %v3523_v50  ;;  %v3525_v61 = vadd.f32 %v3524_v37, %v7896_v19  ;;  %3876 = vadd.xlane.f32.xlu1 %v3875_v20 }
 0x2fd   :  { %v3528_v39 = vpop.f32.mrf.mxu0  ;;  %v3721_v60 = vpop.f32.mrf.mxu1 }
 0x2fe   :  { %v7544_v33 = vadd.f32 %v3717_v17, %v3525_v61  ;;  %v3529_v23 = vadd.f32 %v3528_v39, %v7897_v29  ;;  %v3878_v28 = vadd.f32 %v3787_v21, %v3786_v31  ;;  %v3788_v15 = vmul.f32 %v7541_v6, %v7541_v6 }
 0x2ff   :  { %v3530_v24 = vpop.f32.mrf.mxu0  ;;  %v3723_v37 = vpop.f32.mrf.mxu1 }
 0x300   :  { %v3789_v45 = vmul.f32 %v7544_v33, %v7544_v33  ;;  %v7551_v50 = vadd.f32 %v3721_v60, %v3529_v23  ;;  %v3531_v38 = vadd.f32 %v3530_v24, %v7242_v25  ;;  %3879 = vadd.xlane.f32.xlu0 %v3878_v28 }
 0x301   :  { %v3532_v20 = vpop.f32.mrf.mxu0  ;;  %v3725_v17 = vpop.f32.mrf.mxu1 }
 0x302   :  { %v7554_v19 = vadd.f32 %v3723_v37, %v3531_v38  ;;  %v3533_v61 = vadd.f32 %v3532_v20, %v7245_v30  ;;  %v3881_v31 = vadd.f32 %v3789_v45, %v3788_v15  ;;  %v3790_v39 = vmul.f32 %v7551_v50, %v7551_v50 }
 0x303   :  { %v3534_v21 = vpop.f32.mrf.mxu0  ;;  %v3727_v60 = vpop.f32.mrf.mxu1 }
 0x304   :  { %v3791_v29 = vmul.f32 %v7554_v19, %v7554_v19  ;;  %v7561_v23 = vadd.f32 %v3725_v17, %v3533_v61  ;;  %v3535_v25 = vadd.f32 %v3534_v21, %v7248_v32  ;;  %3882 = vadd.xlane.f32.xlu1 %v3881_v31 }
 0x306   :  { %v7564_v28 = vadd.f32 %v3727_v60, %v3535_v25  ;;  %v3884_v24 = vadd.f32 %v3791_v29, %v3790_v39  ;;  %v3792_v30 = vmul.f32 %v7561_v23, %v7561_v23  ;;  %v7898_v60 = vld [vmem:[#allocation2_spill] sm:$0xff] }
 0x308   :  { %v3793_v15 = vmul.f32 %v7564_v28, %v7564_v28  ;;  %3885 = vadd.xlane.f32.xlu0 %v3884_v24 }
 0x30a   :  { %v3887_v45 = vadd.f32 %v3793_v15, %v3792_v30 }
 0x30c   :  { %3888 = vadd.xlane.f32.xlu1 %v3887_v45 }
 0x319   :  { %v3796_v38 = vpop.xlane.xlu0 %3795 }
 0x31a   :  { %v3890_v37 = vmax.f32 %v3796_v38, 1e-24 }
 0x31c   :  { %4838 = vrsqrt.f32 %v3890_v37  ;;  %v7899_v37 = vld [vmem:[#allocation18_spill] sm:$0xff] }
 0x31d   :  { %v3799_v20 = vpop.xlane.xlu0 %3798 }
 0x31e   :  { %v3891_v61 = vmax.f32 %v3799_v20, 1e-24 }
 0x320   :  { %4840 = vrsqrt.f32 %v3891_v61 }
 0x321   :  { %v3802_v32 = vpop.xlane.xlu1 %3801 }
 0x322   :  { %v3892_v17 = vmax.f32 %v3802_v32, 1e-24 }
 0x324   :  { %4842 = vrsqrt.f32 %v3892_v17 }
 0x325   :  { %v3805_v31 = vpop.xlane.xlu1 %3804 }
 0x326   :  { %v3893_v21 = vmax.f32 %v3805_v31, 1e-24 }
 0x328   :  { %4844 = vrsqrt.f32 %v3893_v21 }
 0x329   :  { %v4839_v39 = vpop.eup %4838  ;;  %v3808_v29 = vpop.xlane.xlu0 %3807 }
 0x32a   :  { %v3954_v25 = vmul.f32 %v4839_v39, %v7251_v56  ;;  %v3955_v24 = vmul.f32 %v4839_v39, %v7898_v60  ;;  %v3894_v30 = vmax.f32 %v3808_v29, 1e-24 }
 0x32c   :  { %v4566_v15 = vpack.c.bf16 %v3955_v24, %v3954_v25  ;;  %4846 = vrsqrt.f32 %v3894_v30 }
 0x32d   :  { %v4841_v45 = vpop.eup %4840  ;;  %v3811_v38 = vpop.xlane.xlu1 %3810 }
 0x32e   :  { %4210 = vst [vmem:[%s7735_s5] sm:$0xff] %v4566_v15  ;;  %v3956_v20 = vmul.f32 %v4841_v45, %v7899_v37  ;;  %v3957_v61 = vmul.f32 %v4841_v45, %v7264_v51  ;;  %v3895_v32 = vmax.f32 %v3811_v38, 1e-24 }
 0x330   :  { %v4567_v17 = vpack.c.bf16 %v3957_v61, %v3956_v20  ;;  %4848 = vrsqrt.f32 %v3895_v32 }
 0x331   :  { %v4843_v31 = vpop.eup %4842  ;;  %v3814_v56 = vpop.xlane.xlu0 %3813 }
 0x332   :  { %4211 = vst [vmem:[%s7735_s5 + $0x8] sm:$0xff] %v4567_v17  ;;  %v3958_v21 = vmul.f32 %v4843_v31, %v7271_v63  ;;  %v3959_v39 = vmul.f32 %v4843_v31, %v7274_v52  ;;  %v3896_v29 = vmax.f32 %v3814_v56, 1e-24 }
 0x334   :  { %v4568_v25 = vpack.c.bf16 %v3959_v39, %v3958_v21  ;;  %4850 = vrsqrt.f32 %v3896_v29 }
 0x335   :  { %v4845_v60 = vpop.eup %4844  ;;  %v3817_v24 = vpop.xlane.xlu1 %3816 }
 0x336   :  { %4212 = vst [vmem:[%s7735_s5 + $0x10] sm:$0xff] %v4568_v25  ;;  %v3960_v51 = vmul.f32 %v4845_v60, %v7277_v43  ;;  %v3961_v30 = vmul.f32 %v4845_v60, %v7284_v59  ;;  %v3897_v15 = vmax.f32 %v3817_v24, 1e-24 }
 0x338   :  { %v4569_v45 = vpack.c.bf16 %v3961_v30, %v3960_v51  ;;  %4852 = vrsqrt.f32 %v3897_v15 }
 0x339   :  { %v4847_v38 = vpop.eup %4846  ;;  %v3820_v63 = vpop.xlane.xlu0 %3819 }
 0x33a   :  { %4213 = vst [vmem:[%s7735_s5 + $0x18] sm:$0xff] %v4569_v45  ;;  %v3962_v52 = vmul.f32 %v4847_v38, %v7291_v34  ;;  %v3963_v37 = vmul.f32 %v4847_v38, %v7294_v2  ;;  %v3898_v20 = vmax.f32 %v3820_v63, 1e-24 }
 0x33c   :  { %v4570_v61 = vpack.c.bf16 %v3963_v37, %v3962_v52  ;;  %4854 = vrsqrt.f32 %v3898_v20 }
 0x33d   :  { %v4849_v32 = vpop.eup %4848  ;;  %v3823_v43 = vpop.xlane.xlu1 %3822 }
 0x33e   :  { %4214 = vst [vmem:[%s7735_s5 + $0x20] sm:$0xff] %v4570_v61  ;;  %v3964_v59 = vmul.f32 %v4849_v32, %v7301_v10  ;;  %v3965_v17 = vmul.f32 %v4849_v32, %v7304_v41  ;;  %v3899_v31 = vmax.f32 %v3823_v43, 1e-24 }
 0x340   :  { %v4571_v56 = vpack.c.bf16 %v3965_v17, %v3964_v59  ;;  %4856 = vrsqrt.f32 %v3899_v31 }
 0x341   :  { %v4851_v21 = vpop.eup %4850  ;;  %v3826_v34 = vpop.xlane.xlu0 %3825 }
 0x342   :  { %4215 = vst [vmem:[%s7735_s5 + $0x28] sm:$0xff] %v4571_v56  ;;  %v3966_v2 = vmul.f32 %v4851_v21, %v7311_v27  ;;  %v3967_v39 = vmul.f32 %v4851_v21, %v7314_v58  ;;  %v3900_v29 = vmax.f32 %v3826_v34, 1e-24 }
 0x344   :  { %v4572_v25 = vpack.c.bf16 %v3967_v39, %v3966_v2  ;;  %4858 = vrsqrt.f32 %v3900_v29 }
 0x345   :  { %v4853_v60 = vpop.eup %4852  ;;  %v3829_v10 = vpop.xlane.xlu1 %3828 }
 0x346   :  { %4216 = vst [vmem:[%s7735_s5 + $0x30] sm:$0xff] %v4572_v25  ;;  %v3968_v41 = vmul.f32 %v4853_v60, %v7321_v18  ;;  %v3969_v24 = vmul.f32 %v4853_v60, %v7324_v1  ;;  %v3901_v51 = vmax.f32 %v3829_v10, 1e-24 }
 0x348   :  { %v4573_v30 = vpack.c.bf16 %v3969_v24, %v3968_v41  ;;  %4860 = vrsqrt.f32 %v3901_v51 }
 0x349   :  { %v4855_v15 = vpop.eup %4854  ;;  %v3832_v27 = vpop.xlane.xlu0 %3831 }
 0x34a   :  { %4217 = vst [vmem:[%s7735_s5 + $0x38] sm:$0xff] %v4573_v30  ;;  %v3970_v58 = vmul.f32 %v4855_v15, %v7331_v36  ;;  %v3971_v45 = vmul.f32 %v4855_v15, %v7334_v5  ;;  %v3902_v38 = vmax.f32 %v3832_v27, 1e-24 }
 0x34c   :  { %v4574_v63 = vpack.c.bf16 %v3971_v45, %v3970_v58  ;;  %4862 = vrsqrt.f32 %v3902_v38 }
 0x34d   :  { %v4857_v52 = vpop.eup %4856  ;;  %v3835_v18 = vpop.xlane.xlu1 %3834 }
 0x34e   :  { %4218 = vst [vmem:[%s7735_s5 + $0x40] sm:$0xff] %v4574_v63  ;;  %v3972_v1 = vmul.f32 %v4857_v52, %v7341_v26  ;;  %v3973_v37 = vmul.f32 %v4857_v52, %v7344_v8  ;;  %v3903_v20 = vmax.f32 %v3835_v18, 1e-24 }
 0x350   :  { %v4575_v61 = vpack.c.bf16 %v3973_v37, %v3972_v1  ;;  %4864 = vrsqrt.f32 %v3903_v20 }
 0x351   :  { %v4859_v32 = vpop.eup %4858  ;;  %v3838_v36 = vpop.xlane.xlu0 %3837 }
 0x352   :  { %4219 = vst [vmem:[%s7735_s5 + $0x48] sm:$0xff] %v4575_v61  ;;  %v3974_v5 = vmul.f32 %v4859_v32, %v7351_v12  ;;  %v3975_v43 = vmul.f32 %v4859_v32, %v7354_v46  ;;  %v3904_v59 = vmax.f32 %v3838_v36, 1e-24 }
 0x354   :  { %v4576_v17 = vpack.c.bf16 %v3975_v43, %v3974_v5  ;;  %4866 = vrsqrt.f32 %v3904_v59 }
 0x355   :  { %v4861_v31 = vpop.eup %4860  ;;  %v3841_v26 = vpop.xlane.xlu1 %3840 }
 0x356   :  { %4220 = vst [vmem:[%s7735_s5 + $0x50] sm:$0xff] %v4576_v17  ;;  %v3976_v8 = vmul.f32 %v4861_v31, %v7361_v3  ;;  %v3977_v56 = vmul.f32 %v4861_v31, %v7364_v13  ;;  %v3905_v21 = vmax.f32 %v3841_v26, 1e-24 }
 0x358   :  { %v4577_v34 = vpack.c.bf16 %v3977_v56, %v3976_v8  ;;  %4868 = vrsqrt.f32 %v3905_v21 }
 0x359   :  { %v4863_v2 = vpop.eup %4862  ;;  %v3844_v12 = vpop.xlane.xlu0 %3843 }
 0x35a   :  { %4221 = vst [vmem:[%s7735_s5 + $0x58] sm:$0xff] %v4577_v34  ;;  %v3978_v46 = vmul.f32 %v4863_v2, %v7371_v22  ;;  %v3979_v39 = vmul.f32 %v4863_v2, %v7374_v35  ;;  %v3906_v29 = vmax.f32 %v3844_v12, 1e-24 }
 0x35c   :  { %v4578_v25 = vpack.c.bf16 %v3979_v39, %v3978_v46  ;;  %4870 = vrsqrt.f32 %v3906_v29 }
 0x35d   :  { %v4865_v60 = vpop.eup %4864  ;;  %v3847_v3 = vpop.xlane.xlu1 %3846 }
 0x35e   :  { %4222 = vst [vmem:[%s7735_s5 + $0x60] sm:$0xff] %v4578_v25  ;;  %v3980_v13 = vmul.f32 %v4865_v60, %v7381_v0  ;;  %v3981_v10 = vmul.f32 %v4865_v60, %v7384_v16  ;;  %v3907_v41 = vmax.f32 %v3847_v3, 1e-24 }
 0x360   :  { %v4579_v24 = vpack.c.bf16 %v3981_v10, %v3980_v13  ;;  %4872 = vrsqrt.f32 %v3907_v41  ;;  %v7901_v13 = vld [vmem:[#allocation20_spill] sm:$0xff] }
 0x361   :  { %v4867_v51 = vpop.eup %4866  ;;  %v3850_v22 = vpop.xlane.xlu0 %3849 }
 0x362   :  { %4223 = vst [vmem:[%s7735_s5 + $0x68] sm:$0xff] %v4579_v24  ;;  %v3982_v35 = vmul.f32 %v4867_v51, %v7391_v57  ;;  %v3983_v30 = vmul.f32 %v4867_v51, %v7394_v48  ;;  %v3908_v15 = vmax.f32 %v3850_v22, 1e-24 }
 0x364   :  { %v4580_v27 = vpack.c.bf16 %v3983_v30, %v3982_v35  ;;  %4874 = vrsqrt.f32 %v3908_v15  ;;  %v7903_v35 = vld [vmem:[#allocation9_spill] sm:$0xff] }
 0x365   :  { %v4869_v58 = vpop.eup %4868  ;;  %v3853_v0 = vpop.xlane.xlu1 %3852 }
 0x366   :  { %4224 = vst [vmem:[%s7735_s5 + $0x70] sm:$0xff] %v4580_v27  ;;  %v3984_v16 = vmul.f32 %v4869_v58, %v7401_v14  ;;  %v3985_v45 = vmul.f32 %v4869_v58, %v7404_v47  ;;  %v3909_v38 = vmax.f32 %v3853_v0, 1e-24 }
 0x368   :  { %v4581_v63 = vpack.c.bf16 %v3985_v45, %v3984_v16  ;;  %4876 = vrsqrt.f32 %v3909_v38  ;;  %v7904_v16 = vld [vmem:[#allocation6_spill] sm:$0xff]  ;;  %v7905_v38 = vld [vmem:[#allocation11_spill] sm:$0xff] }
 0x369   :  { %v4871_v52 = vpop.eup %4870  ;;  %v3856_v57 = vpop.xlane.xlu0 %3855 }
 0x36a   :  { %4225 = vst [vmem:[%s7735_s5 + $0x78] sm:$0xff] %v4581_v63  ;;  %v3986_v48 = vmul.f32 %v4871_v52, %v7411_v7  ;;  %v3987_v18 = vmul.f32 %v4871_v52, %v7414_v4  ;;  %v3910_v1 = vmax.f32 %v3856_v57, 1e-24 }
 0x36c   :  { %v4582_v37 = vpack.c.bf16 %v3987_v18, %v3986_v48  ;;  %4878 = vrsqrt.f32 %v3910_v1  ;;  %v7906_v1 = vld [vmem:[#allocation13_spill] sm:$0xff] }
 0x36d   :  { %v4873_v20 = vpop.eup %4872  ;;  %v3859_v14 = vpop.xlane.xlu1 %3858 }
 0x36e   :  { %4226 = vst [vmem:[%s7735_s5 + $0x80] sm:$0xff] %v4582_v37  ;;  %v3988_v47 = vmul.f32 %v4873_v20, %v7421_v44  ;;  %v3989_v61 = vmul.f32 %v4873_v20, %v7424_v54  ;;  %v3911_v32 = vmax.f32 %v3859_v14, 1e-24  ;;  %v7907_v20 = vld [vmem:[#allocation12_spill] sm:$0xff] }
 0x370   :  { %v4583_v36 = vpack.c.bf16 %v3989_v61, %v3988_v47  ;;  %4880 = vrsqrt.f32 %v3911_v32 }
 0x371   :  { %v4875_v5 = vpop.eup %4874  ;;  %v3862_v7 = vpop.xlane.xlu0 %3861 }
 0x372   :  { %4227 = vst [vmem:[%s7735_s5 + $0x88] sm:$0xff] %v4583_v36  ;;  %v3990_v4 = vmul.f32 %v4875_v5, %v7431_v9  ;;  %v3991_v43 = vmul.f32 %v4875_v5, %v7434_v62  ;;  %v3912_v59 = vmax.f32 %v3862_v7, 1e-24  ;;  %v7908_v5 = vld [vmem:[#allocation14_spill] sm:$0xff] }
 0x374   :  { %v4584_v17 = vpack.c.bf16 %v3991_v43, %v3990_v4  ;;  %4882 = vrsqrt.f32 %v3912_v59  ;;  %v7909_v4 = vld [vmem:[#allocation7_spill] sm:$0xff] }
 0x375   :  { %v4877_v31 = vpop.eup %4876  ;;  %v3865_v44 = vpop.xlane.xlu1 %3864 }
 0x376   :  { %4228 = vst [vmem:[%s7735_s5 + $0x90] sm:$0xff] %v4584_v17  ;;  %v3992_v54 = vmul.f32 %v4877_v31, %v7441_v53  ;;  %v3993_v26 = vmul.f32 %v4877_v31, %v7444_v42  ;;  %v3913_v8 = vmax.f32 %v3865_v44, 1e-24 }
 0x378   :  { %v4585_v56 = vpack.c.bf16 %v3993_v26, %v3992_v54  ;;  %4884 = vrsqrt.f32 %v3913_v8  ;;  %v7910_v54 = vld [vmem:[#allocation4_spill] sm:$0xff]  ;;  %v7911_v8 = vld [vmem:[#allocation3_spill] sm:$0xff] }
 0x379   :  { %v4879_v21 = vpop.eup %4878  ;;  %v3868_v9 = vpop.xlane.xlu0 %3867 }
 0x37a   :  { %4229 = vst [vmem:[%s7735_s5 + $0x98] sm:$0xff] %v4585_v56  ;;  %v3994_v62 = vmul.f32 %v4879_v21, %v7451_v40  ;;  %v3995_v34 = vmul.f32 %v4879_v21, %v7454_v55  ;;  %v3914_v2 = vmax.f32 %v3868_v9, 1e-24  ;;  %v7900_v55 = vld [vmem:[#allocation19_spill] sm:$0xff] }
 0x37c   :  { %v4586_v12 = vpack.c.bf16 %v3995_v34, %v3994_v62  ;;  %4886 = vrsqrt.f32 %v3914_v2  ;;  %v7912_v34 = vld [vmem:[#allocation5_spill] sm:$0xff] }
 0x37d   :  { %v4881_v46 = vpop.eup %4880  ;;  %v3871_v53 = vpop.xlane.xlu1 %3870 }
 0x37e   :  { %4230 = vst [vmem:[%s7735_s5 + $0xa0] sm:$0xff] %v4586_v12  ;;  %v3996_v42 = vmul.f32 %v4881_v46, %v7461_v49  ;;  %v3997_v39 = vmul.f32 %v4881_v46, %v7464_v11  ;;  %v3915_v29 = vmax.f32 %v3871_v53, 1e-24  ;;  %v7902_v11 = vld [vmem:[#allocation10_spill] sm:$0xff]  ;;  %v7913_v12 = vld [vmem:[#allocation15_spill] sm:$0xff] }
 0x380   :  { %v4587_v25 = vpack.c.bf16 %v3997_v39, %v3996_v42  ;;  %4888 = vrsqrt.f32 %v3915_v29 }
 0x381   :  { %v4883_v60 = vpop.eup %4882  ;;  %v3874_v40 = vpop.xlane.xlu0 %3873 }
 0x382   :  { %4231 = vst [vmem:[%s7735_s5 + $0xa8] sm:$0xff] %v4587_v25  ;;  %v3998_v3 = vmul.f32 %v4883_v60, %v7900_v55  ;;  %v3999_v10 = vmul.f32 %v4883_v60, %v7901_v13  ;;  %v3916_v41 = vmax.f32 %v3874_v40, 1e-24 }
 0x384   :  { %v4588_v24 = vpack.c.bf16 %v3999_v10, %v3998_v3  ;;  %4890 = vrsqrt.f32 %v3916_v41 }
 0x385   :  { %v4885_v51 = vpop.eup %4884  ;;  %v3877_v49 = vpop.xlane.xlu1 %3876 }
 0x386   :  { %4232 = vst [vmem:[%s7735_s5 + $0xb0] sm:$0xff] %v4588_v24  ;;  %v4000_v22 = vmul.f32 %v4885_v51, %v7902_v11  ;;  %v4001_v30 = vmul.f32 %v4885_v51, %v7903_v35  ;;  %v3917_v15 = vmax.f32 %v3877_v49, 1e-24 }
 0x388   :  { %v4589_v27 = vpack.c.bf16 %v4001_v30, %v4000_v22  ;;  %4892 = vrsqrt.f32 %v3917_v15 }
 0x389   :  { %v4887_v58 = vpop.eup %4886  ;;  %v3880_v0 = vpop.xlane.xlu0 %3879 }
 0x38a   :  { %4233 = vst [vmem:[%s7735_s5 + $0xb8] sm:$0xff] %v4589_v27  ;;  %v4002_v45 = vmul.f32 %v4887_v58, %v7904_v16  ;;  %v4003_v63 = vmul.f32 %v4887_v58, %v7905_v38  ;;  %v3918_v52 = vmax.f32 %v3880_v0, 1e-24 }
 0x38c   :  { %v4590_v57 = vpack.c.bf16 %v4003_v63, %v4002_v45  ;;  %4894 = vrsqrt.f32 %v3918_v52 }
 0x38d   :  { %v4889_v48 = vpop.eup %4888  ;;  %v3883_v18 = vpop.xlane.xlu1 %3882 }
 0x38e   :  { %4234 = vst [vmem:[%s7735_s5 + $0xc0] sm:$0xff] %v4590_v57  ;;  %v4004_v37 = vmul.f32 %v4889_v48, %v7906_v1  ;;  %v4005_v14 = vmul.f32 %v4889_v48, %v7907_v20  ;;  %v3919_v47 = vmax.f32 %v3883_v18, 1e-24 }
 0x390   :  { %v4591_v61 = vpack.c.bf16 %v4005_v14, %v4004_v37  ;;  %4896 = vrsqrt.f32 %v3919_v47 }
 0x391   :  { %v4891_v32 = vpop.eup %4890  ;;  %v3886_v36 = vpop.xlane.xlu0 %3885 }
 0x392   :  { %4235 = vst [vmem:[%s7735_s5 + $0xc8] sm:$0xff] %v4591_v61  ;;  %v4006_v7 = vmul.f32 %v4891_v32, %v7908_v5  ;;  %v4007_v43 = vmul.f32 %v4891_v32, %v7909_v4  ;;  %v3920_v59 = vmax.f32 %v3886_v36, 1e-24 }
 0x394   :  { %v4592_v17 = vpack.c.bf16 %v4007_v43, %v4006_v7  ;;  %4898 = vrsqrt.f32 %v3920_v59 }
 0x395   :  { %v4893_v31 = vpop.eup %4892  ;;  %v3889_v44 = vpop.xlane.xlu1 %3888 }
 0x396   :  { %4236 = vst [vmem:[%s7735_s5 + $0xd0] sm:$0xff] %v4592_v17  ;;  %v4008_v26 = vmul.f32 %v4893_v31, %v7910_v54  ;;  %v4009_v56 = vmul.f32 %v4893_v31, %v7911_v8  ;;  %v3921_v21 = vmax.f32 %v3889_v44, 1e-24 }
 0x398   :  { %v4593_v9 = vpack.c.bf16 %v4009_v56, %v4008_v26  ;;  %4900 = vrsqrt.f32 %v3921_v21 }
 0x399   :  { %v4895_v62 = vpop.eup %4894 }
 0x39a   :  { %4237 = vst [vmem:[%s7735_s5 + $0xd8] sm:$0xff] %v4593_v9  ;;  %v4010_v2 = vmul.f32 %v4895_v62, %v7912_v34  ;;  %v4011_v46 = vmul.f32 %v4895_v62, %v7913_v12 }
 0x39c   :  { %v4594_v53 = vpack.c.bf16 %v4011_v46, %v4010_v2 }
 0x39d   :  { %v4897_v42 = vpop.eup %4896 }
 0x39e   :  { %4238 = vst [vmem:[%s7735_s5 + $0xe0] sm:$0xff] %v4594_v53  ;;  %v4012_v39 = vmul.f32 %v4897_v42, %v7541_v6  ;;  %v4013_v29 = vmul.f32 %v4897_v42, %v7544_v33 }
 0x3a0   :  { %v4595_v25 = vpack.c.bf16 %v4013_v29, %v4012_v39 }
 0x3a1   :  { %v4899_v60 = vpop.eup %4898 }
 0x3a2   :  { %4239 = vst [vmem:[%s7735_s5 + $0xe8] sm:$0xff] %v4595_v25  ;;  %v4014_v40 = vmul.f32 %v4899_v60, %v7551_v50  ;;  %v4015_v55 = vmul.f32 %v4899_v60, %v7554_v19 }
 0x3a4   :  { %v4596_v3 = vpack.c.bf16 %v4015_v55, %v4014_v40 }
 0x3a5   :  { %v4901_v13 = vpop.eup %4900 }
 0x3a6   :  { %4240 = vst [vmem:[%s7735_s5 + $0xf0] sm:$0xff] %v4596_v3  ;;  %v4016_v6 = vmul.f32 %v4901_v13, %v7561_v23  ;;  %v4017_v33 = vmul.f32 %v4901_v13, %v7564_v28 }
 0x3a8   :  { %v4597_v10 = vpack.c.bf16 %v4017_v33, %v4016_v6 }
 0x3aa   :  { %4241 = vst [vmem:[%s7735_s5 + $0xf8] sm:$0xff] %v4597_v10 }

</bundles_post_ra>
